<compile_context>
chip_gen: v6e
topology: v6e:2x2x1
jax: 0.10.0
libtpu: 0.0.40
codegen_flags: <defaults>
</compile_context>

<pallas_src>
import functools

import jax
import jax.numpy as jnp
from jax.experimental import pallas as pl
from jax.experimental.pallas import tpu as pltpu


def _round_up(x, m):
    return (x + m - 1) // m * m


def _hw_tiling():
    """(max point tile, vmem limit) — generation aware, conservative fallback."""
    max_tile, vmem = 1024, 32 * 1024 * 1024          # safe on v7x (64 MiB VMEM)
    try:
        info = pltpu.get_tpu_info()
        if info.vmem_capacity_bytes >= 96 * 1024 * 1024:   # v5e / v6e: 128 MiB
            max_tile, vmem = 2048, 64 * 1024 * 1024
    except Exception:
        pass
    return max_tile, vmem


# ----------------------------------------------------------------------------
# Fused kernel: per-point conv MLP -> masked global max-pool -> fc chain.
# Used for both the SimpleTransformer stack and the main PointNet stack.
# ----------------------------------------------------------------------------
def _stack_kernel(*refs, n_conv, n_fc, tile_n, n_valid, has_transform):
    idx = 0
    t_ref = None
    if has_transform:
        t_ref = refs[idx]; idx += 1
    pts_ref = refs[idx]; idx += 1
    conv_w = refs[idx:idx + 2 * n_conv:2]
    conv_b = refs[idx + 1:idx + 2 * n_conv:2]
    idx += 2 * n_conv
    fc_w = refs[idx:idx + 2 * n_fc:2]
    fc_b = refs[idx + 1:idx + 2 * n_fc:2]
    idx += 2 * n_fc
    o_ref = refs[idx]
    pooled_ref = refs[idx + 1]

    nt = pl.program_id(1)

    # ---- layer 0 (Cin=3): f32 broadcast FMAs on the VPU; 3x3 transform fold --
    x = pts_ref[0]                                   # (tile_n, 3) f32 raw points
    w0 = conv_w[0][...]                              # (3, C1) f32
    if has_transform:
        # x' = x @ T^T ; layer 0: x' @ W0  ==  x @ W0fold, with
        # W0fold[j, :] = sum_i T[i, j] * W0[i, :].  T is lanes 0..8 of t_ref
        # (row-major, identity already included).
        trow = t_ref[0]                              # (1, 128) f32
        rows = []
        for j in range(3):
            r = (trow[:, j:j + 1] * w0[0:1, :]
                 + trow[:, 3 + j:4 + j] * w0[1:2, :]
                 + trow[:, 6 + j:7 + j] * w0[2:3, :])
            rows.append(r)                           # (1, C1) f32
    else:
        rows = [w0[0:1, :], w0[1:2, :], w0[2:3, :]]
    h = (x[:, 0:1] * rows[0] + x[:, 1:2] * rows[1] + x[:, 2:3] * rows[2]
         + conv_b[0][...])
    h = jnp.maximum(h, 0.0)                          # (tile_n, C1) f32

    # ---- remaining conv layers: bf16 MXU matmuls, f32 epilogue ---------------
    for li in range(1, n_conv):
        h = jnp.dot(h.astype(jnp.bfloat16), conv_w[li][...],
                    preferred_element_type=jnp.float32)
        h = jnp.maximum(h + conv_b[li][...], 0.0)

    # ---- masked per-tile max over points, running max in VMEM scratch --------
    if n_valid is not None:
        pid = jax.lax.broadcasted_iota(jnp.int32, (tile_n, 1), 0) + nt * tile_n
        h = jnp.where(pid < n_valid, h, -jnp.inf)
    tile_max = jnp.max(h, axis=0, keepdims=True)     # (1, C_last) f32

    @pl.when(nt == 0)
    def _():
        pooled_ref[...] = tile_max

    @pl.when(nt > 0)
    def _():
        pooled_ref[...] = jnp.maximum(pooled_ref[...], tile_max)

    # ---- fused fc epilogue on the resident pooled row (once per batch) -------
    @pl.when(nt == pl.num_programs(1) - 1)
    def _():
        f = pooled_ref[...]                          # (1, C_last) f32
        for lj in range(n_fc):
            f = jnp.dot(f.astype(jnp.bfloat16), fc_w[lj][...],
                        preferred_element_type=jnp.float32)
            f = f + fc_b[lj][...]
            if lj + 1 < n_fc:                        # ReLU on all but the last fc
                f = jnp.maximum(f, 0.0)
        o_ref[...] = f.astype(o_ref.dtype)[None]     # (1, 1, out_w), lane-dense


def _stack_call(points, conv_w, conv_b, fc_w, fc_b, *, t_row, n_valid, tile_n,
                vmem_limit):
    """points: (B, N_pad, 3) f32.  conv_w[i]: (C_i, C_{i+1}); fc_w[j]: (F_j, F_{j+1}).
    Returns (B, 1, fc_w[-1].shape[-1]) f32."""
    B, n_pad, cin = points.shape
    n_conv, n_fc = len(conv_w), len(fc_w)
    c_last = conv_w[-1].shape[-1]
    out_w = fc_w[-1].shape[-1]
    assert n_pad % tile_n == 0
    grid = (B, n_pad // tile_n)

    in_specs, args = [], []
    if t_row is not None:
        in_specs.append(pl.BlockSpec((1, 1, t_row.shape[-1]),
                                     lambda b, nt: (b, 0, 0)))
        args.append(t_row)
    in_specs.append(pl.BlockSpec((1, tile_n, cin), lambda b, nt: (b, nt, 0)))
    args.append(points)
    for w, bb in list(zip(conv_w, conv_b)) + list(zip(fc_w, fc_b)):
        in_specs.append(pl.BlockSpec(tuple(w.shape), lambda b, nt: (0, 0)))
        in_specs.append(pl.BlockSpec(tuple(bb.shape), lambda b, nt: (0, 0)))
        args += [w, bb]

    kernel = functools.partial(_stack_kernel, n_conv=n_conv, n_fc=n_fc,
                               tile_n=tile_n, n_valid=n_valid,
                               has_transform=t_row is not None)
    return pl.pallas_call(
        kernel,
        out_shape=jax.ShapeDtypeStruct((B, 1, out_w), jnp.float32),
        grid_spec=pltpu.PrefetchScalarGridSpec(
            num_scalar_prefetch=0,
            grid=grid,
            in_specs=in_specs,
            out_specs=pl.BlockSpec((1, 1, out_w), lambda b, nt: (b, 0, 0)),
            scratch_shapes=[pltpu.VMEM((1, c_last), jnp.float32)],
        ),
        compiler_params=pltpu.CompilerParams(
            dimension_semantics=("parallel", "arbitrary"),
            vmem_limit_bytes=vmem_limit),
    )(*args)


# ----------------------------------------------------------------------------
# Deterministic parameter construction (PyTorch-style init, BN folded)
# ----------------------------------------------------------------------------
def _init_linear(key, fan_in, fan_out):
    kw, kb = jax.random.split(key)
    bound = 1.0 / (fan_in ** 0.5)
    w = jax.random.uniform(kw, (fan_out, fan_in), jnp.float32, -bound, bound)
    b = jax.random.uniform(kb, (fan_out,), jnp.float32, -bound, bound)
    return w, b


def _init_bn(key, c):
    # Perturb PyTorch's defaults so the BN fold is exercised non-trivially.
    k1, k2, k3, k4 = jax.random.split(key, 4)
    gamma = 1.0 + 0.1 * jax.random.normal(k1, (c,), jnp.float32)
    beta = 0.1 * jax.random.normal(k2, (c,), jnp.float32)
    mean = 0.1 * jax.random.normal(k3, (c,), jnp.float32)
    var = jnp.abs(1.0 + 0.1 * jax.random.normal(k4, (c,), jnp.float32))
    return gamma, beta, mean, var


def _fold_bn(w, b, gamma, beta, mean, var, eps=1e-5):
    scale = gamma / jnp.sqrt(var + eps)
    return w * scale[:, None], (b - mean) * scale + beta


def _folded_layer(key, cin, cout, with_bn):
    kl, kb = jax.random.split(key)
    w, b = _init_linear(kl, cin, cout)
    if with_bn:
        w, b = _fold_bn(w, b, *_init_bn(kb, cout))
    return w.T, b                                     # (cin, cout), (cout,)


def build_encoder_params(key):
    # Encoder(latent=512, filters_fc=[32,128,256], desc=512, filters_conv=[512,256,128])
    #  -> SimplePointNet(512, (32,128,256), 512, (512,256,128), [0])
    keys = iter(jax.random.split(key, 16))

    def layer(cin, cout, bn):
        return _folded_layer(next(keys), cin, cout, bn)

    p = {}

    # SimpleTransformer(3) convs: 3->64->128->512 (Conv+BN+ReLU).  Layer 0 f32.
    tw, tb = [], []
    for li, (ci, co) in enumerate(zip([3, 64, 128], [64, 128, 512])):
        w, b = layer(ci, co, True)
        tw.append(w.astype(jnp.float32 if li == 0 else jnp.bfloat16))
        tb.append(b.astype(jnp.float32)[None])
    p["t_conv_w"], p["t_conv_b"] = tw, tb

    # Transformer fc: 512->256 (ReLU), 256->9 padded to 128 lanes (no ReLU),
    # identity matrix folded into the padded bias (lanes 0, 4, 8).
    w1, b1 = layer(512, 256, False)
    w2, b2 = layer(256, 9, False)
    w2p = jnp.zeros((256, 128), jnp.float32).at[:, :9].set(w2)
    b2p = jnp.zeros((128,), jnp.float32).at[:9].set(b2)
    b2p = b2p.at[jnp.array([0, 4, 8])].add(1.0)
    p["t_fc_w"] = [w1.astype(jnp.bfloat16), w2p.astype(jnp.bfloat16)]
    p["t_fc_b"] = [b1.astype(jnp.float32)[None], b2p[None]]

    # Main convs: 3->32->128->256->512 (Conv+BN+ReLU).  Layer 0 stays f32 so the
    # per-batch 3x3 transform fold happens in f32 inside the kernel.
    cw, cb = [], []
    for li, (ci, co) in enumerate(zip([3, 32, 128, 256], [32, 128, 256, 512])):
        w, b = layer(ci, co, True)
        cw.append(w.astype(jnp.float32 if li == 0 else jnp.bfloat16))
        cb.append(b.astype(jnp.float32)[None])
    p["conv_w"], p["conv_b"] = cw, cb

    # Main fc: 512->512->256->128 (Linear+BN+ReLU), final 128->512 (Linear only).
    fw, fb = [], []
    for ci, co in zip([512, 512, 256], [512, 256, 128]):
        w, b = layer(ci, co, True)
        fw.append(w.astype(jnp.bfloat16))
        fb.append(b.astype(jnp.float32)[None])
    w, b = layer(128, 512, False)
    fw.append(w.astype(jnp.bfloat16))
    fb.append(b.astype(jnp.float32)[None])
    p["fc_w"], p["fc_b"] = fw, fb
    return p


# ----------------------------------------------------------------------------
# Forward pass: 2 fused pallas_calls total
# ----------------------------------------------------------------------------
def encoder_forward(P, params):
    """P: (B, N, 3) point cloud (same convention as the PyTorch Encoder input)."""
    B, N, F = P.shape
    assert F == 3, "Unexpected shape"

    max_tile, vmem_limit = _hw_tiling()
    tile_n = min(max_tile, _round_up(N, 128))
    n_pad = _round_up(N, tile_n)
    pts = P if n_pad == N else jnp.pad(P, ((0, 0), (0, n_pad - N), (0, 0)))
    n_valid = None if n_pad == N else N

    # Kernel 1: transformer conv stack + masked max-pool + fc epilogue.
    # Output row (B, 1, 128); lanes 0..8 = flattened 3x3 transform (+ identity).
    t_row = _stack_call(pts, params["t_conv_w"], params["t_conv_b"],
                        params["t_fc_w"], params["t_fc_b"],
                        t_row=None, n_valid=n_valid, tile_n=tile_n,
                        vmem_limit=vmem_limit)

    # Kernel 2: main conv stack (transform folded into layer 0 in f32, in-kernel)
    # + masked max-pool + fused main fc chain -> latent code.
    out = _stack_call(pts, params["conv_w"], params["conv_b"],
                      params["fc_w"], params["fc_b"],
                      t_row=t_row, n_valid=n_valid, tile_n=tile_n,
                      vmem_limit=vmem_limit)
    return out[:, 0, :]


if __name__ == "__main__":
    key = jax.random.PRNGKey(0)
    kp, kx = jax.random.split(key)
    params = build_encoder_params(kp)

    B, N = 2, 64
    x = jax.random.normal(kx, (B, N, 3), jnp.float32)

    fwd = jax.jit(lambda pts: encoder_forward(pts, params))
    out = jax.block_until_ready(fwd(x))

    assert out.shape == (B, 512), out.shape
    assert bool(jnp.all(jnp.isfinite(out)))
    print("KERNEL_OK")
</pallas_src>

<mosaic_0001>
module attributes {stable_mosaic.version = 11 : i64} {
  func.func @_stack_kernel(%arg0: i32, %arg1: i32, %arg2: memref<1x128x3xf32, #tpu.memory_space<vmem>>, %arg3: memref<3x64xf32, #tpu.memory_space<vmem>>, %arg4: memref<1x64xf32, #tpu.memory_space<vmem>>, %arg5: memref<64x128xbf16, #tpu.memory_space<vmem>>, %arg6: memref<1x128xf32, #tpu.memory_space<vmem>>, %arg7: memref<128x512xbf16, #tpu.memory_space<vmem>>, %arg8: memref<1x512xf32, #tpu.memory_space<vmem>>, %arg9: memref<512x256xbf16, #tpu.memory_space<vmem>>, %arg10: memref<1x256xf32, #tpu.memory_space<vmem>>, %arg11: memref<256x128xbf16, #tpu.memory_space<vmem>>, %arg12: memref<1x128xf32, #tpu.memory_space<vmem>>, %arg13: memref<1x1x128xf32, #tpu.memory_space<vmem>>, %arg14: memref<1x512xf32, #tpu.memory_space<vmem>>) attributes {dimension_semantics = [#tpu.dimension_semantics<parallel>, #tpu.dimension_semantics<arbitrary>], iteration_bounds = array<i64: 2, 1>, scalar_prefetch = 0 : i64, scratch_operands = 1 : i64, tpu.core_type = #tpu.core_type<tc>, window_params = [{transform_indices = @transform_0, window_bounds = array<i64: 1, 128, 3>}, {pipeline_mode = #tpu.pipeline_mode<synchronous>, transform_indices = @transform_1, window_bounds = array<i64: 3, 64>}, {pipeline_mode = #tpu.pipeline_mode<synchronous>, transform_indices = @transform_2, window_bounds = array<i64: 1, 64>}, {pipeline_mode = #tpu.pipeline_mode<synchronous>, transform_indices = @transform_3, window_bounds = array<i64: 64, 128>}, {pipeline_mode = #tpu.pipeline_mode<synchronous>, transform_indices = @transform_4, window_bounds = array<i64: 1, 128>}, {pipeline_mode = #tpu.pipeline_mode<synchronous>, transform_indices = @transform_5, window_bounds = array<i64: 128, 512>}, {pipeline_mode = #tpu.pipeline_mode<synchronous>, transform_indices = @transform_6, window_bounds = array<i64: 1, 512>}, {pipeline_mode = #tpu.pipeline_mode<synchronous>, transform_indices = @transform_7, window_bounds = array<i64: 512, 256>}, {pipeline_mode = #tpu.pipeline_mode<synchronous>, transform_indices = @transform_8, window_bounds = array<i64: 1, 256>}, {pipeline_mode = #tpu.pipeline_mode<synchronous>, transform_indices = @transform_9, window_bounds = array<i64: 256, 128>}, {pipeline_mode = #tpu.pipeline_mode<synchronous>, transform_indices = @transform_10, window_bounds = array<i64: 1, 128>}, {transform_indices = @transform_11, window_bounds = array<i64: 1, 1, 128>}]} {
    %c0 = arith.constant 0 : index
    %c0_0 = arith.constant 0 : index
    %c0_1 = arith.constant 0 : index
    %0 = vector.load %arg2[%c0, %c0_0, %c0_1] : memref<1x128x3xf32, #tpu.memory_space<vmem>>, vector<1x128x3xf32>
    %1 = vector.shape_cast %0 : vector<1x128x3xf32> to vector<128x3xf32>
    %c0_2 = arith.constant 0 : index
    %c0_3 = arith.constant 0 : index
    %2 = vector.load %arg3[%c0_2, %c0_3] : memref<3x64xf32, #tpu.memory_space<vmem>>, vector<3x64xf32>
    %3 = vector.extract_strided_slice %2 {offsets = [0, 0], sizes = [1, 64], strides = [1, 1]} : vector<3x64xf32> to vector<1x64xf32>
    %4 = vector.extract_strided_slice %2 {offsets = [1, 0], sizes = [1, 64], strides = [1, 1]} : vector<3x64xf32> to vector<1x64xf32>
    %5 = vector.extract_strided_slice %2 {offsets = [2, 0], sizes = [1, 64], strides = [1, 1]} : vector<3x64xf32> to vector<1x64xf32>
    %6 = vector.extract_strided_slice %1 {offsets = [0, 0], sizes = [128, 1], strides = [1, 1]} : vector<128x3xf32> to vector<128x1xf32>
    %7 = vector.broadcast %6 : vector<128x1xf32> to vector<128x64xf32>
    %8 = vector.broadcast %3 : vector<1x64xf32> to vector<128x64xf32>
    %9 = arith.mulf %7, %8 : vector<128x64xf32>
    %10 = vector.extract_strided_slice %1 {offsets = [0, 1], sizes = [128, 1], strides = [1, 1]} : vector<128x3xf32> to vector<128x1xf32>
    %11 = vector.broadcast %10 : vector<128x1xf32> to vector<128x64xf32>
    %12 = vector.broadcast %4 : vector<1x64xf32> to vector<128x64xf32>
    %13 = arith.mulf %11, %12 : vector<128x64xf32>
    %14 = arith.addf %9, %13 : vector<128x64xf32>
    %15 = vector.extract_strided_slice %1 {offsets = [0, 2], sizes = [128, 1], strides = [1, 1]} : vector<128x3xf32> to vector<128x1xf32>
    %16 = vector.broadcast %15 : vector<128x1xf32> to vector<128x64xf32>
    %17 = vector.broadcast %5 : vector<1x64xf32> to vector<128x64xf32>
    %18 = arith.mulf %16, %17 : vector<128x64xf32>
    %19 = arith.addf %14, %18 : vector<128x64xf32>
    %c0_4 = arith.constant 0 : index
    %c0_5 = arith.constant 0 : index
    %20 = vector.load %arg4[%c0_4, %c0_5] : memref<1x64xf32, #tpu.memory_space<vmem>>, vector<1x64xf32>
    %21 = vector.broadcast %20 : vector<1x64xf32> to vector<128x64xf32>
    %22 = arith.addf %19, %21 : vector<128x64xf32>
    %cst = arith.constant 0.000000e+00 : f32
    %23 = vector.broadcast %cst : f32 to vector<128x64xf32>
    %24 = arith.maximumf %22, %23 : vector<128x64xf32>
    %25 = arith.truncf %24 : vector<128x64xf32> to vector<128x64xbf16>
    %c0_6 = arith.constant 0 : index
    %c0_7 = arith.constant 0 : index
    %26 = vector.load %arg5[%c0_6, %c0_7] : memref<64x128xbf16, #tpu.memory_space<vmem>>, vector<64x128xbf16>
    %cst_8 = arith.constant dense<0.000000e+00> : vector<128x128xf32>
    %27 = tpu.matmul %25, %26, %cst_8 {dimension_numbers = #tpu.dot_dimension_numbers<[1], [0], [0], [1], [0, 0, 1, 1], [], []>} : vector<128x64xbf16>, vector<64x128xbf16>, vector<128x128xf32> -> vector<128x128xf32>
    %c0_9 = arith.constant 0 : index
    %c0_10 = arith.constant 0 : index
    %28 = vector.load %arg6[%c0_9, %c0_10] : memref<1x128xf32, #tpu.memory_space<vmem>>, vector<1x128xf32>
    %29 = vector.broadcast %28 : vector<1x128xf32> to vector<128x128xf32>
    %30 = arith.addf %27, %29 : vector<128x128xf32>
    %cst_11 = arith.constant 0.000000e+00 : f32
    %31 = vector.broadcast %cst_11 : f32 to vector<128x128xf32>
    %32 = arith.maximumf %30, %31 : vector<128x128xf32>
    %33 = arith.truncf %32 : vector<128x128xf32> to vector<128x128xbf16>
    %c0_12 = arith.constant 0 : index
    %c0_13 = arith.constant 0 : index
    %34 = vector.load %arg7[%c0_12, %c0_13] : memref<128x512xbf16, #tpu.memory_space<vmem>>, vector<128x512xbf16>
    %cst_14 = arith.constant dense<0.000000e+00> : vector<128x512xf32>
    %35 = tpu.matmul %33, %34, %cst_14 {dimension_numbers = #tpu.dot_dimension_numbers<[1], [0], [0], [1], [0, 0, 1, 1], [], []>} : vector<128x128xbf16>, vector<128x512xbf16>, vector<128x512xf32> -> vector<128x512xf32>
    %c0_15 = arith.constant 0 : index
    %c0_16 = arith.constant 0 : index
    %36 = vector.load %arg8[%c0_15, %c0_16] : memref<1x512xf32, #tpu.memory_space<vmem>>, vector<1x512xf32>
    %37 = vector.broadcast %36 : vector<1x512xf32> to vector<128x512xf32>
    %38 = arith.addf %35, %37 : vector<128x512xf32>
    %cst_17 = arith.constant 0.000000e+00 : f32
    %39 = vector.broadcast %cst_17 : f32 to vector<128x512xf32>
    %40 = arith.maximumf %38, %39 : vector<128x512xf32>
    %41 = tpu.iota {dimensions = array<i32: 0>} : vector<128x1xi32>
    %c128_i32 = arith.constant 128 : i32
    %42 = arith.muli %arg1, %c128_i32 : i32
    %43 = vector.broadcast %42 : i32 to vector<128x1xi32>
    %44 = arith.addi %41, %43 : vector<128x1xi32>
    %c64_i32 = arith.constant 64 : i32
    %45 = vector.broadcast %c64_i32 : i32 to vector<128x1xi32>
    %46 = arith.cmpi slt, %44, %45 : vector<128x1xi32>
    %cst_18 = arith.constant 0xFF800000 : f32
    %47 = vector.shape_cast %46 : vector<128x1xi1> to vector<128x1xi1>
    %48 = vector.broadcast %47 : vector<128x1xi1> to vector<128x512xi1>
    %49 = vector.broadcast %cst_18 : f32 to vector<128x512xf32>
    %50 = arith.select %48, %40, %49 : vector<128x512xi1>, vector<128x512xf32>
    %cst_19 = arith.constant dense<0xFF800000> : vector<512xf32>
    %51 = vector.multi_reduction <maximumf>, %50, %cst_19 [0] : vector<128x512xf32> to vector<512xf32>
    %52 = vector.shape_cast %51 : vector<512xf32> to vector<1x512xf32>
    %c0_i32 = arith.constant 0 : i32
    %53 = arith.cmpi eq, %arg1, %c0_i32 : i32
    %54 = arith.extui %53 : i1 to i32
    %c0_i32_20 = arith.constant 0 : i32
    %55 = arith.cmpi ne, %54, %c0_i32_20 : i32
    scf.if %55 {
      %c0_25 = arith.constant 0 : index
      %c0_26 = arith.constant 0 : index
      %62 = vector.load %arg14[%c0_25, %c0_26] : memref<1x512xf32, #tpu.memory_space<vmem>>, vector<1x512xf32>
      tpu.vector_store %arg14[%c0_25, %c0_26], %52 {strides = array<i32>} : memref<1x512xf32, #tpu.memory_space<vmem>>, vector<1x512xf32>,
    } else {
    }
    %c0_i32_21 = arith.constant 0 : i32
    %56 = arith.cmpi sgt, %arg1, %c0_i32_21 : i32
    %57 = arith.extui %56 : i1 to i32
    %c0_i32_22 = arith.constant 0 : i32
    %58 = arith.cmpi ne, %57, %c0_i32_22 : i32
    scf.if %58 {
      %c0_25 = arith.constant 0 : index
      %c0_26 = arith.constant 0 : index
      %62 = vector.load %arg14[%c0_25, %c0_26] : memref<1x512xf32, #tpu.memory_space<vmem>>, vector<1x512xf32>
      %63 = arith.maximumf %62, %52 : vector<1x512xf32>
      %c0_27 = arith.constant 0 : index
      %c0_28 = arith.constant 0 : index
      %64 = vector.load %arg14[%c0_27, %c0_28] : memref<1x512xf32, #tpu.memory_space<vmem>>, vector<1x512xf32>
      tpu.vector_store %arg14[%c0_27, %c0_28], %63 {strides = array<i32>} : memref<1x512xf32, #tpu.memory_space<vmem>>, vector<1x512xf32>,
    } else {
    }
    %c0_i32_23 = arith.constant 0 : i32
    %59 = arith.cmpi eq, %arg1, %c0_i32_23 : i32
    %60 = arith.extui %59 : i1 to i32
    %c0_i32_24 = arith.constant 0 : i32
    %61 = arith.cmpi ne, %60, %c0_i32_24 : i32
    scf.if %61 {
      %c0_25 = arith.constant 0 : index
      %c0_26 = arith.constant 0 : index
      %62 = vector.load %arg14[%c0_25, %c0_26] : memref<1x512xf32, #tpu.memory_space<vmem>>, vector<1x512xf32>
      %63 = arith.truncf %62 : vector<1x512xf32> to vector<1x512xbf16>
      %c0_27 = arith.constant 0 : index
      %c0_28 = arith.constant 0 : index
      %64 = vector.load %arg9[%c0_27, %c0_28] : memref<512x256xbf16, #tpu.memory_space<vmem>>, vector<512x256xbf16>
      %cst_29 = arith.constant dense<0.000000e+00> : vector<1x256xf32>
      %65 = tpu.matmul %63, %64, %cst_29 {dimension_numbers = #tpu.dot_dimension_numbers<[1], [0], [0], [1], [0, 0, 1, 1], [], []>} : vector<1x512xbf16>, vector<512x256xbf16>, vector<1x256xf32> -> vector<1x256xf32>
      %c0_30 = arith.constant 0 : index
      %c0_31 = arith.constant 0 : index
      %66 = vector.load %arg10[%c0_30, %c0_31] : memref<1x256xf32, #tpu.memory_space<vmem>>, vector<1x256xf32>
      %67 = arith.addf %65, %66 : vector<1x256xf32>
      %cst_32 = arith.constant 0.000000e+00 : f32
      %68 = vector.broadcast %cst_32 : f32 to vector<1x256xf32>
      %69 = arith.maximumf %67, %68 : vector<1x256xf32>
      %70 = arith.truncf %69 : vector<1x256xf32> to vector<1x256xbf16>
      %c0_33 = arith.constant 0 : index
      %c0_34 = arith.constant 0 : index
      %71 = vector.load %arg11[%c0_33, %c0_34] : memref<256x128xbf16, #tpu.memory_space<vmem>>, vector<256x128xbf16>
      %cst_35 = arith.constant dense<0.000000e+00> : vector<1x128xf32>
      %72 = tpu.matmul %70, %71, %cst_35 {dimension_numbers = #tpu.dot_dimension_numbers<[1], [0], [0], [1], [0, 0, 1, 1], [], []>} : vector<1x256xbf16>, vector<256x128xbf16>, vector<1x128xf32> -> vector<1x128xf32>
      %c0_36 = arith.constant 0 : index
      %c0_37 = arith.constant 0 : index
      %73 = vector.load %arg12[%c0_36, %c0_37] : memref<1x128xf32, #tpu.memory_space<vmem>>, vector<1x128xf32>
      %74 = arith.addf %72, %73 : vector<1x128xf32>
      %75 = vector.shape_cast %74 : vector<1x128xf32> to vector<1x1x128xf32>
      %c0_38 = arith.constant 0 : index
      %c0_39 = arith.constant 0 : index
      %c0_40 = arith.constant 0 : index
      %76 = vector.load %arg13[%c0_38, %c0_39, %c0_40] : memref<1x1x128xf32, #tpu.memory_space<vmem>>, vector<1x1x128xf32>
      tpu.vector_store %arg13[%c0_38, %c0_39, %c0_40], %75 {strides = array<i32>} : memref<1x1x128xf32, #tpu.memory_space<vmem>>, vector<1x1x128xf32>,
    } else {
    }
    return
  }
  func.func @transform_0(%arg0: i32, %arg1: i32) -> (i32, i32, i32) {
    %c0_i32 = arith.constant 0 : i32
    %c0_i32_0 = arith.constant 0 : i32
    return %arg0, %arg1, %c0_i32 : i32, i32, i32
  }
  func.func @transform_1(%arg0: i32, %arg1: i32) -> (i32, i32) {
    %c0_i32 = arith.constant 0 : i32
    %c0_i32_0 = arith.constant 0 : i32
    %c0_i32_1 = arith.constant 0 : i32
    return %c0_i32, %c0_i32_0 : i32, i32
  }
  func.func @transform_2(%arg0: i32, %arg1: i32) -> (i32, i32) {
    %c0_i32 = arith.constant 0 : i32
    %c0_i32_0 = arith.constant 0 : i32
    %c0_i32_1 = arith.constant 0 : i32
    return %c0_i32, %c0_i32_0 : i32, i32
  }
  func.func @transform_3(%arg0: i32, %arg1: i32) -> (i32, i32) {
    %c0_i32 = arith.constant 0 : i32
    %c0_i32_0 = arith.constant 0 : i32
    %c0_i32_1 = arith.constant 0 : i32
    return %c0_i32, %c0_i32_0 : i32, i32
  }
  func.func @transform_4(%arg0: i32, %arg1: i32) -> (i32, i32) {
    %c0_i32 = arith.constant 0 : i32
    %c0_i32_0 = arith.constant 0 : i32
    %c0_i32_1 = arith.constant 0 : i32
    return %c0_i32, %c0_i32_0 : i32, i32
  }
  func.func @transform_5(%arg0: i32, %arg1: i32) -> (i32, i32) {
    %c0_i32 = arith.constant 0 : i32
    %c0_i32_0 = arith.constant 0 : i32
    %c0_i32_1 = arith.constant 0 : i32
    return %c0_i32, %c0_i32_0 : i32, i32
  }
  func.func @transform_6(%arg0: i32, %arg1: i32) -> (i32, i32) {
    %c0_i32 = arith.constant 0 : i32
    %c0_i32_0 = arith.constant 0 : i32
    %c0_i32_1 = arith.constant 0 : i32
    return %c0_i32, %c0_i32_0 : i32, i32
  }
  func.func @transform_7(%arg0: i32, %arg1: i32) -> (i32, i32) {
    %c0_i32 = arith.constant 0 : i32
    %c0_i32_0 = arith.constant 0 : i32
    %c0_i32_1 = arith.constant 0 : i32
    return %c0_i32, %c0_i32_0 : i32, i32
  }
  func.func @transform_8(%arg0: i32, %arg1: i32) -> (i32, i32) {
    %c0_i32 = arith.constant 0 : i32
    %c0_i32_0 = arith.constant 0 : i32
    %c0_i32_1 = arith.constant 0 : i32
    return %c0_i32, %c0_i32_0 : i32, i32
  }
  func.func @transform_9(%arg0: i32, %arg1: i32) -> (i32, i32) {
    %c0_i32 = arith.constant 0 : i32
    %c0_i32_0 = arith.constant 0 : i32
    %c0_i32_1 = arith.constant 0 : i32
    return %c0_i32, %c0_i32_0 : i32, i32
  }
  func.func @transform_10(%arg0: i32, %arg1: i32) -> (i32, i32) {
    %c0_i32 = arith.constant 0 : i32
    %c0_i32_0 = arith.constant 0 : i32
    %c0_i32_1 = arith.constant 0 : i32
    return %c0_i32, %c0_i32_0 : i32, i32
  }
  func.func @transform_11(%arg0: i32, %arg1: i32) -> (i32, i32, i32) {
    %c0_i32 = arith.constant 0 : i32
    %c0_i32_0 = arith.constant 0 : i32
    %c0_i32_1 = arith.constant 0 : i32
    return %arg0, %c0_i32, %c0_i32_0 : i32, i32, i32
  }
}

module attributes {stable_mosaic.version = 11 : i64} {
  func.func @_stack_kernel(%arg0: i32, %arg1: i32, %arg2: memref<1x1x128xf32, #tpu.memory_space<vmem>>, %arg3: memref<1x128x3xf32, #tpu.memory_space<vmem>>, %arg4: memref<3x32xf32, #tpu.memory_space<vmem>>, %arg5: memref<1x32xf32, #tpu.memory_space<vmem>>, %arg6: memref<32x128xbf16, #tpu.memory_space<vmem>>, %arg7: memref<1x128xf32, #tpu.memory_space<vmem>>, %arg8: memref<128x256xbf16, #tpu.memory_space<vmem>>, %arg9: memref<1x256xf32, #tpu.memory_space<vmem>>, %arg10: memref<256x512xbf16, #tpu.memory_space<vmem>>, %arg11: memref<1x512xf32, #tpu.memory_space<vmem>>, %arg12: memref<512x512xbf16, #tpu.memory_space<vmem>>, %arg13: memref<1x512xf32, #tpu.memory_space<vmem>>, %arg14: memref<512x256xbf16, #tpu.memory_space<vmem>>, %arg15: memref<1x256xf32, #tpu.memory_space<vmem>>, %arg16: memref<256x128xbf16, #tpu.memory_space<vmem>>, %arg17: memref<1x128xf32, #tpu.memory_space<vmem>>, %arg18: memref<128x512xbf16, #tpu.memory_space<vmem>>, %arg19: memref<1x512xf32, #tpu.memory_space<vmem>>, %arg20: memref<1x1x512xf32, #tpu.memory_space<vmem>>, %arg21: memref<1x512xf32, #tpu.memory_space<vmem>>) attributes {dimension_semantics = [#tpu.dimension_semantics<parallel>, #tpu.dimension_semantics<arbitrary>], iteration_bounds = array<i64: 2, 1>, scalar_prefetch = 0 : i64, scratch_operands = 1 : i64, tpu.core_type = #tpu.core_type<tc>, window_params = [{transform_indices = @transform_0, window_bounds = array<i64: 1, 1, 128>}, {transform_indices = @transform_1, window_bounds = array<i64: 1, 128, 3>}, {pipeline_mode = #tpu.pipeline_mode<synchronous>, transform_indices = @transform_2, window_bounds = array<i64: 3, 32>}, {pipeline_mode = #tpu.pipeline_mode<synchronous>, transform_indices = @transform_3, window_bounds = array<i64: 1, 32>}, {pipeline_mode = #tpu.pipeline_mode<synchronous>, transform_indices = @transform_4, window_bounds = array<i64: 32, 128>}, {pipeline_mode = #tpu.pipeline_mode<synchronous>, transform_indices = @transform_5, window_bounds = array<i64: 1, 128>}, {pipeline_mode = #tpu.pipeline_mode<synchronous>, transform_indices = @transform_6, window_bounds = array<i64: 128, 256>}, {pipeline_mode = #tpu.pipeline_mode<synchronous>, transform_indices = @transform_7, window_bounds = array<i64: 1, 256>}, {pipeline_mode = #tpu.pipeline_mode<synchronous>, transform_indices = @transform_8, window_bounds = array<i64: 256, 512>}, {pipeline_mode = #tpu.pipeline_mode<synchronous>, transform_indices = @transform_9, window_bounds = array<i64: 1, 512>}, {pipeline_mode = #tpu.pipeline_mode<synchronous>, transform_indices = @transform_10, window_bounds = array<i64: 512, 512>}, {pipeline_mode = #tpu.pipeline_mode<synchronous>, transform_indices = @transform_11, window_bounds = array<i64: 1, 512>}, {pipeline_mode = #tpu.pipeline_mode<synchronous>, transform_indices = @transform_12, window_bounds = array<i64: 512, 256>}, {pipeline_mode = #tpu.pipeline_mode<synchronous>, transform_indices = @transform_13, window_bounds = array<i64: 1, 256>}, {pipeline_mode = #tpu.pipeline_mode<synchronous>, transform_indices = @transform_14, window_bounds = array<i64: 256, 128>}, {pipeline_mode = #tpu.pipeline_mode<synchronous>, transform_indices = @transform_15, window_bounds = array<i64: 1, 128>}, {pipeline_mode = #tpu.pipeline_mode<synchronous>, transform_indices = @transform_16, window_bounds = array<i64: 128, 512>}, {pipeline_mode = #tpu.pipeline_mode<synchronous>, transform_indices = @transform_17, window_bounds = array<i64: 1, 512>}, {transform_indices = @transform_18, window_bounds = array<i64: 1, 1, 512>}]} {
    %c0 = arith.constant 0 : index
    %c0_0 = arith.constant 0 : index
    %c0_1 = arith.constant 0 : index
    %0 = vector.load %arg3[%c0, %c0_0, %c0_1] : memref<1x128x3xf32, #tpu.memory_space<vmem>>, vector<1x128x3xf32>
    %1 = vector.shape_cast %0 : vector<1x128x3xf32> to vector<128x3xf32>
    %c0_2 = arith.constant 0 : index
    %c0_3 = arith.constant 0 : index
    %2 = vector.load %arg4[%c0_2, %c0_3] : memref<3x32xf32, #tpu.memory_space<vmem>>, vector<3x32xf32>
    %c0_4 = arith.constant 0 : index
    %c0_5 = arith.constant 0 : index
    %c0_6 = arith.constant 0 : index
    %3 = vector.load %arg2[%c0_4, %c0_5, %c0_6] : memref<1x1x128xf32, #tpu.memory_space<vmem>>, vector<1x1x128xf32>
    %4 = vector.shape_cast %3 : vector<1x1x128xf32> to vector<1x128xf32>
    %5 = vector.extract_strided_slice %4 {offsets = [0, 0], sizes = [1, 1], strides = [1, 1]} : vector<1x128xf32> to vector<1x1xf32>
    %6 = vector.extract_strided_slice %2 {offsets = [0, 0], sizes = [1, 32], strides = [1, 1]} : vector<3x32xf32> to vector<1x32xf32>
    %7 = vector.broadcast %5 : vector<1x1xf32> to vector<1x32xf32>
    %8 = arith.mulf %7, %6 : vector<1x32xf32>
    %9 = vector.extract_strided_slice %4 {offsets = [0, 3], sizes = [1, 1], strides = [1, 1]} : vector<1x128xf32> to vector<1x1xf32>
    %10 = vector.extract_strided_slice %2 {offsets = [1, 0], sizes = [1, 32], strides = [1, 1]} : vector<3x32xf32> to vector<1x32xf32>
    %11 = vector.broadcast %9 : vector<1x1xf32> to vector<1x32xf32>
    %12 = arith.mulf %11, %10 : vector<1x32xf32>
    %13 = arith.addf %8, %12 : vector<1x32xf32>
    %14 = vector.extract_strided_slice %4 {offsets = [0, 6], sizes = [1, 1], strides = [1, 1]} : vector<1x128xf32> to vector<1x1xf32>
    %15 = vector.extract_strided_slice %2 {offsets = [2, 0], sizes = [1, 32], strides = [1, 1]} : vector<3x32xf32> to vector<1x32xf32>
    %16 = vector.broadcast %14 : vector<1x1xf32> to vector<1x32xf32>
    %17 = arith.mulf %16, %15 : vector<1x32xf32>
    %18 = arith.addf %13, %17 : vector<1x32xf32>
    %19 = vector.extract_strided_slice %4 {offsets = [0, 1], sizes = [1, 1], strides = [1, 1]} : vector<1x128xf32> to vector<1x1xf32>
    %20 = vector.extract_strided_slice %2 {offsets = [0, 0], sizes = [1, 32], strides = [1, 1]} : vector<3x32xf32> to vector<1x32xf32>
    %21 = vector.broadcast %19 : vector<1x1xf32> to vector<1x32xf32>
    %22 = arith.mulf %21, %20 : vector<1x32xf32>
    %23 = vector.extract_strided_slice %4 {offsets = [0, 4], sizes = [1, 1], strides = [1, 1]} : vector<1x128xf32> to vector<1x1xf32>
    %24 = vector.extract_strided_slice %2 {offsets = [1, 0], sizes = [1, 32], strides = [1, 1]} : vector<3x32xf32> to vector<1x32xf32>
    %25 = vector.broadcast %23 : vector<1x1xf32> to vector<1x32xf32>
    %26 = arith.mulf %25, %24 : vector<1x32xf32>
    %27 = arith.addf %22, %26 : vector<1x32xf32>
    %28 = vector.extract_strided_slice %4 {offsets = [0, 7], sizes = [1, 1], strides = [1, 1]} : vector<1x128xf32> to vector<1x1xf32>
    %29 = vector.extract_strided_slice %2 {offsets = [2, 0], sizes = [1, 32], strides = [1, 1]} : vector<3x32xf32> to vector<1x32xf32>
    %30 = vector.broadcast %28 : vector<1x1xf32> to vector<1x32xf32>
    %31 = arith.mulf %30, %29 : vector<1x32xf32>
    %32 = arith.addf %27, %31 : vector<1x32xf32>
    %33 = vector.extract_strided_slice %4 {offsets = [0, 2], sizes = [1, 1], strides = [1, 1]} : vector<1x128xf32> to vector<1x1xf32>
    %34 = vector.extract_strided_slice %2 {offsets = [0, 0], sizes = [1, 32], strides = [1, 1]} : vector<3x32xf32> to vector<1x32xf32>
    %35 = vector.broadcast %33 : vector<1x1xf32> to vector<1x32xf32>
    %36 = arith.mulf %35, %34 : vector<1x32xf32>
    %37 = vector.extract_strided_slice %4 {offsets = [0, 5], sizes = [1, 1], strides = [1, 1]} : vector<1x128xf32> to vector<1x1xf32>
    %38 = vector.extract_strided_slice %2 {offsets = [1, 0], sizes = [1, 32], strides = [1, 1]} : vector<3x32xf32> to vector<1x32xf32>
    %39 = vector.broadcast %37 : vector<1x1xf32> to vector<1x32xf32>
    %40 = arith.mulf %39, %38 : vector<1x32xf32>
    %41 = arith.addf %36, %40 : vector<1x32xf32>
    %42 = vector.extract_strided_slice %4 {offsets = [0, 8], sizes = [1, 1], strides = [1, 1]} : vector<1x128xf32> to vector<1x1xf32>
    %43 = vector.extract_strided_slice %2 {offsets = [2, 0], sizes = [1, 32], strides = [1, 1]} : vector<3x32xf32> to vector<1x32xf32>
    %44 = vector.broadcast %42 : vector<1x1xf32> to vector<1x32xf32>
    %45 = arith.mulf %44, %43 : vector<1x32xf32>
    %46 = arith.addf %41, %45 : vector<1x32xf32>
    %47 = vector.extract_strided_slice %1 {offsets = [0, 0], sizes = [128, 1], strides = [1, 1]} : vector<128x3xf32> to vector<128x1xf32>
    %48 = vector.broadcast %47 : vector<128x1xf32> to vector<128x32xf32>
    %49 = vector.broadcast %18 : vector<1x32xf32> to vector<128x32xf32>
    %50 = arith.mulf %48, %49 : vector<128x32xf32>
    %51 = vector.extract_strided_slice %1 {offsets = [0, 1], sizes = [128, 1], strides = [1, 1]} : vector<128x3xf32> to vector<128x1xf32>
    %52 = vector.broadcast %51 : vector<128x1xf32> to vector<128x32xf32>
    %53 = vector.broadcast %32 : vector<1x32xf32> to vector<128x32xf32>
    %54 = arith.mulf %52, %53 : vector<128x32xf32>
    %55 = arith.addf %50, %54 : vector<128x32xf32>
    %56 = vector.extract_strided_slice %1 {offsets = [0, 2], sizes = [128, 1], strides = [1, 1]} : vector<128x3xf32> to vector<128x1xf32>
    %57 = vector.broadcast %56 : vector<128x1xf32> to vector<128x32xf32>
    %58 = vector.broadcast %46 : vector<1x32xf32> to vector<128x32xf32>
    %59 = arith.mulf %57, %58 : vector<128x32xf32>
    %60 = arith.addf %55, %59 : vector<128x32xf32>
    %c0_7 = arith.constant 0 : index
    %c0_8 = arith.constant 0 : index
    %61 = vector.load %arg5[%c0_7, %c0_8] : memref<1x32xf32, #tpu.memory_space<vmem>>, vector<1x32xf32>
    %62 = vector.broadcast %61 : vector<1x32xf32> to vector<128x32xf32>
    %63 = arith.addf %60, %62 : vector<128x32xf32>
    %cst = arith.constant 0.000000e+00 : f32
    %64 = vector.broadcast %cst : f32 to vector<128x32xf32>
    %65 = arith.maximumf %63, %64 : vector<128x32xf32>
    %66 = arith.truncf %65 : vector<128x32xf32> to vector<128x32xbf16>
    %c0_9 = arith.constant 0 : index
    %c0_10 = arith.constant 0 : index
    %67 = vector.load %arg6[%c0_9, %c0_10] : memref<32x128xbf16, #tpu.memory_space<vmem>>, vector<32x128xbf16>
    %cst_11 = arith.constant dense<0.000000e+00> : vector<128x128xf32>
    %68 = tpu.matmul %66, %67, %cst_11 {dimension_numbers = #tpu.dot_dimension_numbers<[1], [0], [0], [1], [0, 0, 1, 1], [], []>} : vector<128x32xbf16>, vector<32x128xbf16>, vector<128x128xf32> -> vector<128x128xf32>
    %c0_12 = arith.constant 0 : index
    %c0_13 = arith.constant 0 : index
    %69 = vector.load %arg7[%c0_12, %c0_13] : memref<1x128xf32, #tpu.memory_space<vmem>>, vector<1x128xf32>
    %70 = vector.broadcast %69 : vector<1x128xf32> to vector<128x128xf32>
    %71 = arith.addf %68, %70 : vector<128x128xf32>
    %cst_14 = arith.constant 0.000000e+00 : f32
    %72 = vector.broadcast %cst_14 : f32 to vector<128x128xf32>
    %73 = arith.maximumf %71, %72 : vector<128x128xf32>
    %74 = arith.truncf %73 : vector<128x128xf32> to vector<128x128xbf16>
    %c0_15 = arith.constant 0 : index
    %c0_16 = arith.constant 0 : index
    %75 = vector.load %arg8[%c0_15, %c0_16] : memref<128x256xbf16, #tpu.memory_space<vmem>>, vector<128x256xbf16>
    %cst_17 = arith.constant dense<0.000000e+00> : vector<128x256xf32>
    %76 = tpu.matmul %74, %75, %cst_17 {dimension_numbers = #tpu.dot_dimension_numbers<[1], [0], [0], [1], [0, 0, 1, 1], [], []>} : vector<128x128xbf16>, vector<128x256xbf16>, vector<128x256xf32> -> vector<128x256xf32>
    %c0_18 = arith.constant 0 : index
    %c0_19 = arith.constant 0 : index
    %77 = vector.load %arg9[%c0_18, %c0_19] : memref<1x256xf32, #tpu.memory_space<vmem>>, vector<1x256xf32>
    %78 = vector.broadcast %77 : vector<1x256xf32> to vector<128x256xf32>
    %79 = arith.addf %76, %78 : vector<128x256xf32>
    %cst_20 = arith.constant 0.000000e+00 : f32
    %80 = vector.broadcast %cst_20 : f32 to vector<128x256xf32>
    %81 = arith.maximumf %79, %80 : vector<128x256xf32>
    %82 = arith.truncf %81 : vector<128x256xf32> to vector<128x256xbf16>
    %c0_21 = arith.constant 0 : index
    %c0_22 = arith.constant 0 : index
    %83 = vector.load %arg10[%c0_21, %c0_22] : memref<256x512xbf16, #tpu.memory_space<vmem>>, vector<256x512xbf16>
    %cst_23 = arith.constant dense<0.000000e+00> : vector<128x512xf32>
    %84 = tpu.matmul %82, %83, %cst_23 {dimension_numbers = #tpu.dot_dimension_numbers<[1], [0], [0], [1], [0, 0, 1, 1], [], []>} : vector<128x256xbf16>, vector<256x512xbf16>, vector<128x512xf32> -> vector<128x512xf32>
    %c0_24 = arith.constant 0 : index
    %c0_25 = arith.constant 0 : index
    %85 = vector.load %arg11[%c0_24, %c0_25] : memref<1x512xf32, #tpu.memory_space<vmem>>, vector<1x512xf32>
    %86 = vector.broadcast %85 : vector<1x512xf32> to vector<128x512xf32>
    %87 = arith.addf %84, %86 : vector<128x512xf32>
    %cst_26 = arith.constant 0.000000e+00 : f32
    %88 = vector.broadcast %cst_26 : f32 to vector<128x512xf32>
    %89 = arith.maximumf %87, %88 : vector<128x512xf32>
    %90 = tpu.iota {dimensions = array<i32: 0>} : vector<128x1xi32>
    %c128_i32 = arith.constant 128 : i32
    %91 = arith.muli %arg1, %c128_i32 : i32
    %92 = vector.broadcast %91 : i32 to vector<128x1xi32>
    %93 = arith.addi %90, %92 : vector<128x1xi32>
    %c64_i32 = arith.constant 64 : i32
    %94 = vector.broadcast %c64_i32 : i32 to vector<128x1xi32>
    %95 = arith.cmpi slt, %93, %94 : vector<128x1xi32>
    %cst_27 = arith.constant 0xFF800000 : f32
    %96 = vector.shape_cast %95 : vector<128x1xi1> to vector<128x1xi1>
    %97 = vector.broadcast %96 : vector<128x1xi1> to vector<128x512xi1>
    %98 = vector.broadcast %cst_27 : f32 to vector<128x512xf32>
    %99 = arith.select %97, %89, %98 : vector<128x512xi1>, vector<128x512xf32>
    %cst_28 = arith.constant dense<0xFF800000> : vector<512xf32>
    %100 = vector.multi_reduction <maximumf>, %99, %cst_28 [0] : vector<128x512xf32> to vector<512xf32>
    %101 = vector.shape_cast %100 : vector<512xf32> to vector<1x512xf32>
    %c0_i32 = arith.constant 0 : i32
    %102 = arith.cmpi eq, %arg1, %c0_i32 : i32
    %103 = arith.extui %102 : i1 to i32
    %c0_i32_29 = arith.constant 0 : i32
    %104 = arith.cmpi ne, %103, %c0_i32_29 : i32
    scf.if %104 {
      %c0_34 = arith.constant 0 : index
      %c0_35 = arith.constant 0 : index
      %111 = vector.load %arg21[%c0_34, %c0_35] : memref<1x512xf32, #tpu.memory_space<vmem>>, vector<1x512xf32>
      tpu.vector_store %arg21[%c0_34, %c0_35], %101 {strides = array<i32>} : memref<1x512xf32, #tpu.memory_space<vmem>>, vector<1x512xf32>,
    } else {
    }
    %c0_i32_30 = arith.constant 0 : i32
    %105 = arith.cmpi sgt, %arg1, %c0_i32_30 : i32
    %106 = arith.extui %105 : i1 to i32
    %c0_i32_31 = arith.constant 0 : i32
    %107 = arith.cmpi ne, %106, %c0_i32_31 : i32
    scf.if %107 {
      %c0_34 = arith.constant 0 : index
      %c0_35 = arith.constant 0 : index
      %111 = vector.load %arg21[%c0_34, %c0_35] : memref<1x512xf32, #tpu.memory_space<vmem>>, vector<1x512xf32>
      %112 = arith.maximumf %111, %101 : vector<1x512xf32>
      %c0_36 = arith.constant 0 : index
      %c0_37 = arith.constant 0 : index
      %113 = vector.load %arg21[%c0_36, %c0_37] : memref<1x512xf32, #tpu.memory_space<vmem>>, vector<1x512xf32>
      tpu.vector_store %arg21[%c0_36, %c0_37], %112 {strides = array<i32>} : memref<1x512xf32, #tpu.memory_space<vmem>>, vector<1x512xf32>,
    } else {
    }
    %c0_i32_32 = arith.constant 0 : i32
    %108 = arith.cmpi eq, %arg1, %c0_i32_32 : i32
    %109 = arith.extui %108 : i1 to i32
    %c0_i32_33 = arith.constant 0 : i32
    %110 = arith.cmpi ne, %109, %c0_i32_33 : i32
    scf.if %110 {
      %c0_34 = arith.constant 0 : index
      %c0_35 = arith.constant 0 : index
      %111 = vector.load %arg21[%c0_34, %c0_35] : memref<1x512xf32, #tpu.memory_space<vmem>>, vector<1x512xf32>
      %112 = arith.truncf %111 : vector<1x512xf32> to vector<1x512xbf16>
      %c0_36 = arith.constant 0 : index
      %c0_37 = arith.constant 0 : index
      %113 = vector.load %arg12[%c0_36, %c0_37] : memref<512x512xbf16, #tpu.memory_space<vmem>>, vector<512x512xbf16>
      %cst_38 = arith.constant dense<0.000000e+00> : vector<1x512xf32>
      %114 = tpu.matmul %112, %113, %cst_38 {dimension_numbers = #tpu.dot_dimension_numbers<[1], [0], [0], [1], [0, 0, 1, 1], [], []>} : vector<1x512xbf16>, vector<512x512xbf16>, vector<1x512xf32> -> vector<1x512xf32>
      %c0_39 = arith.constant 0 : index
      %c0_40 = arith.constant 0 : index
      %115 = vector.load %arg13[%c0_39, %c0_40] : memref<1x512xf32, #tpu.memory_space<vmem>>, vector<1x512xf32>
      %116 = arith.addf %114, %115 : vector<1x512xf32>
      %cst_41 = arith.constant 0.000000e+00 : f32
      %117 = vector.broadcast %cst_41 : f32 to vector<1x512xf32>
      %118 = arith.maximumf %116, %117 : vector<1x512xf32>
      %119 = arith.truncf %118 : vector<1x512xf32> to vector<1x512xbf16>
      %c0_42 = arith.constant 0 : index
      %c0_43 = arith.constant 0 : index
      %120 = vector.load %arg14[%c0_42, %c0_43] : memref<512x256xbf16, #tpu.memory_space<vmem>>, vector<512x256xbf16>
      %cst_44 = arith.constant dense<0.000000e+00> : vector<1x256xf32>
      %121 = tpu.matmul %119, %120, %cst_44 {dimension_numbers = #tpu.dot_dimension_numbers<[1], [0], [0], [1], [0, 0, 1, 1], [], []>} : vector<1x512xbf16>, vector<512x256xbf16>, vector<1x256xf32> -> vector<1x256xf32>
      %c0_45 = arith.constant 0 : index
      %c0_46 = arith.constant 0 : index
      %122 = vector.load %arg15[%c0_45, %c0_46] : memref<1x256xf32, #tpu.memory_space<vmem>>, vector<1x256xf32>
      %123 = arith.addf %121, %122 : vector<1x256xf32>
      %cst_47 = arith.constant 0.000000e+00 : f32
      %124 = vector.broadcast %cst_47 : f32 to vector<1x256xf32>
      %125 = arith.maximumf %123, %124 : vector<1x256xf32>
      %126 = arith.truncf %125 : vector<1x256xf32> to vector<1x256xbf16>
      %c0_48 = arith.constant 0 : index
      %c0_49 = arith.constant 0 : index
      %127 = vector.load %arg16[%c0_48, %c0_49] : memref<256x128xbf16, #tpu.memory_space<vmem>>, vector<256x128xbf16>
      %cst_50 = arith.constant dense<0.000000e+00> : vector<1x128xf32>
      %128 = tpu.matmul %126, %127, %cst_50 {dimension_numbers = #tpu.dot_dimension_numbers<[1], [0], [0], [1], [0, 0, 1, 1], [], []>} : vector<1x256xbf16>, vector<256x128xbf16>, vector<1x128xf32> -> vector<1x128xf32>
      %c0_51 = arith.constant 0 : index
      %c0_52 = arith.constant 0 : index
      %129 = vector.load %arg17[%c0_51, %c0_52] : memref<1x128xf32, #tpu.memory_space<vmem>>, vector<1x128xf32>
      %130 = arith.addf %128, %129 : vector<1x128xf32>
      %cst_53 = arith.constant 0.000000e+00 : f32
      %131 = vector.broadcast %cst_53 : f32 to vector<1x128xf32>
      %132 = arith.maximumf %130, %131 : vector<1x128xf32>
      %133 = arith.truncf %132 : vector<1x128xf32> to vector<1x128xbf16>
      %c0_54 = arith.constant 0 : index
      %c0_55 = arith.constant 0 : index
      %134 = vector.load %arg18[%c0_54, %c0_55] : memref<128x512xbf16, #tpu.memory_space<vmem>>, vector<128x512xbf16>
      %cst_56 = arith.constant dense<0.000000e+00> : vector<1x512xf32>
      %135 = tpu.matmul %133, %134, %cst_56 {dimension_numbers = #tpu.dot_dimension_numbers<[1], [0], [0], [1], [0, 0, 1, 1], [], []>} : vector<1x128xbf16>, vector<128x512xbf16>, vector<1x512xf32> -> vector<1x512xf32>
      %c0_57 = arith.constant 0 : index
      %c0_58 = arith.constant 0 : index
      %136 = vector.load %arg19[%c0_57, %c0_58] : memref<1x512xf32, #tpu.memory_space<vmem>>, vector<1x512xf32>
      %137 = arith.addf %135, %136 : vector<1x512xf32>
      %138 = vector.shape_cast %137 : vector<1x512xf32> to vector<1x1x512xf32>
      %c0_59 = arith.constant 0 : index
      %c0_60 = arith.constant 0 : index
      %c0_61 = arith.constant 0 : index
      %139 = vector.load %arg20[%c0_59, %c0_60, %c0_61] : memref<1x1x512xf32, #tpu.memory_space<vmem>>, vector<1x1x512xf32>
      tpu.vector_store %arg20[%c0_59, %c0_60, %c0_61], %138 {strides = array<i32>} : memref<1x1x512xf32, #tpu.memory_space<vmem>>, vector<1x1x512xf32>,
    } else {
    }
    return
  }
  func.func @transform_0(%arg0: i32, %arg1: i32) -> (i32, i32, i32) {
    %c0_i32 = arith.constant 0 : i32
    %c0_i32_0 = arith.constant 0 : i32
    %c0_i32_1 = arith.constant 0 : i32
    return %arg0, %c0_i32, %c0_i32_0 : i32, i32, i32
  }
  func.func @transform_1(%arg0: i32, %arg1: i32) -> (i32, i32, i32) {
    %c0_i32 = arith.constant 0 : i32
    %c0_i32_0 = arith.constant 0 : i32
    return %arg0, %arg1, %c0_i32 : i32, i32, i32
  }
  func.func @transform_2(%arg0: i32, %arg1: i32) -> (i32, i32) {
    %c0_i32 = arith.constant 0 : i32
    %c0_i32_0 = arith.constant 0 : i32
    %c0_i32_1 = arith.constant 0 : i32
    return %c0_i32, %c0_i32_0 : i32, i32
  }
  func.func @transform_3(%arg0: i32, %arg1: i32) -> (i32, i32) {
    %c0_i32 = arith.constant 0 : i32
    %c0_i32_0 = arith.constant 0 : i32
    %c0_i32_1 = arith.constant 0 : i32
    return %c0_i32, %c0_i32_0 : i32, i32
  }
  func.func @transform_4(%arg0: i32, %arg1: i32) -> (i32, i32) {
    %c0_i32 = arith.constant 0 : i32
    %c0_i32_0 = arith.constant 0 : i32
    %c0_i32_1 = arith.constant 0 : i32
    return %c0_i32, %c0_i32_0 : i32, i32
  }
  func.func @transform_5(%arg0: i32, %arg1: i32) -> (i32, i32) {
    %c0_i32 = arith.constant 0 : i32
    %c0_i32_0 = arith.constant 0 : i32
    %c0_i32_1 = arith.constant 0 : i32
    return %c0_i32, %c0_i32_0 : i32, i32
  }
  func.func @transform_6(%arg0: i32, %arg1: i32) -> (i32, i32) {
    %c0_i32 = arith.constant 0 : i32
    %c0_i32_0 = arith.constant 0 : i32
    %c0_i32_1 = arith.constant 0 : i32
    return %c0_i32, %c0_i32_0 : i32, i32
  }
  func.func @transform_7(%arg0: i32, %arg1: i32) -> (i32, i32) {
    %c0_i32 = arith.constant 0 : i32
    %c0_i32_0 = arith.constant 0 : i32
    %c0_i32_1 = arith.constant 0 : i32
    return %c0_i32, %c0_i32_0 : i32, i32
  }
  func.func @transform_8(%arg0: i32, %arg1: i32) -> (i32, i32) {
    %c0_i32 = arith.constant 0 : i32
    %c0_i32_0 = arith.constant 0 : i32
    %c0_i32_1 = arith.constant 0 : i32
    return %c0_i32, %c0_i32_0 : i32, i32
  }
  func.func @transform_9(%arg0: i32, %arg1: i32) -> (i32, i32) {
    %c0_i32 = arith.constant 0 : i32
    %c0_i32_0 = arith.constant 0 : i32
    %c0_i32_1 = arith.constant 0 : i32
    return %c0_i32, %c0_i32_0 : i32, i32
  }
  func.func @transform_10(%arg0: i32, %arg1: i32) -> (i32, i32) {
    %c0_i32 = arith.constant 0 : i32
    %c0_i32_0 = arith.constant 0 : i32
    %c0_i32_1 = arith.constant 0 : i32
    return %c0_i32, %c0_i32_0 : i32, i32
  }
  func.func @transform_11(%arg0: i32, %arg1: i32) -> (i32, i32) {
    %c0_i32 = arith.constant 0 : i32
    %c0_i32_0 = arith.constant 0 : i32
    %c0_i32_1 = arith.constant 0 : i32
    return %c0_i32, %c0_i32_0 : i32, i32
  }
  func.func @transform_12(%arg0: i32, %arg1: i32) -> (i32, i32) {
    %c0_i32 = arith.constant 0 : i32
    %c0_i32_0 = arith.constant 0 : i32
    %c0_i32_1 = arith.constant 0 : i32
    return %c0_i32, %c0_i32_0 : i32, i32
  }
  func.func @transform_13(%arg0: i32, %arg1: i32) -> (i32, i32) {
    %c0_i32 = arith.constant 0 : i32
    %c0_i32_0 = arith.constant 0 : i32
    %c0_i32_1 = arith.constant 0 : i32
    return %c0_i32, %c0_i32_0 : i32, i32
  }
  func.func @transform_14(%arg0: i32, %arg1: i32) -> (i32, i32) {
    %c0_i32 = arith.constant 0 : i32
    %c0_i32_0 = arith.constant 0 : i32
    %c0_i32_1 = arith.constant 0 : i32
    return %c0_i32, %c0_i32_0 : i32, i32
  }
  func.func @transform_15(%arg0: i32, %arg1: i32) -> (i32, i32) {
    %c0_i32 = arith.constant 0 : i32
    %c0_i32_0 = arith.constant 0 : i32
    %c0_i32_1 = arith.constant 0 : i32
    return %c0_i32, %c0_i32_0 : i32, i32
  }
  func.func @transform_16(%arg0: i32, %arg1: i32) -> (i32, i32) {
    %c0_i32 = arith.constant 0 : i32
    %c0_i32_0 = arith.constant 0 : i32
    %c0_i32_1 = arith.constant 0 : i32
    return %c0_i32, %c0_i32_0 : i32, i32
  }
  func.func @transform_17(%arg0: i32, %arg1: i32) -> (i32, i32) {
    %c0_i32 = arith.constant 0 : i32
    %c0_i32_0 = arith.constant 0 : i32
    %c0_i32_1 = arith.constant 0 : i32
    return %c0_i32, %c0_i32_0 : i32, i32
  }
  func.func @transform_18(%arg0: i32, %arg1: i32) -> (i32, i32, i32) {
    %c0_i32 = arith.constant 0 : i32
    %c0_i32_0 = arith.constant 0 : i32
    %c0_i32_1 = arith.constant 0 : i32
    return %arg0, %c0_i32, %c0_i32_0 : i32, i32, i32
  }
}

</mosaic_0001>

<bundles_post_ra>
// kernel: _lambda_.2
= control target key start
LH: loop header
LB: loop body
LE: loop exit
PB: predicated region body
PF: predicated region fallthrough
CT: control target
= control target key end

     0   :  { %16 = vsyncpa [#allocation4], 0  ;;  %s3708_s0 = inlined_call_operand.vmem [shape: f32[2,128,3], index: 0, kind: input, shape index: {}]   ;;  %s3709_s1 = inlined_call_operand.vmem [shape: f32[3,64], index: 1, kind: input, shape index: {}]   ;;  %s3710_s2 = inlined_call_operand.vmem [shape: f32[1,64], index: 2, kind: input, shape index: {}]   ;;  %s3711_s3 = inlined_call_operand.vmem [shape: bf16[64,128], index: 3, kind: input, shape index: {}]   ;;  %s3712_s4 = inlined_call_operand.vmem [shape: f32[1,128], index: 4, kind: input, shape index: {}]   ;;  %s3713_s5 = inlined_call_operand.hbm [shape: bf16[128,512], index: 5, kind: input, shape index: {}]   ;;  %s3714_s6 = inlined_call_operand.vmem [shape: f32[1,512], index: 6, kind: input, shape index: {}]   ;;  %s3715_s7 = inlined_call_operand.vmem [shape: bf16[512,256], index: 7, kind: input, shape index: {}]   ;;  %s3716_s8 = inlined_call_operand.vmem [shape: f32[1,256], index: 8, kind: input, shape index: {}]   ;;  %s3717_s9 = inlined_call_operand.hbm [shape: bf16[256,128], index: 9, kind: input, shape index: {}]   ;;  %s3718_s10 = inlined_call_operand.vmem [shape: f32[1,128], index: 10, kind: input, shape index: {}]   ;;  %s3719_s11 = inlined_call_operand.vmem [shape: f32[2,1,128], index: 11, kind: output, shape index: {}]  }
   0x1   :  { %17 = vsyncpa [#allocation6], 0  ;;  %s3165_s17 = smov 0   ;;  %s3167_s18 = smov 0  }
   0x2   :  { %s3169_s19 = smov 0  }
   0x3 LB: > { %s2569_s20 = sadd.s32 4294967295, %s3093_s19   ;;  %s35_s21 = sadd.s32 1, %s3089_s18  ;;  %s3093_s19 = sphi %s3169_s19, %s23_s19   ;;  %s3089_s18 = sphi %s3167_s18, %s3724_s18   ;;  %s3085_s17 = sphi %s3165_s17, %s3723_s17  }
   0x4   : > { %p37_p0 = scmp.ge.s32.totalorder %s35_s21, 2  ;;  %p2571_p1 = scmp.ge.s32.totalorder %s3093_s19, 1 }
   0x5   : > { %p304_p2 = scmp.lt.s32.totalorder %s3093_s19, 3  ;;  %p3190_p4 = scmp.eq.s32.totalorder %s2569_s20, 0 }
   0x6   : > { %s3726_s21 = smov (%p37_p0, %s35_s21), 0  ;;  %s3095_s24 = smov [#allocation3]  }
   0x7   : > { %p3186_p3 = pnand %p2571_p1, %p304_p2  ;;  %s328_s25 = sshll.u32 %s3095_s24, 4  ;;  %s329_s25 = int_to_ptr.vmem [resolvable:$true] %s328_s25 }
   0x8   : > { %s3096_s27 = smov [#allocation5]   ;;  %s3022_s29 = scalar_lea.vmem %s329_s25, 4096 }
   0x9   : > { %p2775_p5 = pneg %p3186_p3  ;;  %s350_s28 = sshll.u32 %s3096_s27, 4  ;;  %s351_s28 = int_to_ptr.vmem [resolvable:$true] %s350_s28 }
   0xa   : > { %p3023_p8 = scmp.ne.s32.totalorder %s329_s25, %s3022_s29  ;;  %p3030_p11 = scmp.lt.s32.totalorder %s329_s25, %s329_s25 }
   0xb   : > { %p3198_p6 = pnand %p3190_p4, %p2775_p5  ;;  %p3031_p12 = scmp.lt.s32.totalorder %s3022_s29, %s3022_s29 }
   0xd   : > { %p3013_p7 = pneg %p3198_p6  ;;  %p3032_p13 = por %p3031_p12, %p3030_p11 }
   0xf   : > { %p3025_p9 = pnand %p3023_p8, %p3013_p7 }
  0x11   : > { %p3026_p10 = pneg %p3025_p9 }
  0x13   : > { %p3033_p0 = pnand %p3032_p13, %p3026_p10 }
  0x15   : > { %3036 = shalt.err (!%p3033_p0)
}
  0x16   : > { %s3097_s30 = smov 256   ;;  %s3098_s12 = smov 16  }
  0x17   : > { %2778 = dma.hbm_to_vmem [thread:$0]  (!%p3198_p6), %s3713_s5, 4096, %s329_s25, [#allocation4], %s3097_s30, %s3097_s30, %s3098_s12  }
  0x18   : > { %s3048_s15 = scalar_lea.vmem %s351_s28, 2048  ;;  %p3056_p8 = scmp.lt.s32.totalorder %s351_s28, %s351_s28 }
  0x19   : > { %p3049_p1 = scmp.ne.s32.totalorder %s351_s28, %s3048_s15  ;;  %p3057_p9 = scmp.lt.s32.totalorder %s3048_s15, %s3048_s15 }
  0x1b   : > { %p3051_p2 = pnand %p3049_p1, %p3013_p7  ;;  %p3058_p11 = por %p3057_p9, %p3056_p8 }
  0x1d   : > { %p3052_p5 = pneg %p3051_p2 }
  0x1f   : > { %p3059_p10 = pnand %p3058_p11, %p3052_p5 }
  0x21   : > { %3062 = shalt.err (!%p3059_p10)
}
  0x22   : > { %s3099_s16 = smov 64   ;;  %s3100_s20 = smov 4  }
  0x23   : > { %2781 = dma.hbm_to_vmem [thread:$0]  (!%p3198_p6), %s3717_s9, 2048, %s351_s28, [#allocation6], %s3099_s16, %s3099_s16, %s3100_s20  }
  0x24   : > { %382 = sbr.rel (%p3186_p3) target bundleno = 1099 (0x44b), region = 64 }
  0x29   : > { %3076 = dma.done.wait (%p3190_p4), [#allocation4], 4096  }
  0x2a   : > { %3078 = vsyncadd (%p3190_p4), [#allocation4], 4294963200 }
  0x2b   : > { %3080 = dma.done.wait (%p3190_p4), [#allocation6], 2048  }
  0x2c   : > { %3082 = vsyncadd (%p3190_p4), [#allocation6], 4294965248  ;;  %p429_p7 = scmp.lt.s32.totalorder %s3085_s17, 1  ;;  %v3101_v0 = vmov 1   ;;  %v3102_v1 = vmov 0   ;;  %v3103_v4 = vmov 2   ;;  %v539_v23 = vlaneseq }
  0x2d   : > { %2821 = vset.pattern.permute.xlu1 %v3101_v0  ;;  %2820 = vset.pattern.permute.xlu0 %v3102_v1  ;;  %v2847_v8 = vld [vmem:[%s3711_s3 + $0x18] sm:$0xff]   ;;  %v2848_v9 = vld [vmem:[%s3711_s3 + $0x10] sm:$0xff]   ;;  %v2849_v11 = vld [vmem:[%s3711_s3 + $0x8] sm:$0xff]   ;;  %vm845_vm0 = vcmask 523264  }
  0x2e   : > { %s3728_s17 = smov (!%p429_p7, %s3085_s17), 1  ;;  %1237 = vmatprep.mubr.bf16.mxu1 %v3102_v1  ;;  %2743 = vmatprep.subr.bf16.mxu0 %v2847_v8  ;;  %v2850_v13 = vld [vmem:[%s3711_s3] sm:$0xff]   ;;  %v3296_v25 = vshrl.u32 %v539_v23, 7  ;;  %v2851_v39 = vld [vmem:[#allocation3 + $0xe4] ss:$16 sps:$4 sm:$0xff]   ;;  %vm1761_vm1 = vcmp.lt.s32.totalorder %v539_v23, 512 }
  0x2f   : > { %s2708_s22 = sshll.u32 %s3728_s17, 7  ;;  %2744 = vmatpush3.bf16.msra.mxu0 %v2847_v8  ;;  %v458_v30 = vld [vmem:[%s3709_s1] sm:$0x7]  ;;  %v2856_v42 = vld [vmem:[#allocation3 + $0xe0] ss:$16 sps:$4 sm:$0xff]   ;;  %1205 = vmatprep.subr.bf16.mxu1 %v2851_v39  ;;  %s440_s28 = scalar_lea.vmem %s3719_s11, %s3728_s17 }
  0x30   : > { %s3241_s23 = scalar_lea.vmem %s3708_s0, %s2708_s22  ;;  %2745 = vmatprep.subr.bf16.mxu0 %v2848_v9  ;;  %v3300_v28 = vsub.s32 0, %v3296_v25  ;;  %v3306_v31 = vsub.s32 1, %v3296_v25  ;;  %v3309_v32 = vsub.s32 2, %v3296_v25  ;;  %v2855_v40 = vld [vmem:[#allocation3 + $0xec] ss:$16 sps:$4 sm:$0xff]   ;;  %1206 = vmatpush1.bf16.msra.mxu1 %v2856_v42 }
  0x31   : > { %v442_v2 = vld [vmem:[%s3241_s23] sm:$0xff]  ;;  %v443_v3 = vld [vmem:[%s3241_s23 + $0x8] sm:$0xff]  ;;  %v445_v5 = vld [vmem:[%s3241_s23 + $0x18] sm:$0xff] }
  0x32   : > { %560 = vperm.xlu1 %2821, %v442_v2   ;;  %461 = vperm.xlu0 %2820, %v442_v2   ;;  %v444_v6 = vld [vmem:[%s3241_s23 + $0x10] sm:$0xff]  ;;  %v446_v7 = vld [vmem:[%s3241_s23 + $0x20] sm:$0xff]  ;;  %v447_v10 = vld [vmem:[%s3241_s23 + $0x28] sm:$0xff]  ;;  %v3312_v33 = vrot.slane %v458_v30, %v3300_v28  ;;  %v3315_v35 = vrot.slane %v458_v30, %v3306_v31  ;;  %v3318_v36 = vrot.slane %v458_v30, %v3309_v32 }
  0x33   : > { %2746 = vmatpush3.bf16.msra.mxu0 %v2848_v9  ;;  %v448_v12 = vld [vmem:[%s3241_s23 + $0x30] sm:$0xff]  ;;  %v449_v14 = vld [vmem:[%s3241_s23 + $0x38] sm:$0xff]  ;;  %v451_v15 = vld [vmem:[%s3241_s23 + $0x48] sm:$0xff] }
  0x34   : > { %2747 = vmatprep.subr.bf16.mxu0 %v2849_v11  ;;  %v452_v16 = vld [vmem:[%s3241_s23 + $0x50] sm:$0xff]  ;;  %v454_v17 = vld [vmem:[%s3241_s23 + $0x60] sm:$0xff]  ;;  %v455_v19 = vld [vmem:[%s3241_s23 + $0x68] sm:$0xff] }
  0x35   : > { %v450_v18 = vld [vmem:[%s3241_s23 + $0x40] sm:$0xff]  ;;  %v456_v20 = vld [vmem:[%s3241_s23 + $0x70] sm:$0xff]  ;;  %v453_v21 = vld [vmem:[%s3241_s23 + $0x58] sm:$0xff] }
  0x36   : > { %564 = vperm.xlu1 %2821, %v443_v3   ;;  %2825 = vset.pattern.permute.xlu0 %v3103_v4  ;;  %v457_v22 = vld [vmem:[%s3241_s23 + $0x78] sm:$0xff]  ;;  %v2862_v48 = vld [vmem:[#allocation3 + $0xc0] ss:$16 sps:$4 sm:$0xff]   ;;  %v3330_v56 = vld [vmem:[%s3710_s2] ss:$0 sm:$0xff] }
  0x37   : > { %664 = vperm.xlu0 %2825, %v443_v3   ;;  %2748 = vmatpush3.bf16.msra.mxu0 %v2849_v11  ;;  %v2857_v43 = vld [vmem:[#allocation3 + $0xc4] ss:$16 sps:$4 sm:$0xff]   ;;  %v2868_v54 = vld [vmem:[#allocation3 + $0xa0] ss:$16 sps:$4 sm:$0xff]   ;;  %v2861_v30 = vld [vmem:[#allocation3 + $0xcc] ss:$16 sps:$4 sm:$0xff]  }
  0x38   : > { %2749 = vmatprep.subr.bf16.mxu0 %v2850_v13  ;;  %1207 = vmatprep.subr.bf16.mxu1 %v2857_v43  ;;  %v2863_v49 = vld [vmem:[#allocation3 + $0xa4] ss:$16 sps:$4 sm:$0xff]   ;;  %v2874_v63 = vld [vmem:[#allocation3 + $0x80] ss:$16 sps:$4 sm:$0xff]   ;;  %v2873_v42 = vld [vmem:[#allocation3 + $0x8c] ss:$16 sps:$4 sm:$0xff]  }
  0x39   : > { %1208 = vmatpush1.bf16.msra.mxu1 %v2862_v48  ;;  %v2869_v57 = vld [vmem:[#allocation3 + $0x84] ss:$16 sps:$4 sm:$0xff]  }
  0x3a   : > { %2822 = vset.pattern.permute.xlu1 %v3102_v1  ;;  %1209 = vmatprep.subr.bf16.mxu1 %v2863_v49 }
  0x3b   : > { %476 = vperm.xlu1 %2822, %v445_v5   ;;  %2826 = vset.pattern.permute.xlu0 %v3102_v1 }
  0x3c   : > { %466 = vperm.xlu0 %2826, %v443_v3   ;;  %2750 = vmatpush3.bf16.msra.mxu0 %v2850_v13  ;;  %v2875_v3 = vld [vmem:[#allocation3 + $0x64] ss:$16 sps:$4 sm:$0xff]  }
  0x3d   : > { %1318 = vmatprep.subr.bf16.mxu0 %v2855_v40  ;;  %1210 = vmatpush1.bf16.msra.mxu1 %v2868_v54 }
  0x3e   : > { %1211 = vmatprep.subr.bf16.mxu1 %v2869_v57 }
  0x3f   : > { %2823 = vset.pattern.permute.xlu1 %v3101_v0 }
  0x40   : > { %572 = vperm.xlu1 %2823, %v445_v5   ;;  %471 = vperm.xlu0 %2826, %v444_v6  }
  0x41   : > { %1212 = vmatpush1.bf16.msra.mxu1 %v2874_v63 }
  0x42   : > { %1213 = vmatprep.subr.bf16.mxu1 %v2875_v3 }
  0x44   : > { %2824 = vset.pattern.permute.xlu1 %v3103_v4  ;;  %481 = vperm.xlu0 %2826, %v446_v7  }
  0x45   : > { %660 = vperm.xlu1 %2824, %v442_v2  }
  0x48   : > { %2827 = vset.pattern.permute.xlu0 %v3101_v0 }
  0x49   : > { %668 = vperm.xlu1 %2824, %v444_v6   ;;  %568 = vperm.xlu0 %2827, %v444_v6  }
  0x4d   : > { %672 = vperm.xlu1 %2824, %v445_v5   ;;  %580 = vperm.xlu0 %2827, %v447_v10  }
  0x51   : > { %2828 = vset.pattern.permute.xlu1 %v3102_v1  ;;  %584 = vperm.xlu0 %2827, %v448_v12  }
  0x52   : > { %486 = vperm.xlu1 %2828, %v447_v10  }
  0x55   : > { %2832 = vset.pattern.permute.xlu0 %v3103_v4 }
  0x56   : > { %2829 = vset.pattern.permute.xlu1 %v3101_v0  ;;  %676 = vperm.xlu0 %2832, %v446_v7  }
  0x57   : > { %576 = vperm.xlu1 %2829, %v446_v7  }
  0x5a   : > { %688 = vperm.xlu0 %2832, %v449_v14  }
  0x5b   : > { %2830 = vset.pattern.permute.xlu1 %v3102_v1 }
  0x5c   : > { %491 = vperm.xlu1 %2830, %v448_v12  }
  0x5e   : > { %696 = vperm.xlu0 %2832, %v451_v15  }
  0x60   : > { %496 = vperm.xlu1 %2830, %v449_v14  }
  0x62   : > { %2839 = vset.pattern.permute.xlu0 %v3102_v1 }
  0x63   : > { %506 = vperm.xlu0 %2839, %v451_v15  }
  0x64   : > { %2831 = vset.pattern.permute.xlu1 %v3101_v0 }
  0x65   : > { %588 = vperm.xlu1 %2831, %v449_v14  }
  0x67   : > { %511 = vperm.xlu0 %2839, %v452_v16  }
  0x69   : > { %2833 = vset.pattern.permute.xlu1 %v3103_v4 }
  0x6a   : > { %680 = vperm.xlu1 %2833, %v447_v10  }
  0x6b   : > { %521 = vperm.xlu0 %2839, %v454_v17  }
  0x6e   : > { %684 = vperm.xlu1 %2833, %v448_v12   ;;  %v2880_v12 = vld [vmem:[#allocation3 + $0x60] ss:$16 sps:$4 sm:$0xff]  }
  0x6f   : > { %2840 = vset.pattern.permute.xlu0 %v3101_v0  ;;  %1214 = vmatpush1.bf16.msra.mxu1 %v2880_v12 }
  0x70   : > { %600 = vperm.xlu0 %2840, %v452_v16  }
  0x72   : > { %2834 = vset.pattern.permute.xlu1 %v3102_v1 }
  0x73   : > { %501 = vperm.xlu1 %2834, %v450_v18  }
  0x74   : > { %612 = vperm.xlu0 %2840, %v455_v19  }
  0x77   : > { %2835 = vset.pattern.permute.xlu1 %v3101_v0 }
  0x78   : > { %592 = vperm.xlu1 %2835, %v450_v18   ;;  %616 = vperm.xlu0 %2840, %v456_v20  }
  0x7c   : > { %596 = vperm.xlu1 %2835, %v451_v15   ;;  %2845 = vset.pattern.permute.xlu0 %v3103_v4 }
  0x7d   : > { %708 = vperm.xlu0 %2845, %v454_v17  }
  0x80   : > { %2836 = vset.pattern.permute.xlu1 %v3102_v1 }
  0x81   : > { %516 = vperm.xlu1 %2836, %v453_v21   ;;  %720 = vperm.xlu0 %2845, %v457_v22  }
  0x85   : > { %2837 = vset.pattern.permute.xlu1 %v3101_v0 }
  0x86   : > { %604 = vperm.xlu1 %2837, %v453_v21  }
  0x8a   : > { %2838 = vset.pattern.permute.xlu1 %v3103_v4 }
  0x8b   : > { %692 = vperm.xlu1 %2838, %v450_v18  }
  0x8f   : > { %700 = vperm.xlu1 %2838, %v452_v16  }
  0x93   : > { %704 = vperm.xlu1 %2838, %v453_v21  }
  0x97   : > { %2841 = vset.pattern.permute.xlu1 %v3102_v1 }
  0x98   : > { %526 = vperm.xlu1 %2841, %v455_v19  }
  0x9c   : > { %2842 = vset.pattern.permute.xlu1 %v3101_v0 }
  0x9d   : > { %608 = vperm.xlu1 %2842, %v454_v17  }
  0xa1   : > { %2843 = vset.pattern.permute.xlu1 %v3102_v1 }
  0xa2   : > { %531 = vperm.xlu1 %2843, %v456_v20  }
  0xa6   : > { %536 = vperm.xlu1 %2843, %v457_v22  }
  0xaa   : > { %2844 = vset.pattern.permute.xlu1 %v3101_v0 }
  0xab   : > { %620 = vperm.xlu1 %2844, %v457_v22  }
  0xad   : > { %v561_v24 = vpop.permute.xlu1 %560  ;;  %v462_v26 = vpop.permute.xlu0 %461 }
  0xae   : > { %v627_v50 = vmul.f32 %v3315_v35, %v561_v24  ;;  %v543_v51 = vmul.f32 %v3312_v33, %v462_v26  ;;  %v2853_v26 = vld [vmem:[#allocation3 + $0xe8] ss:$16 sps:$4 sm:$0xff]  }
  0xaf   : > { %2846 = vset.pattern.permute.xlu1 %v3103_v4 }
  0xb0   : > { %712 = vperm.xlu1 %2846, %v455_v19   ;;  %v643_v58 = vadd.f32 %v627_v50, %v543_v51 }
  0xb1   : > { %v565_v27 = vpop.permute.xlu1 %564 }
  0xb2   : > { %v665_v29 = vpop.permute.xlu0 %664  ;;  %v628_v41 = vmul.f32 %v3315_v35, %v565_v27 }
  0xb3   : > { %v728_v44 = vmul.f32 %v3318_v36, %v665_v29 }
  0xb4   : > { %716 = vperm.xlu1 %2846, %v456_v20  }
  0xb6   : > { %v477_v34 = vpop.permute.xlu1 %476 }
  0xb7   : > { %v467_v37 = vpop.permute.xlu0 %466  ;;  %v546_v7 = vmul.f32 %v3312_v33, %v477_v34 }
  0xb8   : > { %v544_v38 = vmul.f32 %v3312_v33, %v467_v37  ;;  %v2859_v37 = vld [vmem:[#allocation3 + $0xc8] ss:$16 sps:$4 sm:$0xff]  }
  0xba   : > { %v644_v45 = vadd.f32 %v628_v41, %v544_v38  ;;  %v2867_v38 = vld [vmem:[#allocation3 + $0xac] ss:$16 sps:$4 sm:$0xff]   ;;  %v2865_v41 = vld [vmem:[#allocation3 + $0xa8] ss:$16 sps:$4 sm:$0xff]  }
  0xbb   : > { %v573_v46 = vpop.permute.xlu1 %572  ;;  %v472_v47 = vpop.permute.xlu0 %471 }
  0xbc   : > { %v744_v52 = vadd.f32 %v728_v44, %v644_v45  ;;  %v545_v60 = vmul.f32 %v3312_v33, %v472_v47  ;;  %v630_v4 = vmul.f32 %v3315_v35, %v573_v46  ;;  %v2871_v45 = vld [vmem:[#allocation3 + $0x88] ss:$16 sps:$4 sm:$0xff]   ;;  %v2879_v47 = vld [vmem:[#allocation3 + $0x6c] ss:$16 sps:$4 sm:$0xff]  }
  0xbe   : > { %v767_v62 = vadd.f32 %v3330_v56, %v744_v52  ;;  %v646_v14 = vadd.f32 %v630_v4, %v546_v7  ;;  %v2877_v52 = vld [vmem:[#allocation3 + $0x68] ss:$16 sps:$4 sm:$0xff]  }
  0xbf   : > { %v3325_v53 = vpop.permute.xlu0 %481 }
  0xc0   : > { %v661_v55 = vpop.permute.xlu1 %660  ;;  %v783_v11 = vmax.f32 %v767_v62, 0.0  ;;  %v547_v48 = vmul.f32 %v3312_v33, %v3325_v53 }
  0xc1   : > { %v727_v59 = vmul.f32 %v3318_v36, %v661_v55 }
  0xc3   : > { %v743_v61 = vadd.f32 %v727_v59, %v643_v58 }
  0xc4   : > { %v669_v0 = vpop.permute.xlu1 %668  ;;  %v569_v2 = vpop.permute.xlu0 %568 }
  0xc5   : > { %v629_v5 = vmul.f32 %v3315_v35, %v569_v2  ;;  %v766_v6 = vadd.f32 %v3330_v56, %v743_v61  ;;  %v729_v8 = vmul.f32 %v3318_v36, %v669_v0 }
  0xc7   : > { %v645_v9 = vadd.f32 %v629_v5, %v545_v60  ;;  %v782_v10 = vmax.f32 %v766_v6, 0.0 }
  0xc8   : > { %v673_v13 = vpop.permute.xlu1 %672  ;;  %v581_v29 = vpop.permute.xlu0 %580 }
  0xc9   : > { %v745_v15 = vadd.f32 %v729_v8, %v645_v9  ;;  %v730_v16 = vmul.f32 %v3318_v36, %v673_v13  ;;  %v798_v17 = vpack.c.bf16 %v783_v11, %v782_v10  ;;  %v632_v57 = vmul.f32 %v3315_v35, %v581_v29 }
  0xcb   : > { %v768_v18 = vadd.f32 %v3330_v56, %v745_v15  ;;  %v746_v19 = vadd.f32 %v730_v16, %v646_v14  ;;  %2751 = vmatprep.mubr.msk.bf16.mxu0 %vm845_vm0, %v798_v17 }
  0xcc   : > { %v585_v39 = vpop.permute.xlu0 %584 }
  0xcd   : > { %v769_v20 = vadd.f32 %v3330_v56, %v746_v19  ;;  %v487_v21 = vpop.permute.xlu1 %486  ;;  %v784_v22 = vmax.f32 %v768_v18, 0.0  ;;  %v633_v0 = vmul.f32 %v3315_v35, %v585_v39 }
  0xce   : > { %v548_v58 = vmul.f32 %v3312_v33, %v487_v21 }
  0xcf   : > { %v785_v24 = vmax.f32 %v769_v20, 0.0 }
  0xd0   : > { %v648_v63 = vadd.f32 %v632_v57, %v548_v58 }
  0xd1   : > { %v799_v27 = vpack.c.bf16 %v785_v24, %v784_v22  ;;  %v677_v46 = vpop.permute.xlu0 %676 }
  0xd2   : > { %v577_v34 = vpop.permute.xlu1 %576  ;;  %v731_v50 = vmul.f32 %v3318_v36, %v677_v46 }
  0xd3   : > { %2752 = vmatmul.mubr.msk.bf16.vlgmr.msra.gmra.mxu0 %vm845_vm0, %v799_v27  ;;  %v631_v44 = vmul.f32 %v3315_v35, %v577_v34 }
  0xd4   : > { %1319 = vmatpush1.bf16.msra.mxu0 %v2853_v26 }
  0xd5   : > { %1320 = vmatprep.subr.bf16.mxu0 %v2861_v30  ;;  %v647_v49 = vadd.f32 %v631_v44, %v547_v48  ;;  %v689_v55 = vpop.permute.xlu0 %688 }
  0xd6   : > { %v734_v53 = vmul.f32 %v3318_v36, %v689_v55 }
  0xd7   : > { %v492_v40 = vpop.permute.xlu1 %491  ;;  %v747_v60 = vadd.f32 %v731_v50, %v647_v49 }
  0xd8   : > { %1321 = vmatpush1.bf16.msra.mxu0 %v2859_v37  ;;  %v549_v2 = vmul.f32 %v3312_v33, %v492_v40 }
  0xd9   : > { %1322 = vmatprep.subr.bf16.mxu0 %v2867_v38  ;;  %v770_v4 = vadd.f32 %v3330_v56, %v747_v60  ;;  %v697_v15 = vpop.permute.xlu0 %696 }
  0xda   : > { %v649_v8 = vadd.f32 %v633_v0, %v549_v2 }
  0xdb   : > { %v497_v43 = vpop.permute.xlu1 %496  ;;  %v786_v11 = vmax.f32 %v770_v4, 0.0 }
  0xdc   : > { %1323 = vmatpush1.bf16.msra.mxu0 %v2865_v41  ;;  %v550_v59 = vmul.f32 %v3312_v33, %v497_v43  ;;  %v736_v43 = vmul.f32 %v3318_v36, %v697_v15  ;;  %v2891_v15 = vld [vmem:[#allocation3 + $0x2c] ss:$16 sps:$4 sm:$0xff]  }
  0xdd   : > { %1324 = vmatprep.subr.bf16.mxu0 %v2873_v42 }
  0xde   : > { %v507_v21 = vpop.permute.xlu0 %506 }
  0xdf   : > { %v552_v37 = vmul.f32 %v3312_v33, %v507_v21  ;;  %v2893_v21 = vld [vmem:[#allocation3 + $0x4] ss:$16 sps:$4 sm:$0xff]  }
  0xe0   : > { %v589_v51 = vpop.permute.xlu1 %588  ;;  %1325 = vmatpush1.bf16.msra.mxu0 %v2871_v45 }
  0xe1   : > { %v634_v54 = vmul.f32 %v3315_v35, %v589_v51  ;;  %1326 = vmatprep.subr.bf16.mxu0 %v2879_v47 }
  0xe2   : > { %v512_v26 = vpop.permute.xlu0 %511 }
  0xe3   : > { %v650_v61 = vadd.f32 %v634_v54, %v550_v59  ;;  %v553_v44 = vmul.f32 %v3312_v33, %v512_v26  ;;  %v2898_v26 = vld [vmem:[#allocation3] ss:$16 sps:$4 sm:$0xff]  }
  0xe4   : > { %1327 = vmatpush1.bf16.msra.mxu0 %v2877_v52 }
  0xe5   : > { %v681_v62 = vpop.permute.xlu1 %680  ;;  %v750_v5 = vadd.f32 %v734_v53, %v650_v61 }
  0xe6   : > { %v732_v3 = vmul.f32 %v3318_v36, %v681_v62  ;;  %v3364_v29 = vpop.permute.xlu0 %521 }
  0xe7   : > { %v773_v12 = vadd.f32 %v3330_v56, %v750_v5  ;;  %v2881_v5 = vld [vmem:[#allocation3 + $0x44] ss:$16 sps:$4 sm:$0xff]  }
  0xe8   : > { %v748_v6 = vadd.f32 %v732_v3, %v648_v63  ;;  %1215 = vmatprep.subr.bf16.mxu1 %v2881_v5 }
  0xe9   : > { %v685_v7 = vpop.permute.xlu1 %684  ;;  %v789_v19 = vmax.f32 %v773_v12, 0.0  ;;  %v2886_v12 = vld [vmem:[#allocation3 + $0x40] ss:$16 sps:$4 sm:$0xff]  }
  0xea   : > { %v771_v9 = vadd.f32 %v3330_v56, %v748_v6  ;;  %v733_v10 = vmul.f32 %v3318_v36, %v685_v7  ;;  %v2885_v6 = vld [vmem:[#allocation3 + $0x4c] ss:$16 sps:$4 sm:$0xff]   ;;  %1216 = vmatpush1.bf16.msra.mxu1 %v2886_v12 }
  0xeb   : > { %v601_v42 = vpop.permute.xlu0 %600  ;;  %1328 = vmatprep.subr.bf16.mxu0 %v2885_v6 }
  0xec   : > { %v787_v13 = vmax.f32 %v771_v9, 0.0  ;;  %v749_v14 = vadd.f32 %v733_v10, %v649_v8  ;;  %v637_v45 = vmul.f32 %v3315_v35, %v601_v42 }
  0xee   : > { %v800_v16 = vpack.c.bf16 %v787_v13, %v786_v11  ;;  %v772_v17 = vadd.f32 %v3330_v56, %v749_v14  ;;  %v502_v18 = vpop.permute.xlu1 %501  ;;  %v653_v50 = vadd.f32 %v637_v45, %v553_v44  ;;  %v2883_v11 = vld [vmem:[#allocation3 + $0x48] ss:$16 sps:$4 sm:$0xff]   ;;  %v2887_v14 = vld [vmem:[#allocation3 + $0x24] ss:$16 sps:$4 sm:$0xff]  }
  0xef   : > { %v551_v38 = vmul.f32 %v3312_v33, %v502_v18  ;;  %v613_v10 = vpop.permute.xlu0 %612  ;;  %1329 = vmatpush1.bf16.msra.mxu0 %v2883_v11  ;;  %v2892_v18 = vld [vmem:[#allocation3 + $0x20] ss:$16 sps:$4 sm:$0xff]   ;;  %1217 = vmatprep.subr.bf16.mxu1 %v2887_v14 }
  0xf0   : > { %v788_v20 = vmax.f32 %v772_v17, 0.0  ;;  %2755 = vmatprep.mubr.msk.bf16.mxu0 %vm845_vm0, %v800_v16  ;;  %v2889_v17 = vld [vmem:[#allocation3 + $0x28] ss:$16 sps:$4 sm:$0xff]   ;;  %1330 = vmatprep.subr.bf16.mxu0 %v2891_v15  ;;  %v640_v44 = vmul.f32 %v3315_v35, %v613_v10 }
  0xf1   : > { %1218 = vmatpush1.bf16.msra.mxu1 %v2892_v18 }
  0xf2   : > { %v801_v22 = vpack.c.bf16 %v789_v19, %v788_v20  ;;  %1219 = vmatprep.subr.bf16.mxu1 %v2893_v21 }
  0xf3   : > { %v593_v24 = vpop.permute.xlu1 %592  ;;  %v617_v20 = vpop.permute.xlu0 %616  ;;  %1331 = vmatpush1.bf16.msra.mxu0 %v2889_v17 }
  0xf4   : > { %2756 = vmatmul.mubr.msk.bf16.gmra.mxu0 %vm845_vm0, %v801_v22  ;;  %v635_v39 = vmul.f32 %v3315_v35, %v593_v24  ;;  %v2897_v22 = vld [vmem:[#allocation3 + $0xc] ss:$16 sps:$4 sm:$0xff]   ;;  %v2895_v24 = vld [vmem:[#allocation3 + $0x8] ss:$16 sps:$4 sm:$0xff]  }
  0xf5   : > { %1332 = vmatprep.subr.bf16.mxu0 %v2897_v22  ;;  %1220 = vmatpush1.bf16.msra.mxu1 %v2898_v26 }
  0xf6   : > { %v651_v46 = vadd.f32 %v635_v39, %v551_v38 }
  0xf7   : > { %v597_v27 = vpop.permute.xlu1 %596  ;;  %1333 = vmatpush1.bf16.msra.mxu0 %v2895_v24 }
  0xf8   : > { %v636_v34 = vmul.f32 %v3315_v35, %v597_v27 }
  0xfa   : > { %v652_v40 = vadd.f32 %v636_v34, %v552_v37  ;;  %v555_v34 = vmul.f32 %v3312_v33, %v3364_v29 }
  0xfc   : > { %v517_v30 = vpop.permute.xlu1 %516  ;;  %v752_v47 = vadd.f32 %v736_v43, %v652_v40 }
  0xfd   : > { %v554_v52 = vmul.f32 %v3312_v33, %v517_v30  ;;  %v709_v30 = vpop.permute.xlu0 %708 }
  0xfe   : > { %v775_v51 = vadd.f32 %v3330_v56, %v752_v47  ;;  %v739_v40 = vmul.f32 %v3318_v36, %v709_v30 }
 0x100   : > { %v791_v60 = vmax.f32 %v775_v51, 0.0  ;;  %v641_v51 = vmul.f32 %v3315_v35, %v617_v20 }
 0x101   : > { %v605_v41 = vpop.permute.xlu1 %604  ;;  %v721_v42 = vpop.permute.xlu0 %720 }
 0x102   : > { %v638_v54 = vmul.f32 %v3315_v35, %v605_v41 }
 0x104   : > { %v654_v61 = vadd.f32 %v638_v54, %v554_v52 }
 0x106   : > { %v693_v48 = vpop.permute.xlu1 %692 }
 0x107   : > { %v735_v49 = vmul.f32 %v3318_v36, %v693_v48  ;;  %v742_v48 = vmul.f32 %v3318_v36, %v721_v42 }
 0x109   : > { %v751_v55 = vadd.f32 %v735_v49, %v651_v46 }
 0x10a   : > { %v701_v57 = vpop.permute.xlu1 %700 }
 0x10b   : > { %v774_v58 = vadd.f32 %v3330_v56, %v751_v55  ;;  %v737_v59 = vmul.f32 %v3318_v36, %v701_v57 }
 0x10d   : > { %v790_v53 = vmax.f32 %v774_v58, 0.0  ;;  %v753_v62 = vadd.f32 %v737_v59, %v653_v50 }
 0x10e   : > { %v705_v63 = vpop.permute.xlu1 %704 }
 0x10f   : > { %v802_v0 = vpack.c.bf16 %v791_v60, %v790_v53  ;;  %v776_v2 = vadd.f32 %v3330_v56, %v753_v62  ;;  %v738_v3 = vmul.f32 %v3318_v36, %v705_v63 }
 0x111   : > { %2759 = vmatprep.mubr.msk.bf16.mxu0 %vm845_vm0, %v802_v0  ;;  %v754_v4 = vadd.f32 %v738_v3, %v654_v61  ;;  %v792_v7 = vmax.f32 %v776_v2, 0.0 }
 0x113   : > { %v777_v8 = vadd.f32 %v3330_v56, %v754_v4  ;;  %v527_v9 = vpop.permute.xlu1 %526 }
 0x114   : > { %v556_v43 = vmul.f32 %v3312_v33, %v527_v9 }
 0x115   : > { %v793_v13 = vmax.f32 %v777_v8, 0.0 }
 0x116   : > { %v656_v50 = vadd.f32 %v640_v44, %v556_v43 }
 0x117   : > { %v803_v16 = vpack.c.bf16 %v793_v13, %v792_v7 }
 0x118   : > { %v609_v19 = vpop.permute.xlu1 %608 }
 0x119   : > { %2760 = vmatmul.mubr.msk.bf16.gmra.mxu0 %vm845_vm0, %v803_v16  ;;  %v639_v37 = vmul.f32 %v3315_v35, %v609_v19 }
 0x11b   : > { %v655_v39 = vadd.f32 %v639_v37, %v555_v34 }
 0x11d   : > { %v532_v27 = vpop.permute.xlu1 %531  ;;  %v755_v47 = vadd.f32 %v739_v40, %v655_v39 }
 0x11e   : > { %v557_v49 = vmul.f32 %v3312_v33, %v532_v27 }
 0x11f   : > { %v778_v55 = vadd.f32 %v3330_v56, %v755_v47 }
 0x120   : > { %v657_v58 = vadd.f32 %v641_v51, %v557_v49 }
 0x121   : > { %v537_v38 = vpop.permute.xlu1 %536  ;;  %v794_v53 = vmax.f32 %v778_v55, 0.0 }
 0x122   : > { %v558_v41 = vmul.f32 %v3312_v33, %v537_v38 }
 0x126   : > { %v621_v45 = vpop.permute.xlu1 %620 }
 0x127   : > { %v642_v46 = vmul.f32 %v3315_v35, %v621_v45 }
 0x129   : > { %v658_v29 = vadd.f32 %v642_v46, %v558_v41 }
 0x12b   : > { %v713_v52 = vpop.permute.xlu1 %712  ;;  %v758_v57 = vadd.f32 %v742_v48, %v658_v29 }
 0x12c   : > { %v740_v54 = vmul.f32 %v3318_v36, %v713_v52 }
 0x12d   : > { %v781_v63 = vadd.f32 %v3330_v56, %v758_v57  ;;  %v2899_v57 = vld [vmem:[%s3715_s7 + $0x70] ss:$8 sps:$4 sm:$0xff]  }
 0x12e   : > { %v756_v59 = vadd.f32 %v740_v54, %v656_v50 }
 0x12f   : > { %v717_v60 = vpop.permute.xlu1 %716  ;;  %v797_v3 = vmax.f32 %v781_v63, 0.0  ;;  %v2908_v63 = vld [vmem:[%s3715_s7 + $0x160] ss:$8 sps:$4 sm:$0xff]  }
 0x130   : > { %v779_v61 = vadd.f32 %v3330_v56, %v756_v59  ;;  %v741_v62 = vmul.f32 %v3318_v36, %v717_v60  ;;  %v3407_v36 = vld [vmem:[%s3712_s4] ss:$0 sm:$0xff]  ;;  %v2902_v59 = vld [vmem:[%s3715_s7 + $0x170] ss:$8 sps:$4 sm:$0xff]   ;;  %v2904_v60 = vld [vmem:[%s3715_s7 + $0x174] ss:$8 sps:$4 sm:$0xff]  }
 0x131   : > { %2270 = vmatprep.subr.bf16.mxu0 %v2904_v60  ;;  %v2973_v60 = vld [vmem:[%s3715_s7 + $0xb4] ss:$8 sps:$4 sm:$0xff]  }
 0x132   : > { %v795_v33 = vmax.f32 %v779_v61, 0.0  ;;  %v757_v0 = vadd.f32 %v741_v62, %v657_v58  ;;  %v2901_v58 = vld [vmem:[%s3715_s7 + $0x74] ss:$8 sps:$4 sm:$0xff]   ;;  %v2907_v61 = vld [vmem:[%s3715_s7 + $0x64] ss:$8 sps:$4 sm:$0xff]  }
 0x133   : > { %2229 = vmatprep.subr.bf16.mxu1 %v2901_v58  ;;  %v2905_v62 = vld [vmem:[%s3715_s7 + $0x60] ss:$8 sps:$4 sm:$0xff]  }
 0x134   : > { %v804_v2 = vpack.c.bf16 %v795_v33, %v794_v53  ;;  %v780_v35 = vadd.f32 %v3330_v56, %v757_v0  ;;  %v2910_v53 = vld [vmem:[%s3715_s7 + $0x164] ss:$8 sps:$4 sm:$0xff]   ;;  %v2913_v33 = vld [vmem:[%s3715_s7 + $0x54] ss:$8 sps:$4 sm:$0xff]   ;;  %v2965_v58 = vld [vmem:[%s3715_s7 + $0xc0] ss:$8 sps:$4 sm:$0xff]  }
 0x135   : > { %v2916_v0 = vld [vmem:[%s3715_s7 + $0x154] ss:$8 sps:$4 sm:$0xff]  }
 0x136   : > { %v796_v4 = vmax.f32 %v780_v35, 0.0  ;;  %2763 = vmatprep.mubr.msk.bf16.mxu0 %vm845_vm0, %v804_v2  ;;  %v2911_v35 = vld [vmem:[%s3715_s7 + $0x50] ss:$8 sps:$4 sm:$0xff]  }
 0x138   : > { %v805_v5 = vpack.c.bf16 %v797_v3, %v796_v4  ;;  %v2914_v4 = vld [vmem:[%s3715_s7 + $0x150] ss:$8 sps:$4 sm:$0xff]  }
 0x13a   : > { %2764 = vmatmul.mubr.msk.bf16.gmra.mxu0 %vm845_vm0, %v805_v5 }
 0x13b   : > { %1350 = vmatprep.mubr.bf16.mxu0 %v3102_v1 }
 0x193   : > { %v2753_v6 = vpop.f32.mrf.mxu0 }
 0x194   : > { %v913_v15 = vadd.f32 %v2753_v6, %v3407_v36 }
 0x195   : > { %v904_v7 = vpop.f32.mrf.mxu0 }
 0x196   : > { %v905_v9 = vadd.f32 %v3407_v36, %v904_v7  ;;  %v969_v17 = vmax.f32 %v913_v15, 0.0  ;;  %v2920_v15 = vld [vmem:[%s3715_s7 + $0x140] ss:$8 sps:$4 sm:$0xff]  }
 0x197   : > { %v2754_v8 = vpop.f32.mrf.mxu0 }
 0x198   : > { %v967_v11 = vmax.f32 %v905_v9, 0.0  ;;  %v916_v13 = vadd.f32 %v2754_v8, %v3407_v36 }
 0x199   : > { %v907_v56 = vpop.f32.mrf.mxu0 }
 0x19a   : > { %v908_v10 = vadd.f32 %v3407_v36, %v907_v56  ;;  %v970_v16 = vmax.f32 %v916_v13, 0.0  ;;  %v2919_v56 = vld [vmem:[%s3715_s7 + $0x44] ss:$8 sps:$4 sm:$0xff]  }
 0x19c   : > { %v968_v12 = vmax.f32 %v908_v10, 0.0  ;;  %v984_v18 = vpack.c.bf16 %v970_v16, %v969_v17  ;;  %v2922_v10 = vld [vmem:[%s3715_s7 + $0x144] ss:$8 sps:$4 sm:$0xff]   ;;  %v2925_v17 = vld [vmem:[%s3715_s7 + $0x34] ss:$8 sps:$4 sm:$0xff]  }
 0x19e   : > { %v983_v14 = vpack.c.bf16 %v968_v12, %v967_v11 }
 0x1a0   : > { %1238 = vmatmul.mubr.bf16.vlgmr.msra.gmra.mxu1 %v983_v14  ;;  %1351 = vmatmul.mubr.bf16.vlgmr.msra.gmra.mxu0 %v983_v14  ;;  %v2917_v14 = vld [vmem:[%s3715_s7 + $0x40] ss:$8 sps:$4 sm:$0xff]  }
 0x1a1   : > { %1247 = vmatprep.mubr.bf16.mxu1 %v3102_v1  ;;  %1360 = vmatprep.mubr.bf16.mxu0 %v3102_v1 }
 0x1a2   : > { %2230 = vmatpush1.bf16.msra.mxu1 %v2899_v57  ;;  %2271 = vmatpush1.bf16.msra.mxu0 %v2902_v59  ;;  %v2970_v57 = vld [vmem:[%s3715_s7 + $0x1c4] ss:$8 sps:$4 sm:$0xff]   ;;  %v2968_v59 = vld [vmem:[%s3715_s7 + $0x1c0] ss:$8 sps:$4 sm:$0xff]  }
 0x1a3   : > { %2231 = vmatprep.subr.bf16.mxu1 %v2907_v61  ;;  %2272 = vmatprep.subr.bf16.mxu0 %v2910_v53  ;;  %v2976_v61 = vld [vmem:[%s3715_s7 + $0x1b4] ss:$8 sps:$4 sm:$0xff]   ;;  %v2971_v53 = vld [vmem:[%s3715_s7 + $0xb0] ss:$8 sps:$4 sm:$0xff]  }
 0x1a6   : > { %2232 = vmatpush1.bf16.msra.mxu1 %v2905_v62  ;;  %2273 = vmatpush1.bf16.msra.mxu0 %v2908_v63  ;;  %v2974_v62 = vld [vmem:[%s3715_s7 + $0x1b0] ss:$8 sps:$4 sm:$0xff]   ;;  %v2977_v63 = vld [vmem:[%s3715_s7 + $0xa0] ss:$8 sps:$4 sm:$0xff]  }
 0x1a7   : > { %2233 = vmatprep.subr.bf16.mxu1 %v2913_v33  ;;  %2274 = vmatprep.subr.bf16.mxu0 %v2916_v0  ;;  %v2979_v33 = vld [vmem:[%s3715_s7 + $0xa4] ss:$8 sps:$4 sm:$0xff]   ;;  %v2980_v0 = vld [vmem:[%s3715_s7 + $0x1a0] ss:$8 sps:$4 sm:$0xff]  }
 0x1a8   : > { %1248 = vmatmul.mubr.bf16.gmra.mxu1 %v984_v18  ;;  %1361 = vmatmul.mubr.bf16.gmra.mxu0 %v984_v18 }
 0x1a9   : > { %1257 = vmatprep.mubr.bf16.mxu1 %v3102_v1  ;;  %1370 = vmatprep.mubr.bf16.mxu0 %v3102_v1 }
 0x1aa   : > { %2234 = vmatpush1.bf16.msra.mxu1 %v2911_v35  ;;  %2275 = vmatpush1.bf16.msra.mxu0 %v2914_v4  ;;  %v2985_v35 = vld [vmem:[%s3715_s7 + $0x94] ss:$8 sps:$4 sm:$0xff]   ;;  %v2983_v4 = vld [vmem:[%s3715_s7 + $0x90] ss:$8 sps:$4 sm:$0xff]  }
 0x1ab   : > { %2235 = vmatprep.subr.bf16.mxu1 %v2919_v56  ;;  %2276 = vmatprep.subr.bf16.mxu0 %v2922_v10  ;;  %v2995_v56 = vld [vmem:[#allocation5 + $0x78] sm:$0xff]  }
 0x1ae   : > { %2236 = vmatpush1.bf16.msra.mxu1 %v2917_v14  ;;  %2277 = vmatpush1.bf16.msra.mxu0 %v2920_v15 }
 0x1af   : > { %2237 = vmatprep.subr.bf16.mxu1 %v2925_v17 }
 0x1b4   : > { %v2757_v19 = vpop.f32.mrf.mxu0 }
 0x1b5   : > { %v929_v38 = vadd.f32 %v2757_v19, %v3407_v36 }
 0x1b6   : > { %v920_v20 = vpop.f32.mrf.mxu0 }
 0x1b7   : > { %v921_v22 = vadd.f32 %v3407_v36, %v920_v20  ;;  %v973_v40 = vmax.f32 %v929_v38, 0.0  ;;  %v2923_v20 = vld [vmem:[%s3715_s7 + $0x30] ss:$8 sps:$4 sm:$0xff]  }
 0x1b8   : > { %v2758_v21 = vpop.f32.mrf.mxu0  ;;  %2238 = vmatpush1.bf16.msra.mxu1 %v2923_v20  ;;  %v2938_v38 = vld [vmem:[%s3715_s7 + $0x110] ss:$8 sps:$4 sm:$0xff]   ;;  %v1039_v20 = vsub.s32 3, %v3296_v25 }
 0x1b9   : > { %v971_v27 = vmax.f32 %v921_v22, 0.0  ;;  %v932_v34 = vadd.f32 %v2758_v21, %v3407_v36  ;;  %v2926_v21 = vld [vmem:[%s3715_s7 + $0x130] ss:$8 sps:$4 sm:$0xff]   ;;  %v2931_v22 = vld [vmem:[%s3715_s7 + $0x24] ss:$8 sps:$4 sm:$0xff]  }
 0x1ba   : > { %v923_v24 = vpop.f32.mrf.mxu0  ;;  %2239 = vmatprep.subr.bf16.mxu1 %v2931_v22 }
 0x1bb   : > { %v924_v26 = vadd.f32 %v3407_v36, %v923_v24  ;;  %v974_v39 = vmax.f32 %v932_v34, 0.0  ;;  %v2934_v24 = vld [vmem:[%s3715_s7 + $0x124] ss:$8 sps:$4 sm:$0xff]   ;;  %v2940_v34 = vld [vmem:[%s3715_s7 + $0x114] ss:$8 sps:$4 sm:$0xff]  }
 0x1bd   : > { %v972_v30 = vmax.f32 %v924_v26, 0.0  ;;  %v986_v41 = vpack.c.bf16 %v974_v39, %v973_v40  ;;  %v2943_v39 = vld [vmem:[%s3715_s7 + $0x4] ss:$8 sps:$4 sm:$0xff]  }
 0x1be   : > { %v2946_v40 = vld [vmem:[%s3715_s7 + $0x104] ss:$8 sps:$4 sm:$0xff]  }
 0x1bf   : > { %v985_v37 = vpack.c.bf16 %v972_v30, %v971_v27  ;;  %v2929_v27 = vld [vmem:[%s3715_s7 + $0x20] ss:$8 sps:$4 sm:$0xff]   ;;  %v2937_v30 = vld [vmem:[%s3715_s7 + $0x14] ss:$8 sps:$4 sm:$0xff]  }
 0x1c0   : > { %2240 = vmatpush1.bf16.msra.mxu1 %v2929_v27 }
 0x1c1   : > { %1258 = vmatmul.mubr.bf16.gmra.mxu1 %v985_v37  ;;  %1371 = vmatmul.mubr.bf16.gmra.mxu0 %v985_v37  ;;  %v2935_v37 = vld [vmem:[%s3715_s7 + $0x10] ss:$8 sps:$4 sm:$0xff]  }
 0x1c2   : > { %1267 = vmatprep.mubr.bf16.mxu1 %v3102_v1  ;;  %1380 = vmatprep.mubr.bf16.mxu0 %v3102_v1 }
 0x1c3   : > { %2241 = vmatprep.subr.bf16.mxu1 %v2937_v30 }
 0x1c4   : > { %2242 = vmatpush1.bf16.msra.mxu1 %v2935_v37 }
 0x1c5   : > { %2243 = vmatprep.subr.bf16.mxu1 %v2943_v39 }
 0x1c9   : > { %1268 = vmatmul.mubr.bf16.gmra.mxu1 %v986_v41  ;;  %1381 = vmatmul.mubr.bf16.gmra.mxu0 %v986_v41  ;;  %v2941_v41 = vld [vmem:[%s3715_s7] ss:$8 sps:$4 sm:$0xff]  }
 0x1ca   : > { %1277 = vmatprep.mubr.bf16.mxu1 %v3102_v1  ;;  %1390 = vmatprep.mubr.bf16.mxu0 %v3102_v1 }
 0x1cb   : > { %2244 = vmatpush1.bf16.msra.mxu1 %v2941_v41 }
 0x1d9   : > { %v2761_v42 = vpop.f32.mrf.mxu0 }
 0x1da   : > { %v945_v29 = vadd.f32 %v2761_v42, %v3407_v36  ;;  %v2944_v42 = vld [vmem:[%s3715_s7 + $0x100] ss:$8 sps:$4 sm:$0xff]  }
 0x1db   : > { %v936_v43 = vpop.f32.mrf.mxu0 }
 0x1dc   : > { %v937_v44 = vadd.f32 %v3407_v36, %v936_v43  ;;  %v977_v52 = vmax.f32 %v945_v29, 0.0  ;;  %v2949_v43 = vld [vmem:[%s3715_s7 + $0xf4] ss:$8 sps:$4 sm:$0xff]   ;;  %v2953_v29 = vld [vmem:[%s3715_s7 + $0xe0] ss:$8 sps:$4 sm:$0xff]  }
 0x1dd   : > { %v2762_v45 = vpop.f32.mrf.mxu0  ;;  %2245 = vmatprep.subr.bf16.mxu1 %v2949_v43 }
 0x1de   : > { %v975_v47 = vmax.f32 %v937_v44, 0.0  ;;  %v948_v49 = vadd.f32 %v2762_v45, %v3407_v36  ;;  %v2952_v44 = vld [vmem:[%s3715_s7 + $0x1f4] ss:$8 sps:$4 sm:$0xff]   ;;  %v2947_v45 = vld [vmem:[%s3715_s7 + $0xf0] ss:$8 sps:$4 sm:$0xff]  }
 0x1df   : > { %v939_v46 = vpop.f32.mrf.mxu0  ;;  %2246 = vmatpush2.bf16.msra.mxu1 %v2947_v45 }
 0x1e0   : > { %v940_v48 = vadd.f32 %v3407_v36, %v939_v46  ;;  %v978_v54 = vmax.f32 %v948_v49, 0.0  ;;  %v2950_v46 = vld [vmem:[%s3715_s7 + $0x1f0] ss:$8 sps:$4 sm:$0xff]   ;;  %v2956_v49 = vld [vmem:[%s3715_s7 + $0x1e0] ss:$8 sps:$4 sm:$0xff]  }
 0x1e2   : > { %v976_v50 = vmax.f32 %v940_v48, 0.0  ;;  %v988_v55 = vpack.c.bf16 %v978_v54, %v977_v52  ;;  %v2958_v48 = vld [vmem:[%s3715_s7 + $0x1e4] ss:$8 sps:$4 sm:$0xff]   ;;  %v2959_v52 = vld [vmem:[%s3715_s7 + $0xd0] ss:$8 sps:$4 sm:$0xff]  }
 0x1e3   : > { %v2962_v54 = vld [vmem:[%s3715_s7 + $0x1d0] ss:$8 sps:$4 sm:$0xff]  }
 0x1e4   : > { %v987_v51 = vpack.c.bf16 %v976_v50, %v975_v47  ;;  %v2955_v47 = vld [vmem:[%s3715_s7 + $0xe4] ss:$8 sps:$4 sm:$0xff]   ;;  %v2961_v50 = vld [vmem:[%s3715_s7 + $0xd4] ss:$8 sps:$4 sm:$0xff]  }
 0x1e5   : > { %2247 = vmatprep.subr.bf16.mxu1 %v2955_v47 }
 0x1e6   : > { %1278 = vmatmul.mubr.bf16.gmra.mxu1 %v987_v51  ;;  %1391 = vmatmul.mubr.bf16.gmra.mxu0 %v987_v51  ;;  %v2964_v51 = vld [vmem:[%s3715_s7 + $0x1d4] ss:$8 sps:$4 sm:$0xff]  }
 0x1e7   : > { %1287 = vmatprep.mubr.bf16.mxu1 %v3102_v1  ;;  %1400 = vmatprep.mubr.bf16.mxu0 %v3102_v1 }
 0x1e8   : > { %2248 = vmatpush2.bf16.msra.mxu1 %v2953_v29 }
 0x1e9   : > { %2249 = vmatprep.subr.bf16.mxu1 %v2961_v50 }
 0x1ec   : > { %2250 = vmatpush2.bf16.msra.mxu1 %v2959_v52 }
 0x1ee   : > { %1288 = vmatmul.mubr.bf16.gmra.mxu1 %v988_v55  ;;  %1401 = vmatmul.mubr.bf16.gmra.mxu0 %v988_v55  ;;  %v2967_v55 = vld [vmem:[%s3715_s7 + $0xc4] ss:$8 sps:$4 sm:$0xff]  }
 0x1ef   : > { %1297 = vmatprep.mubr.bf16.mxu1 %v3102_v1  ;;  %1410 = vmatprep.mubr.bf16.mxu0 %v3102_v1 }
 0x1f0   : > { %2251 = vmatprep.subr.bf16.mxu1 %v2967_v55 }
 0x1f1   : > { %2252 = vmatpush2.bf16.msra.mxu1 %v2965_v58 }
 0x1f2   : > { %2253 = vmatprep.subr.bf16.mxu1 %v2973_v60 }
 0x1f5   : > { %2254 = vmatpush2.bf16.msra.mxu1 %v2971_v53 }
 0x1f6   : > { %2255 = vmatprep.subr.bf16.mxu1 %v2979_v33 }
 0x1f9   : > { %2256 = vmatpush2.bf16.msra.mxu1 %v2977_v63 }
 0x1fa   : > { %v2765_v2 = vpop.f32.mrf.mxu0  ;;  %2257 = vmatprep.subr.bf16.mxu1 %v2985_v35 }
 0x1fb   : > { %v961_v11 = vadd.f32 %v2765_v2, %v3407_v36  ;;  %v2982_v2 = vld [vmem:[%s3715_s7 + $0x1a4] ss:$8 sps:$4 sm:$0xff]  }
 0x1fc   : > { %v952_v3 = vpop.f32.mrf.mxu0 }
 0x1fd   : > { %v953_v5 = vadd.f32 %v3407_v36, %v952_v3  ;;  %v981_v18 = vmax.f32 %v961_v11, 0.0  ;;  %v2988_v3 = vld [vmem:[%s3715_s7 + $0x194] ss:$8 sps:$4 sm:$0xff]   ;;  %2258 = vmatpush2.bf16.msra.mxu1 %v2983_v4 }
 0x1fe   : > { %v2766_v6 = vpop.f32.mrf.mxu0 }
 0x1ff   : > { %v979_v8 = vmax.f32 %v953_v5, 0.0  ;;  %v964_v12 = vadd.f32 %v2766_v6, %v3407_v36  ;;  %v2986_v5 = vld [vmem:[%s3715_s7 + $0x190] ss:$8 sps:$4 sm:$0xff]   ;;  %v2991_v6 = vld [vmem:[%s3715_s7 + $0x84] ss:$8 sps:$4 sm:$0xff]  }
 0x200   : > { %v955_v7 = vpop.f32.mrf.mxu0  ;;  %2259 = vmatprep.subr.bf16.mxu1 %v2991_v6 }
 0x201   : > { %v956_v9 = vadd.f32 %v3407_v36, %v955_v7  ;;  %v2928_v36 = vld [vmem:[%s3715_s7 + $0x134] ss:$8 sps:$4 sm:$0xff]   ;;  %v982_v19 = vmax.f32 %v964_v12, 0.0  ;;  %v2994_v7 = vld [vmem:[%s3715_s7 + $0x184] ss:$8 sps:$4 sm:$0xff]  }
 0x202   : > { %2278 = vmatprep.subr.bf16.mxu0 %v2928_v36 }
 0x203   : > { %v980_v13 = vmax.f32 %v956_v9, 0.0  ;;  %2279 = vmatpush1.bf16.msra.mxu0 %v2926_v21  ;;  %v990_v26 = vpack.c.bf16 %v982_v19, %v981_v18  ;;  %v2992_v9 = vld [vmem:[%s3715_s7 + $0x180] ss:$8 sps:$4 sm:$0xff]  }
 0x204   : > { %2280 = vmatprep.subr.bf16.mxu0 %v2934_v24  ;;  %v1023_v19 = vld [vmem:[%s3714_s6] sm:$0xf] }
 0x205   : > { %v989_v16 = vpack.c.bf16 %v980_v13, %v979_v8  ;;  %v2989_v8 = vld [vmem:[%s3715_s7 + $0x80] ss:$8 sps:$4 sm:$0xff]   ;;  %v3636_v24 = vrot.slane %v1023_v19, %v3300_v28  ;;  %v3642_v27 = vrot.slane %v1023_v19, %v3306_v31 }
 0x206   : > { %2260 = vmatpush2.bf16.msra.mxu1 %v2989_v8 }
 0x207   : > { %1298 = vmatmul.mubr.bf16.gmra.mxu1 %v989_v16  ;;  %1411 = vmatmul.mubr.bf16.gmra.mxu0 %v989_v16 }
 0x208   : > { %1307 = vmatprep.mubr.bf16.mxu1 %v3102_v1  ;;  %1420 = vmatprep.mubr.bf16.mxu0 %v3102_v1  ;;  %v2932_v1 = vld [vmem:[%s3715_s7 + $0x120] ss:$8 sps:$4 sm:$0xff]  }
 0x209   : > { %2281 = vmatpush1.bf16.msra.mxu0 %v2932_v1  ;;  %2721 = vmatprep.subr.bf16.mxu1 %v2995_v56  ;;  %v3646_v1 = vrot.slane %v1023_v19, %v1039_v20 }
 0x20a   : > { %2282 = vmatprep.subr.bf16.mxu0 %v2940_v34 }
 0x20d   : > { %2283 = vmatpush1.bf16.msra.mxu0 %v2938_v38 }
 0x20e   : > { %2284 = vmatprep.subr.bf16.mxu0 %v2946_v40 }
 0x20f   : > { %1308 = vmatmul.mubr.bf16.gmra.mxu1 %v990_v26  ;;  %1421 = vmatmul.mubr.bf16.gmra.mxu0 %v990_v26  ;;  %v3639_v26 = vrot.slane %v1023_v19, %v3309_v32 }
 0x211   : > { %2285 = vmatpush1.bf16.msra.mxu0 %v2944_v42 }
 0x212   : > { %2286 = vmatprep.subr.bf16.mxu0 %v2952_v44 }
 0x215   : > { %2287 = vmatpush2.bf16.msra.mxu0 %v2950_v46 }
 0x216   : > { %2288 = vmatprep.subr.bf16.mxu0 %v2958_v48 }
 0x219   : > { %2289 = vmatpush2.bf16.msra.mxu0 %v2956_v49 }
 0x21a   : > { %2290 = vmatprep.subr.bf16.mxu0 %v2964_v51 }
 0x21d   : > { %2291 = vmatpush2.bf16.msra.mxu0 %v2962_v54 }
 0x21e   : > { %2292 = vmatprep.subr.bf16.mxu0 %v2970_v57 }
 0x221   : > { %2293 = vmatpush2.bf16.msra.mxu0 %v2968_v59 }
 0x222   : > { %2294 = vmatprep.subr.bf16.mxu0 %v2976_v61 }
 0x225   : > { %2295 = vmatpush2.bf16.msra.mxu0 %v2974_v62 }
 0x226   : > { %2296 = vmatprep.subr.bf16.mxu0 %v2982_v2 }
 0x229   : > { %2297 = vmatpush2.bf16.msra.mxu0 %v2980_v0 }
 0x22a   : > { %2298 = vmatprep.subr.bf16.mxu0 %v2988_v3 }
 0x22d   : > { %2299 = vmatpush2.bf16.msra.mxu0 %v2986_v5 }
 0x22e   : > { %2300 = vmatprep.subr.bf16.mxu0 %v2994_v7 }
 0x231   : > { %2301 = vmatpush2.bf16.msra.mxu0 %v2992_v9 }
 0x260   : > { %v1239_v10 = vpop.f32.mrf.mxu1  ;;  %v1352_v11 = vpop.f32.mrf.mxu0 }
 0x261   : > { %v1240_v39 = vadd.f32 %v1239_v10, %v3636_v24  ;;  %v1353_v40 = vadd.f32 %v1352_v11, %v3639_v26 }
 0x262   : > { %v1241_v12 = vpop.f32.mrf.mxu1  ;;  %v1354_v13 = vpop.f32.mrf.mxu0 }
 0x263   : > { %v1242_v43 = vadd.f32 %v1241_v12, %v3642_v27  ;;  %v1355_v44 = vadd.f32 %v1354_v13, %v3646_v1  ;;  %v1431_v55 = vmax.f32 %v1240_v39, 0.0  ;;  %v1433_v57 = vmax.f32 %v1353_v40, 0.0 }
 0x264   : > { %v1243_v14 = vpop.f32.mrf.mxu1  ;;  %v1356_v15 = vpop.f32.mrf.mxu0 }
 0x265   : > { %v1244_v30 = vadd.f32 %v1243_v14, %v3636_v24  ;;  %v1357_v34 = vadd.f32 %v1356_v15, %v3639_v26  ;;  %v1432_v60 = vmax.f32 %v1242_v43, 0.0  ;;  %v1434_v61 = vmax.f32 %v1355_v44, 0.0 }
 0x266   : > { %v1245_v16 = vpop.f32.mrf.mxu1  ;;  %v1358_v17 = vpop.f32.mrf.mxu0 }
 0x267   : > { %v1246_v41 = vadd.f32 %v1245_v16, %v3642_v27  ;;  %v1359_v42 = vadd.f32 %v1358_v17, %v3646_v1  ;;  %v1435_v47 = vmax.f32 %v1244_v30, 0.0  ;;  %v1437_v48 = vmax.f32 %v1357_v34, 0.0 }
 0x268   : > { %v1249_v36 = vpop.f32.mrf.mxu1  ;;  %v1362_v18 = vpop.f32.mrf.mxu0 }
 0x269   : > { %v1250_v45 = vadd.f32 %v1249_v36, %v3636_v24  ;;  %v1363_v46 = vadd.f32 %v1362_v18, %v3639_v26  ;;  %v1436_v58 = vmax.f32 %v1246_v41, 0.0  ;;  %v1438_v59 = vmax.f32 %v1359_v42, 0.0 }
 0x26a   : > { %v1251_v21 = vpop.f32.mrf.mxu1  ;;  %v1364_v22 = vpop.f32.mrf.mxu0  ;;  %v1642_v63 = vmax.f32 %v1431_v55, %v1435_v47  ;;  %v1684_v33 = vmax.f32 %v1433_v57, %v1437_v48 }
 0x26b   : > { %v1252_v29 = vadd.f32 %v1251_v21, %v3642_v27  ;;  %v1365_v49 = vadd.f32 %v1364_v22, %v3646_v1  ;;  %v1439_v53 = vmax.f32 %v1250_v45, 0.0  ;;  %v1441_v62 = vmax.f32 %v1363_v46, 0.0 }
 0x26c   : > { %v1253_v37 = vpop.f32.mrf.mxu1  ;;  %v1366_v38 = vpop.f32.mrf.mxu0  ;;  %v1663_v8 = vmax.f32 %v1432_v60, %v1436_v58  ;;  %v1705_v9 = vmax.f32 %v1434_v61, %v1438_v59 }
 0x26d   : > { %v1254_v50 = vadd.f32 %v1253_v37, %v3636_v24  ;;  %v1367_v51 = vadd.f32 %v1366_v38, %v3639_v26  ;;  %v1440_v4 = vmax.f32 %v1252_v29, 0.0  ;;  %v1442_v5 = vmax.f32 %v1365_v49, 0.0 }
 0x26e   : > { %v1255_v52 = vpop.f32.mrf.mxu1  ;;  %v1368_v54 = vpop.f32.mrf.mxu0  ;;  %v1643_v13 = vmax.f32 %v1642_v63, %v1439_v53  ;;  %v1685_v14 = vmax.f32 %v1684_v33, %v1441_v62 }
 0x26f   : > { %v1256_v0 = vadd.f32 %v1255_v52, %v3642_v27  ;;  %v1369_v2 = vadd.f32 %v1368_v54, %v3646_v1  ;;  %v1443_v6 = vmax.f32 %v1254_v50, 0.0  ;;  %v1445_v7 = vmax.f32 %v1367_v51, 0.0 }
 0x270   : > { %v1664_v21 = vmax.f32 %v1663_v8, %v1440_v4  ;;  %v1706_v22 = vmax.f32 %v1705_v9, %v1442_v5 }
 0x271   : > { %v1444_v17 = vmax.f32 %v1256_v0, 0.0  ;;  %v1446_v36 = vmax.f32 %v1369_v2, 0.0  ;;  %v1644_v30 = vmax.f32 %v1643_v13, %v1443_v6  ;;  %v1686_v34 = vmax.f32 %v1685_v14, %v1445_v7 }
 0x273   : > { %v1665_v47 = vmax.f32 %v1664_v21, %v1444_v17  ;;  %v1707_v48 = vmax.f32 %v1706_v22, %v1446_v36 }
 0x281   : > { %v1259_v35 = vpop.f32.mrf.mxu1  ;;  %v1372_v3 = vpop.f32.mrf.mxu0 }
 0x282   : > { %v1260_v56 = vadd.f32 %v1259_v35, %v3636_v24  ;;  %v1373_v10 = vadd.f32 %v1372_v3, %v3639_v26 }
 0x283   : > { %v1261_v11 = vpop.f32.mrf.mxu1  ;;  %v1374_v12 = vpop.f32.mrf.mxu0 }
 0x284   : > { %v1262_v15 = vadd.f32 %v1261_v11, %v3642_v27  ;;  %v1375_v16 = vadd.f32 %v1374_v12, %v3646_v1  ;;  %v1447_v37 = vmax.f32 %v1260_v56, 0.0  ;;  %v1449_v38 = vmax.f32 %v1373_v10, 0.0 }
 0x285   : > { %v1263_v18 = vpop.f32.mrf.mxu1  ;;  %v1376_v19 = vpop.f32.mrf.mxu0 }
 0x286   : > { %v1264_v39 = vadd.f32 %v1263_v18, %v3636_v24  ;;  %v1377_v40 = vadd.f32 %v1376_v19, %v3639_v26  ;;  %v1448_v43 = vmax.f32 %v1262_v15, 0.0  ;;  %v1450_v44 = vmax.f32 %v1375_v16, 0.0 }
 0x287   : > { %v1265_v41 = vpop.f32.mrf.mxu1  ;;  %v1378_v42 = vpop.f32.mrf.mxu0  ;;  %v1645_v58 = vmax.f32 %v1644_v30, %v1447_v37  ;;  %v1687_v59 = vmax.f32 %v1686_v34, %v1449_v38 }
 0x288   : > { %v1266_v45 = vadd.f32 %v1265_v41, %v3642_v27  ;;  %v1379_v46 = vadd.f32 %v1378_v42, %v3646_v1  ;;  %v1451_v29 = vmax.f32 %v1264_v39, 0.0  ;;  %v1453_v49 = vmax.f32 %v1377_v40, 0.0 }
 0x289   : > { %v1269_v50 = vpop.f32.mrf.mxu1  ;;  %v1382_v51 = vpop.f32.mrf.mxu0  ;;  %v1666_v53 = vmax.f32 %v1665_v47, %v1448_v43  ;;  %v1708_v62 = vmax.f32 %v1707_v48, %v1450_v44  ;;  %v3104_v43 = vmov 1966171168  }
 0x28a   : > { %v1452_v52 = vmax.f32 %v1266_v45, 0.0  ;;  %v1454_v54 = vmax.f32 %v1379_v46, 0.0  ;;  %v1270_v55 = vadd.f32 %v1269_v50, %v3636_v24  ;;  %v1383_v57 = vadd.f32 %v1382_v51, %v3639_v26 }
 0x28b   : > { %v1271_v60 = vpop.f32.mrf.mxu1  ;;  %v1384_v61 = vpop.f32.mrf.mxu0  ;;  %v1646_v0 = vmax.f32 %v1645_v58, %v1451_v29  ;;  %v1688_v2 = vmax.f32 %v1687_v59, %v1453_v49  ;;  %v1737_v44 = vunpack.c.l.s4 %v3104_v43 }
 0x28c   : > { %v1455_v63 = vmax.f32 %v1270_v55, 0.0  ;;  %v1457_v33 = vmax.f32 %v1383_v57, 0.0  ;;  %v1272_v35 = vadd.f32 %v1271_v60, %v3642_v27  ;;  %v1385_v3 = vadd.f32 %v1384_v61, %v3646_v1 }
 0x28d   : > { %v1273_v4 = vpop.f32.mrf.mxu1  ;;  %v1386_v5 = vpop.f32.mrf.mxu0  ;;  %v1667_v6 = vmax.f32 %v1666_v53, %v1452_v52  ;;  %v1709_v7 = vmax.f32 %v1708_v62, %v1454_v54  ;;  %v1738_v50 = vunpack.c.0.s8 %v1737_v44 }
 0x28e   : > { %v1274_v8 = vadd.f32 %v1273_v4, %v3636_v24  ;;  %v1387_v9 = vadd.f32 %v1386_v5, %v3639_v26  ;;  %v1647_v56 = vmax.f32 %v1646_v0, %v1455_v63  ;;  %v1689_v10 = vmax.f32 %v1688_v2, %v1457_v33 }
 0x28f   : > { %v1456_v11 = vmax.f32 %v1272_v35, 0.0  ;;  %v1458_v12 = vmax.f32 %v1385_v3, 0.0  ;;  %v1275_v13 = vpop.f32.mrf.mxu1  ;;  %v1388_v14 = vpop.f32.mrf.mxu0  ;;  %v1741_v59 = vsub.s32 %v1738_v50, %v3296_v25  ;;  %v2998_v25 = vld [vmem:[#allocation5 + $0x30] sm:$0xff]  }
 0x290   : > { %v1459_v15 = vmax.f32 %v1274_v8, 0.0  ;;  %v1461_v16 = vmax.f32 %v1387_v9, 0.0  ;;  %v1276_v17 = vadd.f32 %v1275_v13, %v3642_v27  ;;  %v1389_v36 = vadd.f32 %v1388_v14, %v3646_v1 }
 0x291   : > { %v1668_v18 = vmax.f32 %v1667_v6, %v1456_v11  ;;  %v1710_v19 = vmax.f32 %v1709_v7, %v1458_v12 }
 0x292   : > { %v1648_v21 = vmax.f32 %v1647_v56, %v1459_v15  ;;  %v1690_v22 = vmax.f32 %v1689_v10, %v1461_v16  ;;  %v1460_v30 = vmax.f32 %v1276_v17, 0.0  ;;  %v1462_v24 = vmax.f32 %v1389_v36, 0.0 }
 0x294   : > { %v1657_v34 = vrot.slane %v1648_v21, 4  ;;  %v1699_v26 = vrot.slane %v1690_v22, 4  ;;  %v1669_v37 = vmax.f32 %v1668_v18, %v1460_v30  ;;  %v1711_v38 = vmax.f32 %v1710_v19, %v1462_v24 }
 0x296   : > { %v1658_v39 = vmax.f32 %v1648_v21, %v1657_v34  ;;  %v1700_v40 = vmax.f32 %v1690_v22, %v1699_v26  ;;  %v1678_v41 = vrot.slane %v1669_v37, 4  ;;  %v1720_v42 = vrot.slane %v1711_v38, 4 }
 0x298   : > { %v1659_v45 = vrot.slane %v1658_v39, 2  ;;  %v1701_v27 = vrot.slane %v1700_v40, 2  ;;  %v1679_v46 = vmax.f32 %v1669_v37, %v1678_v41  ;;  %v1721_v1 = vmax.f32 %v1711_v38, %v1720_v42  ;;  %v2996_v37 = vld [vmem:[#allocation5 + $0x38] sm:$0xff]   ;;  %v2997_v38 = vld [vmem:[#allocation5 + $0x70] sm:$0xff]  }
 0x299   : > { %v3003_v41 = vld [vmem:[#allocation5 + $0x58] sm:$0xff]  }
 0x29a   : > { %v1660_v47 = vmax.f32 %v1658_v39, %v1659_v45  ;;  %v1702_v48 = vmax.f32 %v1700_v40, %v1701_v27  ;;  %v1680_v29 = vrot.slane %v1679_v46, 2  ;;  %v1722_v49 = vrot.slane %v1721_v1, 2  ;;  %v3001_v39 = vld [vmem:[#allocation5 + $0x60] sm:$0xff]   ;;  %v3004_v42 = vld [vmem:[#allocation5 + $0x18] sm:$0xff]  }
 0x29b   : > { %v3002_v40 = vld [vmem:[#allocation5 + $0x20] sm:$0xff]  }
 0x29c   : > { %v1661_v51 = vrot.slane %v1660_v47, 1  ;;  %v1703_v52 = vrot.slane %v1702_v48, 1  ;;  %v1681_v54 = vmax.f32 %v1679_v46, %v1680_v29  ;;  %v1723_v55 = vmax.f32 %v1721_v1, %v1722_v49 }
 0x29e   : > { %v1682_v57 = vrot.slane %v1681_v54, 1  ;;  %v1724_v58 = vrot.slane %v1723_v55, 1  ;;  %v1662_v60 = vmax.f32 %v1660_v47, %v1661_v51  ;;  %v1704_v61 = vmax.f32 %v1702_v48, %v1703_v52 }
 0x2a0   : > { %v1683_v53 = vmax.f32 %v1681_v54, %v1682_v57  ;;  %v1725_v62 = vmax.f32 %v1723_v55, %v1724_v58  ;;  %v3005_v58 = vld [vmem:[#allocation5 + $0x50] sm:$0xff]  }
 0x2a2   : > { %v1734_v63 = vcombine.low %v1662_v60, %v1683_v53  ;;  %v1735_v33 = vcombine.low %v1704_v61, %v1725_v62  ;;  %v3007_v60 = vld [vmem:[#allocation5 + $0x48] sm:$0xff]   ;;  %v3009_v53 = vld [vmem:[#allocation5 + $0x40] sm:$0xff]  }
 0x2a3   : > { %v3008_v61 = vld [vmem:[#allocation5 + $0x8] sm:$0xff]   ;;  %v3010_v62 = vld [vmem:[#allocation5] sm:$0xff]  }
 0x2a4   : > { %v1742_v0 = vrot.slane %v1734_v63, %v1741_v59  ;;  %v1749_v2 = vrot.slane %v1735_v33, %v1741_v59  ;;  %v1897_v63 = vld [vmem:[%s3716_s8] sm:$0x3] }
 0x2a5   : > { %v2222_v33 = vrot.slane %v1897_v63, %v3300_v28 }
 0x2a6   : > { %v1750_v35 = vcombine.low %v1742_v0, %v1749_v2  ;;  %v1279_v3 = vpop.f32.mrf.mxu1  ;;  %v1392_v4 = vpop.f32.mrf.mxu0  ;;  %v2226_v0 = vrot.slane %v1897_v63, %v3306_v31 }
 0x2a8   : > { %v1757_v5 = vrot.slane %v1750_v35, %v1741_v59  ;;  %v1281_v6 = vpop.f32.mrf.mxu1  ;;  %v1394_v7 = vpop.f32.mrf.mxu0  ;;  %v3006_v59 = vld [vmem:[#allocation5 + $0x10] sm:$0xff]  }
 0x2aa   : > { %1763 = vst.msk [vmem:[#allocation2] sm:$0xf] %vm1761_vm1, %v1757_v5  ;;  %v1283_v8 = vpop.f32.mrf.mxu1  ;;  %v1396_v9 = vpop.f32.mrf.mxu0 }
 0x2ac   : > { %v1285_v56 = vpop.f32.mrf.mxu1  ;;  %v1398_v10 = vpop.f32.mrf.mxu0 }
 0x2ae   : > { %v1289_v11 = vpop.f32.mrf.mxu1  ;;  %v1402_v12 = vpop.f32.mrf.mxu0 }
 0x2b0   : > { %v1291_v13 = vpop.f32.mrf.mxu1  ;;  %v1404_v14 = vpop.f32.mrf.mxu0 }
 0x2b1   : > { %v1807_v15 = vld [vmem:[#allocation2] sm:$0xf] }
 0x2b2   : > { %v1816_v16 = vrot.slane %v1807_v15, %v3306_v31  ;;  %v1824_v17 = vrot.slane %v1807_v15, %v1039_v20  ;;  %v1812_v23 = vrot.slane %v1807_v15, %v3300_v28  ;;  %v1820_v36 = vrot.slane %v1807_v15, %v3309_v32  ;;  %v1293_v18 = vpop.f32.mrf.mxu1  ;;  %v1406_v19 = vpop.f32.mrf.mxu0  ;;  %v2999_v20 = vld [vmem:[#allocation5 + $0x68] sm:$0xff]   ;;  %v2347_v31 = vld [vmem:[%s3718_s10] sm:$0x1] }
 0x2b3   : > { %v3000_v32 = vld [vmem:[#allocation5 + $0x28] sm:$0xff]  }
 0x2b4   : > { %v1830_v21 = vpack.c.bf16 %v1816_v16, %v1816_v16  ;;  %v1832_v22 = vpack.c.bf16 %v1824_v17, %v1824_v17  ;;  %v1829_v30 = vpack.c.bf16 %v1812_v23, %v1812_v23  ;;  %v1831_v24 = vpack.c.bf16 %v1820_v36, %v1820_v36  ;;  %v1295_v34 = vpop.f32.mrf.mxu1  ;;  %v1408_v26 = vpop.f32.mrf.mxu0 }
 0x2b6   : > { %2261 = vmatprep.mubr.bf16.mxu1 %v1830_v21  ;;  %2302 = vmatprep.mubr.bf16.mxu0 %v1832_v22 }
 0x2b7   : > { %2262 = vmatmul.mubr.bf16.vlgmr.msra.gmra.mxu1 %v1829_v30  ;;  %2303 = vmatmul.mubr.bf16.vlgmr.msra.gmra.mxu0 %v1831_v24 }
 0x2b8   : > { %2722 = vmatpush3.bf16.msra.mxu1 %v2996_v37 }
 0x2b9   : > { %2723 = vmatprep.subr.bf16.mxu1 %v2997_v38 }
 0x2bc   : > { %2724 = vmatpush3.bf16.msra.mxu1 %v2998_v25 }
 0x2bd   : > { %2725 = vmatprep.subr.bf16.mxu1 %v2999_v20 }
 0x2c0   : > { %2726 = vmatpush3.bf16.msra.mxu1 %v3000_v32 }
 0x2c1   : > { %2727 = vmatprep.subr.bf16.mxu1 %v3001_v39 }
 0x2c4   : > { %2728 = vmatpush3.bf16.msra.mxu1 %v3002_v40 }
 0x2c5   : > { %2729 = vmatprep.subr.bf16.mxu1 %v3003_v41 }
 0x2c7   : > { %v1299_v43 = vpop.f32.mrf.mxu1  ;;  %v1412_v44 = vpop.f32.mrf.mxu0 }
 0x2c8   : > { %2730 = vmatpush3.bf16.msra.mxu1 %v3004_v42 }
 0x2c9   : > { %v1301_v45 = vpop.f32.mrf.mxu1  ;;  %v1414_v27 = vpop.f32.mrf.mxu0  ;;  %2731 = vmatprep.subr.bf16.mxu1 %v3005_v58 }
 0x2cb   : > { %v1303_v46 = vpop.f32.mrf.mxu1  ;;  %v1416_v1 = vpop.f32.mrf.mxu0 }
 0x2cc   : > { %2732 = vmatpush3.bf16.msra.mxu1 %v3006_v59 }
 0x2cd   : > { %v1305_v47 = vpop.f32.mrf.mxu1  ;;  %v1418_v48 = vpop.f32.mrf.mxu0  ;;  %2733 = vmatprep.subr.bf16.mxu1 %v3007_v60 }
 0x2cf   : > { %v1309_v29 = vpop.f32.mrf.mxu1  ;;  %v1422_v49 = vpop.f32.mrf.mxu0 }
 0x2d0   : > { %2734 = vmatpush3.bf16.msra.mxu1 %v3008_v61 }
 0x2d1   : > { %v1311_v50 = vpop.f32.mrf.mxu1  ;;  %v1424_v51 = vpop.f32.mrf.mxu0  ;;  %2735 = vmatprep.subr.bf16.mxu1 %v3009_v53 }
 0x2d3   : > { %v1313_v52 = vpop.f32.mrf.mxu1  ;;  %v1426_v54 = vpop.f32.mrf.mxu0 }
 0x2d4   : > { %2736 = vmatpush3.bf16.msra.mxu1 %v3010_v62 }
 0x2d5   : > { %v1315_v55 = vpop.f32.mrf.mxu1  ;;  %v1428_v57 = vpop.f32.mrf.mxu0 }
 0x377   : > { %v2263_v2 = vpop.f32.mrf.mxu1  ;;  %v2304_v35 = vpop.f32.mrf.mxu0 }
 0x378   : > { %v2264_v3 = vadd.f32 %v2263_v2, %v2222_v33 }
 0x379   : > { %v2265_v4 = vpop.f32.mrf.mxu1  ;;  %v2306_v5 = vpop.f32.mrf.mxu0 }
 0x37a   : > { %v2305_v6 = vadd.f32 %v2304_v35, %v2264_v3  ;;  %v2266_v7 = vadd.f32 %v2265_v4, %v2226_v0 }
 0x37b   : > { %v2267_v8 = vpop.f32.mrf.mxu1  ;;  %v2308_v9 = vpop.f32.mrf.mxu0 }
 0x37c   : > { %v2307_v56 = vadd.f32 %v2306_v5, %v2266_v7  ;;  %v2311_v10 = vmax.f32 %v2305_v6, 0.0 }
 0x37d   : > { %v2268_v11 = vpop.f32.mrf.mxu1  ;;  %v2309_v12 = vpop.f32.mrf.mxu0 }
 0x37e   : > { %v2312_v13 = vmax.f32 %v2307_v56, 0.0  ;;  %v2313_v15 = vpack.c.bf16 %v2311_v10, %v2311_v10 }
 0x380   : > { %v2314_v14 = vpack.c.bf16 %v2312_v13, %v2312_v13 }
 0x382   : > { %2476 = vmatprep.mubr.bf16.mxu1 %v2314_v14 }
 0x383   : > { %2477 = vmatmul.mubr.bf16.vlgmr.msra.gmra.mxu1 %v2313_v15 }
 0x443   : > { %v2737_v28 = vpop.f32.mrf.mxu1 }
 0x445   : > { %v2738_v16 = vpop.f32.mrf.mxu1 }
 0x446   : > { %v2739_v17 = vadd.f32 %v2738_v16, %v2737_v28 }
 0x447   : > { %v2740_v23 = vpop.f32.mrf.mxu1 }
 0x448   : > { %v2479_v36 = vadd.f32 %v2739_v17, %v2347_v31 }
 0x449   : > { %v2741_v18 = vpop.f32.mrf.mxu1 }
 0x44a   : > { %2484 = vst [vmem:[%s440_s28] sm:$0x1] %v2479_v36 }
 0x44b PF: > { %s23_s19 = sadd.s32 1, %s3093_s19   ;;  %s3723_s17 = smov %s3089_s18 }
 0x44c   : > { %p20_p3 = scmp.ge.s32.totalorder %s23_s19, 4   ;;  %s3724_s18 = smov %s3726_s21 }
 0x44e   :  { %22 = sbr.rel (!%p20_p3) target bundleno = 3 (0x3), region = 115 }
 0x453   :  { %2502 = vsyncpa [#allocation4], 1 }
 0x454   :  { %2504 = vsyncpa [#allocation4 + $0x1], 1 }
 0x455   :  { %2505 = vsyncpa [#allocation6], 1 }

// kernel: _lambda_.3
= control target key start
LH: loop header
LB: loop body
LE: loop exit
PB: predicated region body
PF: predicated region fallthrough
CT: control target
= control target key end

     0   :  { %s6830_s0 = inlined_call_operand.vmem [shape: f32[2,1,128], index: 0, kind: input, shape index: {}]   ;;  %s6831_s1 = inlined_call_operand.vmem [shape: f32[2,128,3], index: 1, kind: input, shape index: {}]   ;;  %s6832_s2 = inlined_call_operand.vmem [shape: f32[3,32], index: 2, kind: input, shape index: {}]   ;;  %s6833_s3 = inlined_call_operand.vmem [shape: f32[1,32], index: 3, kind: input, shape index: {}]   ;;  %s6834_s4 = inlined_call_operand.vmem [shape: bf16[32,128], index: 4, kind: input, shape index: {}]   ;;  %s6835_s5 = inlined_call_operand.vmem [shape: f32[1,128], index: 5, kind: input, shape index: {}]   ;;  %s6836_s6 = inlined_call_operand.hbm [shape: bf16[128,256], index: 6, kind: input, shape index: {}]   ;;  %s6837_s7 = inlined_call_operand.vmem [shape: f32[1,256], index: 7, kind: input, shape index: {}]   ;;  %s6838_s8 = inlined_call_operand.hbm [shape: bf16[256,512], index: 8, kind: input, shape index: {}]   ;;  %s6839_s9 = inlined_call_operand.vmem [shape: f32[1,512], index: 9, kind: input, shape index: {}]   ;;  %s6840_s10 = inlined_call_operand.vmem [shape: bf16[512,512], index: 10, kind: input, shape index: {}]   ;;  %s6841_s11 = inlined_call_operand.vmem [shape: f32[1,512], index: 11, kind: input, shape index: {}]   ;;  %s6842_s12 = inlined_call_operand.hbm [shape: bf16[512,256], index: 12, kind: input, shape index: {}]   ;;  %s6843_s13 = inlined_call_operand.vmem [shape: f32[1,256], index: 13, kind: input, shape index: {}]   ;;  %s6844_s14 = inlined_call_operand.vmem [shape: bf16[256,128], index: 14, kind: input, shape index: {}]   ;;  %s6845_s15 = inlined_call_operand.vmem [shape: f32[1,128], index: 15, kind: input, shape index: {}]   ;;  %s6846_s16 = inlined_call_operand.hbm [shape: bf16[128,512], index: 16, kind: input, shape index: {}]   ;;  %s6847_s17 = inlined_call_operand.vmem [shape: f32[1,512], index: 17, kind: input, shape index: {}]   ;;  %s6848_s18 = inlined_call_operand.vmem [shape: f32[2,1,512], index: 18, kind: output, shape index: {}]  }
   0x1   :  { %6854 = sst [smem:[#allocation15_spill]] %s6830_s0 }
   0x2   :  { %6855 = sst [smem:[#allocation16_spill]] %s6831_s1 }
   0x3   :  { %6856 = sst [smem:[#allocation17_spill]] %s6832_s2 }
   0x4   :  { %6857 = sst [smem:[#allocation18_spill]] %s6838_s8 }
   0x5   :  { %23 = vsyncpa [#allocation4], 0 }
   0x6   :  { %24 = vsyncpa [#allocation6], 0 }
   0x7   :  { %25 = vsyncpa [#allocation9], 0  ;;  %s5930_s27 = smov 0   ;;  %s5932_s28 = smov 0  }
   0x8   :  { %s5934_s29 = smov 0  }
   0x9 LB: > { %6858 = sst [smem:[#allocation13_spill]] %s5811_s28  ;;  %s5817_s30 = smov [#allocation5]   ;;  %s5815_s29 = sphi %s5934_s29, %s31_s29   ;;  %s5811_s28 = sphi %s5932_s28, %s6874_s28   ;;  %s5807_s27 = sphi %s5930_s27, %s6873_s27  }
   0xa   : > { %s504_s0 = sshll.u32 %s5817_s30, 4  ;;  %s4682_s19 = sadd.s32 4294967295, %s5815_s29   ;;  %s505_s0 = int_to_ptr.vmem [resolvable:$true] %s504_s0 }
   0xb   : > { %p4684_p0 = scmp.ge.s32.totalorder %s5815_s29, 1  ;;  %p464_p1 = scmp.lt.s32.totalorder %s5815_s29, 3 }
   0xc   : > { %p5948_p2 = scmp.eq.s32.totalorder %s4682_s19, 0  ;;  %s43_s22 = sadd.s32 1, %s5811_s28 }
   0xd   : > { %p5952_p3 = pnand %p4684_p0, %p464_p1  ;;  %p5965_p6 = scmp.ge.s32.totalorder %s43_s22, 2 }
   0xe   : > { %s6859_s1 = scalar_select %p5948_p2, 1, 0 }
   0xf   : > { %p5101_p4 = pneg %p5952_p3  ;;  %s5818_s23 = smov [#allocation3]  }
  0x10   : > { %s488_s24 = sshll.u32 %s5818_s23, 4  ;;  %s5688_s25 = scalar_lea.vmem %s505_s0, 8192  ;;  %s489_s24 = int_to_ptr.vmem [resolvable:$true] %s488_s24 }
  0x11   : > { %p5960_p5 = pnand %p5948_p2, %p5101_p4  ;;  %p5689_p8 = scmp.ne.s32.totalorder %s505_s0, %s5688_s25 }
  0x12   : > { %p5696_p11 = scmp.lt.s32.totalorder %s505_s0, %s505_s0  ;;  %p5697_p12 = scmp.lt.s32.totalorder %s5688_s25, %s5688_s25 }
  0x13   : > { %p5679_p7 = pneg %p5960_p5 }
  0x14   : > { %p5698_p13 = por %p5697_p12, %p5696_p11 }
  0x15   : > { %p5691_p9 = pnand %p5689_p8, %p5679_p7 }
  0x17   : > { %p5692_p10 = pneg %p5691_p9 }
  0x19   : > { %p5699_p0 = pnand %p5698_p13, %p5692_p10 }
  0x1b   : > { %5702 = shalt.err (!%p5699_p0)
}
  0x1c   : > { %s6850_s26 = smov 256   ;;  %s6851_s30 = smov 16  }
  0x1d   : > { %s6863_s8 = sld [smem:[#allocation18_spill]]  ;;  %s6876_s22 = smov (%p5965_p6, %s43_s22), 0 }
  0x1e   : > { %6864 = sst [smem:[#allocation14_spill]] %s6876_s22  ;;  %s5714_s25 = scalar_lea.vmem %s489_s24, 2048 }
  0x1f   : > { %p5715_p1 = scmp.ne.s32.totalorder %s489_s24, %s5714_s25  ;;  %p5722_p9 = scmp.lt.s32.totalorder %s489_s24, %s489_s24 }
  0x20   : > { %p5723_p10 = scmp.lt.s32.totalorder %s5714_s25, %s5714_s25 }
  0x21   : > { %p5717_p4 = pnand %p5715_p1, %p5679_p7 }
  0x22   : > { %p5724_p11 = por %p5723_p10, %p5722_p9 }
  0x23   : > { %5107 = dma.hbm_to_vmem [thread:$0]  (!%p5960_p5), %s6863_s8, 8192, %s505_s0, [#allocation6], %s6850_s26, %s6850_s26, %s6851_s30  }
  0x24   : > { %p5718_p8 = pneg %p5717_p4 }
  0x26   : > { %p5725_p12 = pnand %p5724_p11, %p5718_p8 }
  0x28   : > { %5728 = shalt.err (!%p5725_p12)
}
  0x29   : > { %s5821_s28 = smov 128   ;;  %s5822_s19 = smov 8  }
  0x2a   : > { %5104 = dma.hbm_to_vmem [thread:$0]  (!%p5960_p5), %s6836_s6, 2048, %s489_s24, [#allocation4], %s5821_s28, %s5821_s28, %s5822_s19  }
  0x2b   : > { %s5823_s23 = smov [#allocation7]   ;;  %s5824_s30 = smov [#allocation8]  }
  0x2c   : > { %s526_s26 = sshll.u32 %s5823_s23, 4  ;;  %s548_s8 = sshll.u32 %s5824_s30, 4  ;;  %s527_s26 = int_to_ptr.vmem [resolvable:$true] %s526_s26  ;;  %s549_s8 = int_to_ptr.vmem [resolvable:$true] %s548_s8 }
  0x2d   : > { %s5740_s22 = scalar_lea.vmem %s527_s26, 8192  ;;  %p5748_p1 = scmp.lt.s32.totalorder %s527_s26, %s527_s26 }
  0x2e   : > { %p5741_p6 = scmp.ne.s32.totalorder %s527_s26, %s5740_s22  ;;  %p5749_p4 = scmp.lt.s32.totalorder %s5740_s22, %s5740_s22 }
  0x30   : > { %p5743_p13 = pnand %p5741_p6, %p5679_p7  ;;  %p5750_p8 = por %p5749_p4, %p5748_p1 }
  0x32   : > { %p5744_p0 = pneg %p5743_p13 }
  0x34   : > { %p5751_p9 = pnand %p5750_p8, %p5744_p0 }
  0x36   : > { %5754 = shalt.err (!%p5751_p9)
}
  0x37   : > { %5110 = dma.hbm_to_vmem [thread:$0]  (!%p5960_p5), %s6842_s12, 8192, %s527_s26, [#allocation6], %s5821_s28, %s5821_s28, %s5822_s19  }
  0x38   : > { %s5766_s30 = scalar_lea.vmem %s549_s8, 4096  ;;  %p5774_p6 = scmp.lt.s32.totalorder %s549_s8, %s549_s8 }
  0x39   : > { %p5767_p10 = scmp.ne.s32.totalorder %s549_s8, %s5766_s30  ;;  %p5775_p13 = scmp.lt.s32.totalorder %s5766_s30, %s5766_s30 }
  0x3b   : > { %p5769_p11 = pnand %p5767_p10, %p5679_p7  ;;  %p5776_p2 = por %p5775_p13, %p5774_p6 }
  0x3d   : > { %p5770_p12 = pneg %p5769_p11 }
  0x3f   : > { %p5777_p1 = pnand %p5776_p2, %p5770_p12 }
  0x41   : > { %5780 = shalt.err (!%p5777_p1)
}
  0x42   : > { %s6865_s22 = smov 16   ;;  %s6866_s0 = smov 256  }
  0x43   : > { %5113 = dma.hbm_to_vmem [thread:$0]  (!%p5960_p5), %s6846_s16, 4096, %s549_s8, [#allocation9], %s6866_s0, %s6866_s0, %s6865_s22  }
  0x44   : > { %586 = sbr.rel (%p5952_p3) target bundleno = 1850 (0x73a), region = 92  ;;  %p6867_p7 = scmp.ne.s32.totalorder (!%p5952_p3), %s6859_s1, 0 }
  0x49   : > { %5794 = dma.done.wait (%p6867_p7), [#allocation4], 2048  }
  0x4a   : > { %5796 = vsyncadd (%p6867_p7), [#allocation4], 4294965248 }
  0x4b   : > { %5798 = dma.done.wait (%p6867_p7), [#allocation6], 16384  }
  0x4c   : > { %5800 = vsyncadd (%p6867_p7), [#allocation6], 4294950912 }
  0x4d   : > { %5802 = dma.done.wait (%p6867_p7), [#allocation9], 4096  }
  0x4e   : > { %5804 = vsyncadd (%p6867_p7), [#allocation9], 4294963200  ;;  %p658_p2 = scmp.lt.s32.totalorder %s5807_s27, 1  ;;  %v5825_v0 = vmov 3   ;;  %v5826_v1 = vmov 0   ;;  %s6868_s20 = sld [smem:[#allocation15_spill]]  ;;  %v699_v31 = vlaneseq }
  0x4f   : > { %5164 = vset.pattern.permute.xlu0 %v5825_v0  ;;  %5166 = vset.pattern.permute.xlu1 %v5826_v1  ;;  %v5827_v3 = vmov 6   ;;  %v5828_v4 = vmov 4   ;;  %v5829_v5 = vmov 1   ;;  %v5830_v6 = vmov 7   ;;  %s6869_s25 = sld [smem:[#allocation16_spill]]  ;;  %v5203_v17 = vld [vmem:[%s6834_s4 + $0x8] sm:$0xff]  }
  0x50   : > { %s6878_s27 = smov (!%p658_p2, %s5807_s27), 1  ;;  %1456 = vmatprep.mubr.bf16.mxu1 %v5826_v1  ;;  %v5831_v7 = vmov 5   ;;  %v5832_v8 = vmov 8   ;;  %v5833_v10 = vmov 2   ;;  %5065 = vmatprep.subr.bf16.mxu0 %v5203_v17  ;;  %v5204_v20 = vld [vmem:[%s6834_s4] sm:$0xff]   ;;  %v6098_v34 = vshrl.u32 %v699_v31, 7 }
  0x51   : > { %s5032_s1 = sshll.u32 %s6878_s27, 7  ;;  %5066 = vmatpush3.bf16.msra.mxu0 %v5203_v17  ;;  %s6870_s28 = sld [smem:[#allocation17_spill]]  ;;  %vm1170_vm0 = vcmask 261120   ;;  %vm6535_vm1 = vcmp.lt.s32.totalorder %v699_v31, 512 }
  0x52   : > { %5067 = vmatprep.subr.bf16.mxu0 %v5204_v20  ;;  %v6102_v37 = vsub.s32 0, %v6098_v34  ;;  %s4697_s2 = sshll.u32 %s6878_s27, 2 }
  0x54   : > { %s660_s21 = scalar_lea.vmem %s6868_s20, %s6878_s27 }
  0x55   : > { %v693_v2 = vld [vmem:[%s660_s21] sm:$0x1]  ;;  %s6042_s24 = scalar_lea.vmem %s6869_s25, %s5032_s1  ;;  %5068 = vmatpush3.bf16.msra.mxu0 %v5204_v20 }
  0x56   : > { %696 = vperm.xlu1 %5166, %v693_v2   ;;  %705 = vperm.xlu0 %5164, %v693_v2   ;;  %v676_v9 = vld [vmem:[%s6042_s24] sm:$0xff]  ;;  %v679_v11 = vld [vmem:[%s6042_s24 + $0x18] sm:$0xff]  ;;  %v677_v12 = vld [vmem:[%s6042_s24 + $0x8] sm:$0xff] }
  0x57   : > { %v681_v13 = vld [vmem:[%s6042_s24 + $0x28] sm:$0xff]  ;;  %v678_v14 = vld [vmem:[%s6042_s24 + $0x10] sm:$0xff]  ;;  %v680_v19 = vld [vmem:[%s6042_s24 + $0x20] sm:$0xff] }
  0x58   : > { %v682_v15 = vld [vmem:[%s6042_s24 + $0x30] sm:$0xff]  ;;  %v685_v16 = vld [vmem:[%s6042_s24 + $0x48] sm:$0xff]  ;;  %v684_v21 = vld [vmem:[%s6042_s24 + $0x40] sm:$0xff] }
  0x59   : > { %v686_v18 = vld [vmem:[%s6042_s24 + $0x50] sm:$0xff]  ;;  %v687_v22 = vld [vmem:[%s6042_s24 + $0x58] sm:$0xff]  ;;  %v689_v24 = vld [vmem:[%s6042_s24 + $0x68] sm:$0xff] }
  0x5a   : > { %5167 = vset.pattern.permute.xlu1 %v5827_v3  ;;  %5165 = vset.pattern.permute.xlu0 %v5828_v4  ;;  %v683_v23 = vld [vmem:[%s6042_s24 + $0x38] sm:$0xff]  ;;  %v6081_v25 = vld [vmem:[%s6042_s24 + $0x70] sm:$0xff]  ;;  %v688_v28 = vld [vmem:[%s6042_s24 + $0x60] sm:$0xff] }
  0x5b   : > { %718 = vperm.xlu1 %5167, %v693_v2   ;;  %740 = vperm.xlu0 %5165, %v693_v2   ;;  %v691_v36 = vld [vmem:[%s6042_s24 + $0x78] sm:$0xff]  ;;  %v692_v42 = vld [vmem:[%s6870_s28] sm:$0x7]  ;;  %s674_s28 = scalar_lea.vmem %s6848_s18, %s4697_s2 }
  0x5f   : > { %5168 = vset.pattern.permute.xlu1 %v5829_v5  ;;  %5169 = vset.pattern.permute.xlu0 %v5830_v6 }
  0x60   : > { %731 = vperm.xlu1 %5168, %v693_v2   ;;  %753 = vperm.xlu0 %5169, %v693_v2  }
  0x64   : > { %5170 = vset.pattern.permute.xlu1 %v5831_v7  ;;  %5172 = vset.pattern.permute.xlu0 %v5832_v8 }
  0x65   : > { %775 = vperm.xlu1 %5170, %v693_v2   ;;  %788 = vperm.xlu0 %5172, %v693_v2  }
  0x69   : > { %5171 = vset.pattern.permute.xlu1 %v5833_v10  ;;  %5174 = vset.pattern.permute.xlu0 %v5829_v5 }
  0x6a   : > { %766 = vperm.xlu1 %5171, %v693_v2   ;;  %901 = vperm.xlu0 %5174, %v676_v9  }
  0x6e   : > { %5173 = vset.pattern.permute.xlu1 %v5826_v1  ;;  %5178 = vset.pattern.permute.xlu0 %v5833_v10 }
  0x6f   : > { %1001 = vperm.xlu0 %5178, %v676_v9   ;;  %802 = vperm.xlu1 %5173, %v676_v9  }
  0x73   : > { %1013 = vperm.xlu0 %5178, %v679_v11   ;;  %807 = vperm.xlu1 %5173, %v677_v12  }
  0x77   : > { %5180 = vset.pattern.permute.xlu0 %v5826_v1  ;;  %5175 = vset.pattern.permute.xlu1 %v5829_v5 }
  0x78   : > { %817 = vperm.xlu0 %5180, %v679_v11   ;;  %905 = vperm.xlu1 %5175, %v677_v12  }
  0x7c   : > { %827 = vperm.xlu0 %5180, %v681_v13   ;;  %5176 = vset.pattern.permute.xlu1 %v5826_v1 }
  0x7d   : > { %812 = vperm.xlu1 %5176, %v678_v14  }
  0x80   : > { %832 = vperm.xlu0 %5180, %v682_v15  }
  0x81   : > { %5177 = vset.pattern.permute.xlu1 %v5829_v5 }
  0x82   : > { %909 = vperm.xlu1 %5177, %v678_v14  }
  0x84   : > { %5184 = vset.pattern.permute.xlu0 %v5829_v5 }
  0x85   : > { %925 = vperm.xlu0 %5184, %v682_v15  }
  0x86   : > { %913 = vperm.xlu1 %5177, %v679_v11  }
  0x89   : > { %5187 = vset.pattern.permute.xlu0 %v5833_v10 }
  0x8a   : > { %1021 = vperm.xlu0 %5187, %v681_v13   ;;  %5179 = vset.pattern.permute.xlu1 %v5833_v10 }
  0x8b   : > { %1005 = vperm.xlu1 %5179, %v677_v12  }
  0x8e   : > { %5190 = vset.pattern.permute.xlu0 %v5829_v5 }
  0x8f   : > { %937 = vperm.xlu0 %5190, %v685_v16   ;;  %1009 = vperm.xlu1 %5179, %v678_v14  }
  0x93   : > { %941 = vperm.xlu0 %5190, %v686_v18   ;;  %5181 = vset.pattern.permute.xlu1 %v5826_v1 }
  0x94   : > { %822 = vperm.xlu1 %5181, %v680_v19  }
  0x97   : > { %5193 = vset.pattern.permute.xlu0 %v5833_v10 }
  0x98   : > { %1033 = vperm.xlu0 %5193, %v684_v21   ;;  %5182 = vset.pattern.permute.xlu1 %v5829_v5 }
  0x99   : > { %917 = vperm.xlu1 %5182, %v680_v19  }
  0x9c   : > { %1045 = vperm.xlu0 %5193, %v687_v22  }
  0x9d   : > { %921 = vperm.xlu1 %5182, %v681_v13  }
  0xa0   : > { %5195 = vset.pattern.permute.xlu0 %v5826_v1 }
  0xa1   : > { %842 = vperm.xlu0 %5195, %v684_v21   ;;  %5183 = vset.pattern.permute.xlu1 %v5826_v1 }
  0xa2   : > { %837 = vperm.xlu1 %5183, %v683_v23  }
  0xa5   : > { %867 = vperm.xlu0 %5195, %v689_v24  }
  0xa6   : > { %5185 = vset.pattern.permute.xlu1 %v5829_v5 }
  0xa7   : > { %929 = vperm.xlu1 %5185, %v683_v23  }
  0xa9   : > { %872 = vperm.xlu0 %5195, %v6081_v25  }
  0xab   : > { %5186 = vset.pattern.permute.xlu1 %v5833_v10 }
  0xac   : > { %1017 = vperm.xlu1 %5186, %v680_v19  }
  0xad   : > { %5199 = vset.pattern.permute.xlu0 %v5829_v5 }
  0xae   : > { %957 = vperm.xlu0 %5199, %v6081_v25  }
  0xb0   : > { %1025 = vperm.xlu1 %5186, %v682_v15  }
  0xb2   : > { %5202 = vset.pattern.permute.xlu0 %v5833_v10 }
  0xb3   : > { %1053 = vperm.xlu0 %5202, %v689_v24  }
  0xb4   : > { %1029 = vperm.xlu1 %5186, %v683_v23   ;;  %v5208_v23 = vld [vmem:[#allocation3 + $0x64] ss:$8 sps:$4 sm:$0xff]  }
  0xb8   : > { %5188 = vset.pattern.permute.xlu1 %v5826_v1 }
  0xb9   : > { %847 = vperm.xlu1 %5188, %v685_v16  }
  0xbd   : > { %5189 = vset.pattern.permute.xlu1 %v5829_v5 }
  0xbe   : > { %933 = vperm.xlu1 %5189, %v684_v21   ;;  %v5205_v21 = vld [vmem:[#allocation3 + $0x74] ss:$8 sps:$4 sm:$0xff]  }
  0xbf   : > { %1424 = vmatprep.subr.bf16.mxu1 %v5205_v21 }
  0xc2   : > { %5191 = vset.pattern.permute.xlu1 %v5826_v1 }
  0xc3   : > { %852 = vperm.xlu1 %5191, %v686_v18  }
  0xc7   : > { %857 = vperm.xlu1 %5191, %v687_v22  }
  0xcb   : > { %5192 = vset.pattern.permute.xlu1 %v5829_v5 }
  0xcc   : > { %945 = vperm.xlu1 %5192, %v687_v22   ;;  %v5207_v22 = vld [vmem:[#allocation3 + $0x70] ss:$8 sps:$4 sm:$0xff]  }
  0xcd   : > { %1425 = vmatpush1.bf16.msra.mxu1 %v5207_v22 }
  0xce   : > { %1426 = vmatprep.subr.bf16.mxu1 %v5208_v23 }
  0xd0   : > { %5194 = vset.pattern.permute.xlu1 %v5833_v10 }
  0xd1   : > { %v697_v26 = vpop.permute.xlu1 %696  ;;  %1037 = vperm.xlu1 %5194, %v685_v16   ;;  %v706_v30 = vpop.permute.xlu0 %705 }
  0xd2   : > { %v711_v43 = vrot.slane %v706_v30, %v6102_v37  ;;  %v702_v54 = vrot.slane %v697_v26, %v6102_v37 }
  0xd4   : > { %v712_v52 = vmul.f32 %v711_v43, %v692_v42  ;;  %v703_v2 = vmul.f32 %v702_v54, %v692_v42 }
  0xd5   : > { %1041 = vperm.xlu1 %5194, %v686_v18  }
  0xd6   : > { %v719_v27 = vpop.permute.xlu1 %718  ;;  %v741_v32 = vpop.permute.xlu0 %740  ;;  %v714_v62 = vrot.slane %v712_v52, 1 }
  0xd7   : > { %v746_v39 = vrot.slane %v741_v32, %v6102_v37  ;;  %v724_v45 = vrot.slane %v719_v27, %v6102_v37  ;;  %v5210_v32 = vld [vmem:[#allocation3 + $0x60] ss:$8 sps:$4 sm:$0xff]  }
  0xd8   : > { %v716_v9 = vadd.f32 %v714_v62, %v703_v2  ;;  %1427 = vmatpush1.bf16.msra.mxu1 %v5210_v32  ;;  %v5219_v2 = vld [vmem:[#allocation3 + $0x30] ss:$8 sps:$4 sm:$0xff]  }
  0xd9   : > { %5196 = vset.pattern.permute.xlu1 %v5826_v1  ;;  %v747_v46 = vmul.f32 %v746_v39, %v692_v42  ;;  %v725_v55 = vmul.f32 %v724_v45, %v692_v42  ;;  %v6139_v39 = vld [vmem:[%s6833_s3] ss:$0 sm:$0xff]  ;;  %v5213_v45 = vld [vmem:[#allocation3 + $0x50] ss:$8 sps:$4 sm:$0xff]  }
  0xda   : > { %862 = vperm.xlu1 %5196, %v688_v28  }
  0xdb   : > { %v732_v29 = vpop.permute.xlu1 %731  ;;  %v754_v38 = vpop.permute.xlu0 %753  ;;  %v749_v56 = vrot.slane %v747_v46, 1  ;;  %v727_v3 = vrot.slane %v725_v55, 2  ;;  %v5214_v46 = vld [vmem:[#allocation3 + $0x44] ss:$8 sps:$4 sm:$0xff]   ;;  %v5216_v55 = vld [vmem:[#allocation3 + $0x40] ss:$8 sps:$4 sm:$0xff]  }
  0xdc   : > { %v737_v47 = vrot.slane %v732_v29, %v6102_v37  ;;  %v759_v48 = vrot.slane %v754_v38, %v6102_v37 }
  0xdd   : > { %v729_v12 = vadd.f32 %v727_v3, %v716_v9 }
  0xde   : > { %5197 = vset.pattern.permute.xlu1 %v5829_v5  ;;  %v738_v58 = vmul.f32 %v737_v47, %v692_v42  ;;  %v760_v59 = vmul.f32 %v759_v48, %v692_v42 }
  0xdf   : > { %949 = vperm.xlu1 %5197, %v688_v28  }
  0xe0   : > { %v776_v33 = vpop.permute.xlu1 %775  ;;  %v789_v40 = vpop.permute.xlu0 %788  ;;  %v762_v6 = vrot.slane %v760_v59, 2 }
  0xe1   : > { %v781_v44 = vrot.slane %v776_v33, %v6102_v37  ;;  %v794_v49 = vrot.slane %v789_v40, %v6102_v37  ;;  %v5211_v33 = vld [vmem:[#allocation3 + $0x54] ss:$8 sps:$4 sm:$0xff]  }
  0xe2   : > { %1428 = vmatprep.subr.bf16.mxu1 %v5211_v33 }
  0xe3   : > { %953 = vperm.xlu1 %5197, %v689_v24   ;;  %v782_v53 = vmul.f32 %v781_v44, %v692_v42  ;;  %v795_v60 = vmul.f32 %v794_v49, %v692_v42  ;;  %1429 = vmatpush1.bf16.msra.mxu1 %v5213_v45 }
  0xe4   : > { %1430 = vmatprep.subr.bf16.mxu1 %v5214_v46 }
  0xe5   : > { %v767_v35 = vpop.permute.xlu1 %766  ;;  %v902_v57 = vpop.permute.xlu0 %901  ;;  %v784_v63 = vrot.slane %v782_v53, 1  ;;  %v797_v7 = vrot.slane %v795_v60, 2 }
  0xe6   : > { %v772_v50 = vrot.slane %v767_v35, %v6102_v37 }
  0xe7   : > { %5198 = vset.pattern.permute.xlu1 %v5826_v1  ;;  %1431 = vmatpush1.bf16.msra.mxu1 %v5216_v55 }
  0xe8   : > { %877 = vperm.xlu1 %5198, %v691_v36   ;;  %v773_v61 = vmul.f32 %v772_v50, %v692_v42 }
  0xea   : > { %v803_v41 = vpop.permute.xlu1 %802  ;;  %v1002_v4 = vpop.permute.xlu0 %1001  ;;  %v786_v8 = vadd.f32 %v784_v63, %v773_v61 }
  0xec   : > { %5200 = vset.pattern.permute.xlu1 %v5829_v5  ;;  %v751_v5 = vadd.f32 %v749_v56, %v738_v58  ;;  %v799_v14 = vadd.f32 %v797_v7, %v786_v8  ;;  %v5217_v56 = vld [vmem:[#allocation3 + $0x34] ss:$8 sps:$4 sm:$0xff]  }
  0xed   : > { %961 = vperm.xlu1 %5200, %v691_v36   ;;  %1432 = vmatprep.subr.bf16.mxu1 %v5217_v56 }
  0xee   : > { %v808_v51 = vpop.permute.xlu1 %807  ;;  %v764_v13 = vadd.f32 %v762_v6, %v751_v5  ;;  %v1014_v15 = vpop.permute.xlu0 %1013  ;;  %v6127_v17 = vrot.slane %v799_v14, %v6102_v37  ;;  %1433 = vmatpush1.bf16.msra.mxu1 %v5219_v2 }
  0xf0   : > { %v6124_v16 = vrot.slane %v764_v13, %v6102_v37 }
  0xf1   : > { %5201 = vset.pattern.permute.xlu1 %v5833_v10  ;;  %v6121_v10 = vrot.slane %v729_v12, %v6102_v37 }
  0xf2   : > { %1049 = vperm.xlu1 %5201, %v688_v28   ;;  %v968_v24 = vmul.f32 %v6124_v16, %v902_v57 }
  0xf3   : > { %v906_v0 = vpop.permute.xlu1 %905  ;;  %v884_v19 = vmul.f32 %v6121_v10, %v803_v41  ;;  %v818_v20 = vpop.permute.xlu0 %817  ;;  %v1071_v41 = vmul.f32 %v6127_v17, %v1014_v15 }
  0xf4   : > { %v887_v29 = vmul.f32 %v6121_v10, %v818_v20  ;;  %v969_v30 = vmul.f32 %v6124_v16, %v906_v0 }
  0xf5   : > { %v984_v28 = vadd.f32 %v968_v24, %v884_v19 }
  0xf6   : > { %1057 = vperm.xlu1 %5201, %v6081_v25   ;;  %v1068_v25 = vmul.f32 %v6127_v17, %v1002_v4 }
  0xf7   : > { %v828_v61 = vpop.permute.xlu0 %827 }
  0xf8   : > { %v813_v11 = vpop.permute.xlu1 %812  ;;  %v1084_v35 = vadd.f32 %v1068_v25, %v984_v28  ;;  %v889_v13 = vmul.f32 %v6121_v10, %v828_v61 }
  0xf9   : > { %v886_v47 = vmul.f32 %v6121_v10, %v813_v11 }
  0xfa   : > { %1061 = vperm.xlu1 %5201, %v691_v36   ;;  %v885_v36 = vmul.f32 %v6121_v10, %v808_v51  ;;  %v1107_v50 = vadd.f32 %v6139_v39, %v1084_v35 }
  0xfb   : > { %v833_v7 = vpop.permute.xlu0 %832 }
  0xfc   : > { %v985_v42 = vadd.f32 %v969_v30, %v885_v36  ;;  %v1123_v59 = vmax.f32 %v1107_v50, 0.0 }
  0xfd   : > { %v910_v18 = vpop.permute.xlu1 %909 }
  0xfe   : > { %v970_v43 = vmul.f32 %v6124_v16, %v910_v18 }
 0x100   : > { %v986_v52 = vadd.f32 %v970_v43, %v886_v47  ;;  %v926_v9 = vpop.permute.xlu0 %925 }
 0x101   : > { %v914_v26 = vpop.permute.xlu1 %913  ;;  %v974_v24 = vmul.f32 %v6124_v16, %v926_v9 }
 0x102   : > { %v971_v27 = vmul.f32 %v6124_v16, %v914_v26 }
 0x104   : > { %v987_v38 = vadd.f32 %v971_v27, %v887_v29  ;;  %v890_v27 = vmul.f32 %v6121_v10, %v833_v7 }
 0x105   : > { %v1022_v14 = vpop.permute.xlu0 %1021 }
 0x106   : > { %v1006_v40 = vpop.permute.xlu1 %1005  ;;  %v1087_v48 = vadd.f32 %v1071_v41, %v987_v38  ;;  %v1073_v19 = vmul.f32 %v6127_v17, %v1022_v14  ;;  %v990_v33 = vadd.f32 %v974_v24, %v890_v27 }
 0x107   : > { %v1069_v44 = vmul.f32 %v6127_v17, %v1006_v40 }
 0x108   : > { %v1110_v57 = vadd.f32 %v6139_v39, %v1087_v48 }
 0x109   : > { %v1085_v49 = vadd.f32 %v1069_v44, %v985_v42 }
 0x10a   : > { %v1010_v51 = vpop.permute.xlu1 %1009  ;;  %v1126_v3 = vmax.f32 %v1110_v57, 0.0  ;;  %v938_v28 = vpop.permute.xlu0 %937 }
 0x10b   : > { %v1070_v53 = vmul.f32 %v6127_v17, %v1010_v51  ;;  %v1108_v54 = vadd.f32 %v6139_v39, %v1085_v49  ;;  %v977_v7 = vmul.f32 %v6124_v16, %v938_v28 }
 0x10d   : > { %v1086_v58 = vadd.f32 %v1070_v53, %v986_v52  ;;  %v1124_v60 = vmax.f32 %v1108_v54, 0.0 }
 0x10e   : > { %v942_v45 = vpop.permute.xlu0 %941 }
 0x10f   : > { %v1109_v62 = vadd.f32 %v6139_v39, %v1086_v58  ;;  %v823_v63 = vpop.permute.xlu1 %822  ;;  %v1139_v0 = vpack.c.bf16 %v1124_v60, %v1123_v59 }
 0x110   : > { %v888_v21 = vmul.f32 %v6121_v10, %v823_v63 }
 0x111   : > { %v1125_v4 = vmax.f32 %v1109_v62, 0.0  ;;  %5069 = vmatprep.mubr.msk.bf16.mxu0 %vm1170_vm0, %v1139_v0 }
 0x113   : > { %v1140_v5 = vpack.c.bf16 %v1126_v3, %v1125_v4  ;;  %v1034_v53 = vpop.permute.xlu0 %1033 }
 0x114   : > { %v918_v6 = vpop.permute.xlu1 %917  ;;  %v1076_v4 = vmul.f32 %v6127_v17, %v1034_v53 }
 0x115   : > { %5070 = vmatmul.mubr.msk.bf16.vlgmr.msra.gmra.mxu0 %vm1170_vm0, %v1140_v5  ;;  %v972_v20 = vmul.f32 %v6124_v16, %v918_v6 }
 0x117   : > { %v988_v25 = vadd.f32 %v972_v20, %v888_v21  ;;  %v1046_v58 = vpop.permute.xlu0 %1045 }
 0x118   : > { %v922_v8 = vpop.permute.xlu1 %921 }
 0x119   : > { %v973_v12 = vmul.f32 %v6124_v16, %v922_v8 }
 0x11b   : > { %v989_v15 = vadd.f32 %v973_v12, %v889_v13  ;;  %v1079_v12 = vmul.f32 %v6127_v17, %v1046_v58 }
 0x11c   : > { %v843_v60 = vpop.permute.xlu0 %842 }
 0x11d   : > { %v838_v11 = vpop.permute.xlu1 %837  ;;  %v1089_v22 = vadd.f32 %v1073_v19, %v989_v15  ;;  %v892_v63 = vmul.f32 %v6121_v10, %v843_v60 }
 0x11e   : > { %v891_v41 = vmul.f32 %v6121_v10, %v838_v11 }
 0x11f   : > { %v1112_v29 = vadd.f32 %v6139_v39, %v1089_v22 }
 0x121   : > { %v1128_v40 = vmax.f32 %v1112_v29, 0.0 }
 0x122   : > { %v930_v18 = vpop.permute.xlu1 %929 }
 0x123   : > { %v975_v35 = vmul.f32 %v6124_v16, %v930_v18  ;;  %v978_v18 = vmul.f32 %v6124_v16, %v942_v45 }
 0x125   : > { %v991_v46 = vadd.f32 %v975_v35, %v891_v41 }
 0x127   : > { %v1018_v23 = vpop.permute.xlu1 %1017 }
 0x128   : > { %v1072_v26 = vmul.f32 %v6127_v17, %v1018_v23 }
 0x12a   : > { %v1088_v30 = vadd.f32 %v1072_v26, %v988_v25 }
 0x12b   : > { %v1026_v32 = vpop.permute.xlu1 %1025 }
 0x12c   : > { %v1111_v36 = vadd.f32 %v6139_v39, %v1088_v30  ;;  %v1074_v38 = vmul.f32 %v6127_v17, %v1026_v32  ;;  %v5220_v30 = vld [vmem:[#allocation3 + $0x24] ss:$8 sps:$4 sm:$0xff]   ;;  %v868_v32 = vpop.permute.xlu0 %867 }
 0x12d   : > { %1434 = vmatprep.subr.bf16.mxu1 %v5220_v30  ;;  %v897_v53 = vmul.f32 %v6121_v10, %v868_v32  ;;  %v6209_v32 = vld [vmem:[%s6835_s5] ss:$0 sm:$0xff] }
 0x12e   : > { %v1127_v42 = vmax.f32 %v1111_v36, 0.0  ;;  %v1090_v43 = vadd.f32 %v1074_v38, %v990_v33  ;;  %v5222_v38 = vld [vmem:[#allocation3 + $0x20] ss:$8 sps:$4 sm:$0xff]  }
 0x12f   : > { %v1030_v44 = vpop.permute.xlu1 %1029  ;;  %1435 = vmatpush1.bf16.msra.mxu1 %v5222_v38 }
 0x130   : > { %v1141_v47 = vpack.c.bf16 %v1128_v40, %v1127_v42  ;;  %v1075_v48 = vmul.f32 %v6127_v17, %v1030_v44  ;;  %v1113_v49 = vadd.f32 %v6139_v39, %v1090_v43  ;;  %v5223_v42 = vld [vmem:[#allocation3 + $0x14] ss:$8 sps:$4 sm:$0xff]   ;;  %v5225_v44 = vld [vmem:[#allocation3 + $0x10] ss:$8 sps:$4 sm:$0xff]  }
 0x131   : > { %1436 = vmatprep.subr.bf16.mxu1 %v5223_v42 }
 0x132   : > { %v1091_v50 = vadd.f32 %v1075_v48, %v991_v46  ;;  %5073 = vmatprep.mubr.msk.bf16.mxu0 %vm1170_vm0, %v1141_v47  ;;  %v1129_v54 = vmax.f32 %v1113_v49, 0.0  ;;  %v873_v46 = vpop.permute.xlu0 %872  ;;  %v5226_v47 = vld [vmem:[#allocation3 + $0x4] ss:$8 sps:$4 sm:$0xff]   ;;  %v5228_v48 = vld [vmem:[#allocation3] ss:$8 sps:$4 sm:$0xff]  }
 0x133   : > { %1437 = vmatpush1.bf16.msra.mxu1 %v5225_v44  ;;  %v5232_v44 = vld [vmem:[#allocation5 + $0xe8] ss:$16 sps:$4 sm:$0xff]  }
 0x134   : > { %v1114_v51 = vadd.f32 %v6139_v39, %v1091_v50  ;;  %v848_v52 = vpop.permute.xlu1 %847  ;;  %1438 = vmatprep.subr.bf16.mxu1 %v5226_v47  ;;  %v5240_v47 = vld [vmem:[#allocation5 + $0xcc] ss:$16 sps:$4 sm:$0xff]  }
 0x135   : > { %v893_v5 = vmul.f32 %v6121_v10, %v848_v52 }
 0x136   : > { %v1130_v55 = vmax.f32 %v1114_v51, 0.0  ;;  %v958_v50 = vpop.permute.xlu0 %957 }
 0x137   : > { %v993_v13 = vadd.f32 %v977_v7, %v893_v5  ;;  %1439 = vmatpush1.bf16.msra.mxu1 %v5228_v48  ;;  %v5247_v48 = vld [vmem:[#allocation5 + $0x80] ss:$16 sps:$4 sm:$0xff]  }
 0x138   : > { %v1142_v56 = vpack.c.bf16 %v1130_v55, %v1129_v54 }
 0x139   : > { %v934_v57 = vpop.permute.xlu1 %933 }
 0x13a   : > { %5074 = vmatmul.mubr.msk.bf16.gmra.mxu0 %vm1170_vm0, %v1142_v56  ;;  %v976_v62 = vmul.f32 %v6124_v16, %v934_v57  ;;  %v1054_v54 = vpop.permute.xlu0 %1053 }
 0x13b   : > { %v1081_v57 = vmul.f32 %v6127_v17, %v1054_v54  ;;  %v5253_v54 = vld [vmem:[#allocation5 + $0x60] ss:$16 sps:$4 sm:$0xff]  }
 0x13c   : > { %v992_v0 = vadd.f32 %v976_v62, %v892_v63  ;;  %v982_v62 = vmul.f32 %v6124_v16, %v958_v50 }
 0x13e   : > { %v853_v59 = vpop.permute.xlu1 %852  ;;  %v1092_v8 = vadd.f32 %v1076_v4, %v992_v0 }
 0x13f   : > { %v894_v14 = vmul.f32 %v6121_v10, %v853_v59 }
 0x140   : > { %v1115_v19 = vadd.f32 %v6139_v39, %v1092_v8 }
 0x141   : > { %v994_v23 = vadd.f32 %v978_v18, %v894_v14 }
 0x142   : > { %v858_v61 = vpop.permute.xlu1 %857  ;;  %v1131_v26 = vmax.f32 %v1115_v19, 0.0 }
 0x143   : > { %v895_v6 = vmul.f32 %v6121_v10, %v858_v61 }
 0x147   : > { %v946_v2 = vpop.permute.xlu1 %945 }
 0x148   : > { %v979_v3 = vmul.f32 %v6124_v16, %v946_v2  ;;  %v898_v2 = vmul.f32 %v6121_v10, %v873_v46 }
 0x14a   : > { %v995_v9 = vadd.f32 %v979_v3, %v895_v6  ;;  %v998_v6 = vadd.f32 %v982_v62, %v898_v2  ;;  %v5250_v62 = vld [vmem:[#allocation5 + $0x88] ss:$16 sps:$4 sm:$0xff]   ;;  %v5273_v2 = vld [vmem:[#allocation5 + $0x4] ss:$16 sps:$4 sm:$0xff]  }
 0x14c   : > { %v1038_v11 = vpop.permute.xlu1 %1037  ;;  %v1095_v20 = vadd.f32 %v1079_v12, %v995_v9 }
 0x14d   : > { %v1077_v15 = vmul.f32 %v6127_v17, %v1038_v11 }
 0x14e   : > { %v1118_v27 = vadd.f32 %v6139_v39, %v1095_v20 }
 0x14f   : > { %v1093_v21 = vadd.f32 %v1077_v15, %v993_v13 }
 0x150   : > { %v1042_v22 = vpop.permute.xlu1 %1041  ;;  %v1134_v40 = vmax.f32 %v1118_v27, 0.0  ;;  %v5231_v27 = vld [vmem:[#allocation5 + $0xe4] ss:$16 sps:$4 sm:$0xff]  }
 0x151   : > { %v1116_v24 = vadd.f32 %v6139_v39, %v1093_v21  ;;  %v1078_v25 = vmul.f32 %v6127_v17, %v1042_v22  ;;  %1991 = vmatprep.subr.bf16.mxu0 %v5231_v27  ;;  %v5295_v27 = vld [vmem:[#allocation5 + $0x180] ss:$16 sps:$4 sm:$0xff]  }
 0x153   : > { %v1132_v28 = vmax.f32 %v1116_v24, 0.0  ;;  %v1094_v29 = vadd.f32 %v1078_v25, %v994_v23 }
 0x155   : > { %v1143_v33 = vpack.c.bf16 %v1132_v28, %v1131_v26  ;;  %v1117_v35 = vadd.f32 %v6139_v39, %v1094_v29  ;;  %v863_v36 = vpop.permute.xlu1 %862  ;;  %v5229_v26 = vld [vmem:[#allocation5 + $0xe0] ss:$16 sps:$4 sm:$0xff]   ;;  %v5234_v28 = vld [vmem:[#allocation5 + $0xec] ss:$16 sps:$4 sm:$0xff]   ;;  %v5237_v29 = vld [vmem:[#allocation5 + $0xc4] ss:$16 sps:$4 sm:$0xff]  }
 0x156   : > { %v896_v59 = vmul.f32 %v6121_v10, %v863_v36  ;;  %2104 = vmatprep.subr.bf16.mxu1 %v5234_v28  ;;  %1992 = vmatpush1.bf16.msra.mxu0 %v5229_v26  ;;  %v5288_v26 = vld [vmem:[#allocation5 + $0x1cc] ss:$16 sps:$4 sm:$0xff]  }
 0x157   : > { %v1133_v41 = vmax.f32 %v1117_v35, 0.0  ;;  %5077 = vmatprep.mubr.msk.bf16.mxu0 %vm1170_vm0, %v1143_v33  ;;  %1993 = vmatprep.subr.bf16.mxu0 %v5237_v29  ;;  %v5243_v33 = vld [vmem:[#allocation5 + $0xa4] ss:$16 sps:$4 sm:$0xff]  }
 0x158   : > { %v5303_v29 = vld [vmem:[#allocation5 + $0x164] ss:$16 sps:$4 sm:$0xff]  }
 0x159   : > { %v1144_v43 = vpack.c.bf16 %v1134_v40, %v1133_v41  ;;  %v5241_v40 = vld [vmem:[#allocation5 + $0xa0] ss:$16 sps:$4 sm:$0xff]   ;;  %v5249_v41 = vld [vmem:[#allocation5 + $0x84] ss:$16 sps:$4 sm:$0xff]  }
 0x15a   : > { %v950_v45 = vpop.permute.xlu1 %949 }
 0x15b   : > { %5078 = vmatmul.mubr.msk.bf16.gmra.mxu0 %vm1170_vm0, %v1144_v43  ;;  %v980_v58 = vmul.f32 %v6124_v16, %v950_v45 }
 0x15d   : > { %v996_v63 = vadd.f32 %v980_v58, %v896_v59  ;;  %v5252_v59 = vld [vmem:[#allocation5 + $0x8c] ss:$16 sps:$4 sm:$0xff]  }
 0x15e   : > { %v954_v49 = vpop.permute.xlu1 %953 }
 0x15f   : > { %v981_v52 = vmul.f32 %v6124_v16, %v954_v49  ;;  %v5255_v49 = vld [vmem:[#allocation5 + $0x64] ss:$16 sps:$4 sm:$0xff]  }
 0x161   : > { %v997_v55 = vadd.f32 %v981_v52, %v897_v53  ;;  %v5246_v53 = vld [vmem:[#allocation5 + $0xac] ss:$16 sps:$4 sm:$0xff]  }
 0x163   : > { %v878_v51 = vpop.permute.xlu1 %877  ;;  %v1097_v60 = vadd.f32 %v1081_v57, %v997_v55  ;;  %v5261_v55 = vld [vmem:[#allocation5 + $0x44] ss:$16 sps:$4 sm:$0xff]   ;;  %v5244_v57 = vld [vmem:[#allocation5 + $0xa8] ss:$16 sps:$4 sm:$0xff]  }
 0x164   : > { %v899_v12 = vmul.f32 %v6121_v10, %v878_v51  ;;  %v5238_v51 = vld [vmem:[#allocation5 + $0xc8] ss:$16 sps:$4 sm:$0xff]  }
 0x165   : > { %v1120_v3 = vadd.f32 %v6139_v39, %v1097_v60  ;;  %v5259_v60 = vld [vmem:[#allocation5 + $0x40] ss:$16 sps:$4 sm:$0xff]  }
 0x167   : > { %v1136_v11 = vmax.f32 %v1120_v3, 0.0  ;;  %v5256_v3 = vld [vmem:[#allocation5 + $0x68] ss:$16 sps:$4 sm:$0xff]  }
 0x168   : > { %v962_v56 = vpop.permute.xlu1 %961 }
 0x169   : > { %v983_v7 = vmul.f32 %v6124_v16, %v962_v56 }
 0x16b   : > { %v999_v18 = vadd.f32 %v983_v7, %v899_v12  ;;  %v5262_v7 = vld [vmem:[#allocation5 + $0x48] ss:$16 sps:$4 sm:$0xff]  }
 0x16c   : > { %v5268_v12 = vld [vmem:[#allocation5 + $0x28] ss:$16 sps:$4 sm:$0xff]  }
 0x16d   : > { %v1050_v61 = vpop.permute.xlu1 %1049 }
 0x16e   : > { %v1080_v0 = vmul.f32 %v6127_v17, %v1050_v61  ;;  %v5267_v61 = vld [vmem:[#allocation5 + $0x24] ss:$16 sps:$4 sm:$0xff]  }
 0x170   : > { %v1096_v4 = vadd.f32 %v1080_v0, %v996_v63  ;;  %v5258_v63 = vld [vmem:[#allocation5 + $0x6c] ss:$16 sps:$4 sm:$0xff]   ;;  %v5265_v0 = vld [vmem:[#allocation5 + $0x20] ss:$16 sps:$4 sm:$0xff]  }
 0x171   : > { %v1058_v5 = vpop.permute.xlu1 %1057 }
 0x172   : > { %v1119_v8 = vadd.f32 %v6139_v39, %v1096_v4  ;;  %v1082_v9 = vmul.f32 %v6127_v17, %v1058_v5  ;;  %v5264_v4 = vld [vmem:[#allocation5 + $0x4c] ss:$16 sps:$4 sm:$0xff]   ;;  %v5271_v5 = vld [vmem:[#allocation5] ss:$16 sps:$4 sm:$0xff]  }
 0x174   : > { %v1135_v13 = vmax.f32 %v1119_v8, 0.0  ;;  %v1098_v14 = vadd.f32 %v1082_v9, %v998_v6  ;;  %v5279_v6 = vld [vmem:[#allocation5 + $0x1e4] ss:$16 sps:$4 sm:$0xff]   ;;  %v5270_v8 = vld [vmem:[#allocation5 + $0x2c] ss:$16 sps:$4 sm:$0xff]  }
 0x175   : > { %v1062_v15 = vpop.permute.xlu1 %1061  ;;  %v5277_v9 = vld [vmem:[#allocation5 + $0x1e0] ss:$16 sps:$4 sm:$0xff]  }
 0x176   : > { %v1145_v19 = vpack.c.bf16 %v1136_v11, %v1135_v13  ;;  %v1083_v20 = vmul.f32 %v6127_v17, %v1062_v15  ;;  %v1121_v21 = vadd.f32 %v6139_v39, %v1098_v14  ;;  %v5235_v17 = vld [vmem:[#allocation5 + $0xc0] ss:$16 sps:$4 sm:$0xff]   ;;  %v5285_v11 = vld [vmem:[#allocation5 + $0x1c4] ss:$16 sps:$4 sm:$0xff]   ;;  %v5276_v13 = vld [vmem:[#allocation5 + $0xc] ss:$16 sps:$4 sm:$0xff]  }
 0x177   : > { %1994 = vmatpush1.bf16.msra.mxu0 %v5235_v17  ;;  %v5283_v14 = vld [vmem:[#allocation5 + $0x1c0] ss:$16 sps:$4 sm:$0xff]   ;;  %v5291_v15 = vld [vmem:[#allocation5 + $0x1a4] ss:$16 sps:$4 sm:$0xff]  }
 0x178   : > { %v1099_v22 = vadd.f32 %v1083_v20, %v999_v18  ;;  %5081 = vmatprep.mubr.msk.bf16.mxu0 %vm1170_vm0, %v1145_v19  ;;  %v1137_v23 = vmax.f32 %v1121_v21, 0.0  ;;  %1995 = vmatprep.subr.bf16.mxu0 %v5243_v33  ;;  %v5274_v19 = vld [vmem:[#allocation5 + $0x8] ss:$16 sps:$4 sm:$0xff]   ;;  %v5282_v21 = vld [vmem:[#allocation5 + $0x1ec] ss:$16 sps:$4 sm:$0xff]  }
 0x17a   : > { %v1122_v16 = vadd.f32 %v6139_v39, %v1099_v22  ;;  %v5289_v22 = vld [vmem:[#allocation5 + $0x1a0] ss:$16 sps:$4 sm:$0xff]  }
 0x17b   : > { %1996 = vmatpush1.bf16.msra.mxu0 %v5241_v40 }
 0x17c   : > { %v1138_v24 = vmax.f32 %v1122_v16, 0.0  ;;  %1997 = vmatprep.subr.bf16.mxu0 %v5249_v41  ;;  %v5297_v16 = vld [vmem:[#allocation5 + $0x184] ss:$16 sps:$4 sm:$0xff]   ;;  %v5292_v41 = vld [vmem:[#allocation5 + $0x1a8] ss:$16 sps:$4 sm:$0xff]  }
 0x17e   : > { %v1146_v25 = vpack.c.bf16 %v1138_v24, %v1137_v23 }
 0x17f   : > { %1998 = vmatpush1.bf16.msra.mxu0 %v5247_v48  ;;  %v5304_v48 = vld [vmem:[#allocation5 + $0x168] ss:$16 sps:$4 sm:$0xff]  }
 0x180   : > { %5082 = vmatmul.mubr.msk.bf16.gmra.mxu0 %vm1170_vm0, %v1146_v25  ;;  %1999 = vmatprep.subr.bf16.mxu0 %v5255_v49  ;;  %v5280_v25 = vld [vmem:[#allocation5 + $0x1e8] ss:$16 sps:$4 sm:$0xff]  }
 0x183   : > { %2000 = vmatpush1.bf16.msra.mxu0 %v5253_v54 }
 0x184   : > { %2001 = vmatprep.subr.bf16.mxu0 %v5261_v55  ;;  %v5309_v55 = vld [vmem:[#allocation5 + $0x144] ss:$16 sps:$4 sm:$0xff]  }
 0x187   : > { %2002 = vmatpush1.bf16.msra.mxu0 %v5259_v60 }
 0x188   : > { %2003 = vmatprep.subr.bf16.mxu0 %v5267_v61 }
 0x18b   : > { %2004 = vmatpush1.bf16.msra.mxu0 %v5265_v0  ;;  %v5318_v0 = vld [vmem:[#allocation5 + $0x12c] ss:$16 sps:$4 sm:$0xff]  }
 0x18c   : > { %2005 = vmatprep.subr.bf16.mxu0 %v5273_v2  ;;  %v5313_v2 = vld [vmem:[#allocation5 + $0x120] ss:$16 sps:$4 sm:$0xff]  }
 0x18f   : > { %2006 = vmatpush1.bf16.msra.mxu0 %v5271_v5 }
 0x190   : > { %2007 = vmatprep.subr.bf16.mxu0 %v5279_v6  ;;  %v5321_v6 = vld [vmem:[#allocation5 + $0x104] ss:$16 sps:$4 sm:$0xff]  }
 0x193   : > { %2008 = vmatpush2.bf16.msra.mxu0 %v5277_v9  ;;  %v5322_v9 = vld [vmem:[#allocation5 + $0x108] ss:$16 sps:$4 sm:$0xff]  }
 0x194   : > { %2009 = vmatprep.subr.bf16.mxu0 %v5285_v11 }
 0x197   : > { %2010 = vmatpush2.bf16.msra.mxu0 %v5283_v14 }
 0x198   : > { %2011 = vmatprep.subr.bf16.mxu0 %v5291_v15 }
 0x19b   : > { %2012 = vmatpush2.bf16.msra.mxu0 %v5289_v22 }
 0x19c   : > { %2013 = vmatprep.subr.bf16.mxu0 %v5297_v16 }
 0x19f   : > { %2014 = vmatpush2.bf16.msra.mxu0 %v5295_v27  ;;  %v6235_v27 = vsub.s32 1, %v6098_v34 }
 0x1a0   : > { %2015 = vmatprep.subr.bf16.mxu0 %v5303_v29 }
 0x1d5   : > { %v5071_v10 = vpop.f32.mrf.mxu0 }
 0x1d6   : > { %v1238_v50 = vadd.f32 %v5071_v10, %v6209_v32 }
 0x1d7   : > { %v1229_v30 = vpop.f32.mrf.mxu0 }
 0x1d8   : > { %v1230_v35 = vadd.f32 %v6209_v32, %v1229_v30  ;;  %v1294_v56 = vmax.f32 %v1238_v50, 0.0 }
 0x1d9   : > { %v5072_v39 = vpop.f32.mrf.mxu0 }
 0x1da   : > { %v1292_v42 = vmax.f32 %v1230_v35, 0.0  ;;  %v1241_v45 = vadd.f32 %v5072_v39, %v6209_v32  ;;  %v5286_v39 = vld [vmem:[#allocation5 + $0x1c8] ss:$16 sps:$4 sm:$0xff]  }
 0x1db   : > { %v1232_v36 = vpop.f32.mrf.mxu0 }
 0x1dc   : > { %v1233_v38 = vadd.f32 %v6209_v32, %v1232_v36  ;;  %v1295_v52 = vmax.f32 %v1241_v45, 0.0  ;;  %v5294_v36 = vld [vmem:[#allocation5 + $0x1ac] ss:$16 sps:$4 sm:$0xff]   ;;  %v5298_v45 = vld [vmem:[#allocation5 + $0x188] ss:$16 sps:$4 sm:$0xff]  }
 0x1de   : > { %v1293_v43 = vmax.f32 %v1233_v38, 0.0  ;;  %v1309_v58 = vpack.c.bf16 %v1295_v52, %v1294_v56  ;;  %v5301_v38 = vld [vmem:[#allocation5 + $0x160] ss:$16 sps:$4 sm:$0xff]   ;;  %v5312_v56 = vld [vmem:[#allocation5 + $0x14c] ss:$16 sps:$4 sm:$0xff]  }
 0x1df   : > { %2016 = vmatpush2.bf16.msra.mxu0 %v5301_v38 }
 0x1e0   : > { %v1308_v46 = vpack.c.bf16 %v1293_v43, %v1292_v42  ;;  %v5300_v43 = vld [vmem:[#allocation5 + $0x18c] ss:$16 sps:$4 sm:$0xff]   ;;  %2017 = vmatprep.subr.bf16.mxu0 %v5309_v55 }
 0x1e2   : > { %1457 = vmatmul.mubr.bf16.vlgmr.msra.gmra.mxu1 %v1308_v46 }
 0x1e3   : > { %1466 = vmatprep.mubr.bf16.mxu1 %v5826_v1  ;;  %2105 = vmatpush1.bf16.msra.mxu1 %v5232_v44 }
 0x1e4   : > { %2106 = vmatprep.subr.bf16.mxu1 %v5240_v47  ;;  %v5306_v47 = vld [vmem:[#allocation5 + $0x16c] ss:$16 sps:$4 sm:$0xff]  }
 0x1e7   : > { %2107 = vmatpush1.bf16.msra.mxu1 %v5238_v51 }
 0x1e8   : > { %2108 = vmatprep.subr.bf16.mxu1 %v5246_v53 }
 0x1ea   : > { %1467 = vmatmul.mubr.bf16.gmra.mxu1 %v1309_v58  ;;  %v5310_v58 = vld [vmem:[#allocation5 + $0x148] ss:$16 sps:$4 sm:$0xff]  }
 0x1eb   : > { %1476 = vmatprep.mubr.bf16.mxu1 %v5826_v1  ;;  %2109 = vmatpush1.bf16.msra.mxu1 %v5244_v57  ;;  %v5307_v57 = vld [vmem:[#allocation5 + $0x140] ss:$16 sps:$4 sm:$0xff]  }
 0x1ec   : > { %2110 = vmatprep.subr.bf16.mxu1 %v5252_v59  ;;  %2018 = vmatpush2.bf16.msra.mxu0 %v5307_v57 }
 0x1ef   : > { %2111 = vmatpush1.bf16.msra.mxu1 %v5250_v62 }
 0x1f0   : > { %2112 = vmatprep.subr.bf16.mxu1 %v5258_v63  ;;  %v5315_v63 = vld [vmem:[#allocation5 + $0x124] ss:$16 sps:$4 sm:$0xff]  }
 0x1f1   : > { %2019 = vmatprep.subr.bf16.mxu0 %v5315_v63 }
 0x1f2   : > { %2020 = vmatpush2.bf16.msra.mxu0 %v5313_v2 }
 0x1f3   : > { %2113 = vmatpush1.bf16.msra.mxu1 %v5256_v3  ;;  %v5316_v3 = vld [vmem:[#allocation5 + $0x128] ss:$16 sps:$4 sm:$0xff]   ;;  %2021 = vmatprep.subr.bf16.mxu0 %v5321_v6 }
 0x1f4   : > { %2114 = vmatprep.subr.bf16.mxu1 %v5264_v4 }
 0x1f7   : > { %2115 = vmatpush1.bf16.msra.mxu1 %v5262_v7  ;;  %v5324_v7 = vld [vmem:[#allocation5 + $0x10c] ss:$16 sps:$4 sm:$0xff]  }
 0x1f8   : > { %2116 = vmatprep.subr.bf16.mxu1 %v5270_v8  ;;  %v5319_v8 = vld [vmem:[#allocation5 + $0x100] ss:$16 sps:$4 sm:$0xff]  }
 0x1f9   : > { %2022 = vmatpush2.bf16.msra.mxu0 %v5319_v8 }
 0x1fa   : > { %v5075_v18 = vpop.f32.mrf.mxu0 }
 0x1fb   : > { %2117 = vmatpush1.bf16.msra.mxu1 %v5268_v12  ;;  %v1254_v40 = vadd.f32 %v5075_v18, %v6209_v32 }
 0x1fc   : > { %v1245_v20 = vpop.f32.mrf.mxu0  ;;  %2118 = vmatprep.subr.bf16.mxu1 %v5276_v13 }
 0x1fd   : > { %v1246_v24 = vadd.f32 %v6209_v32, %v1245_v20  ;;  %v1298_v44 = vmax.f32 %v1254_v40, 0.0 }
 0x1fe   : > { %v5076_v23 = vpop.f32.mrf.mxu0 }
 0x1ff   : > { %2119 = vmatpush1.bf16.msra.mxu1 %v5274_v19  ;;  %v1296_v30 = vmax.f32 %v1246_v24, 0.0  ;;  %v1257_v33 = vadd.f32 %v5076_v23, %v6209_v32 }
 0x200   : > { %v1248_v10 = vpop.f32.mrf.mxu0  ;;  %2120 = vmatprep.subr.bf16.mxu1 %v5282_v21 }
 0x201   : > { %v1249_v28 = vadd.f32 %v6209_v32, %v1248_v10  ;;  %v1299_v42 = vmax.f32 %v1257_v33, 0.0 }
 0x203   : > { %v1297_v17 = vmax.f32 %v1249_v28, 0.0  ;;  %2121 = vmatpush2.bf16.msra.mxu1 %v5280_v25  ;;  %v1311_v46 = vpack.c.bf16 %v1299_v42, %v1298_v44  ;;  %v1332_v28 = vld [vmem:[%s6837_s7] sm:$0x3] }
 0x204   : > { %2122 = vmatprep.subr.bf16.mxu1 %v5288_v26 }
 0x205   : > { %v1310_v35 = vpack.c.bf16 %v1297_v17, %v1296_v30  ;;  %v6241_v30 = vrot.slane %v1332_v28, %v6235_v27 }
 0x207   : > { %1477 = vmatmul.mubr.bf16.gmra.mxu1 %v1310_v35 }
 0x208   : > { %1486 = vmatprep.mubr.bf16.mxu1 %v5826_v1  ;;  %2123 = vmatpush2.bf16.msra.mxu1 %v5286_v39 }
 0x209   : > { %2124 = vmatprep.subr.bf16.mxu1 %v5294_v36 }
 0x20c   : > { %2125 = vmatpush2.bf16.msra.mxu1 %v5292_v41 }
 0x20d   : > { %2126 = vmatprep.subr.bf16.mxu1 %v5300_v43 }
 0x20f   : > { %1487 = vmatmul.mubr.bf16.gmra.mxu1 %v1311_v46 }
 0x210   : > { %1496 = vmatprep.mubr.bf16.mxu1 %v5826_v1  ;;  %2127 = vmatpush2.bf16.msra.mxu1 %v5298_v45 }
 0x211   : > { %2128 = vmatprep.subr.bf16.mxu1 %v5306_v47 }
 0x214   : > { %2129 = vmatpush2.bf16.msra.mxu1 %v5304_v48 }
 0x215   : > { %2130 = vmatprep.subr.bf16.mxu1 %v5312_v56 }
 0x218   : > { %2131 = vmatpush2.bf16.msra.mxu1 %v5310_v58 }
 0x219   : > { %2132 = vmatprep.subr.bf16.mxu1 %v5318_v0 }
 0x21b   : > { %v5079_v49 = vpop.f32.mrf.mxu0 }
 0x21c   : > { %v1270_v4 = vadd.f32 %v5079_v49, %v6209_v32  ;;  %2133 = vmatpush2.bf16.msra.mxu1 %v5316_v3 }
 0x21d   : > { %v1261_v50 = vpop.f32.mrf.mxu0  ;;  %2134 = vmatprep.subr.bf16.mxu1 %v5324_v7 }
 0x21e   : > { %v1262_v52 = vadd.f32 %v6209_v32, %v1261_v50  ;;  %v1302_v11 = vmax.f32 %v1270_v4, 0.0 }
 0x21f   : > { %v5080_v51 = vpop.f32.mrf.mxu0 }
 0x220   : > { %v1300_v59 = vmax.f32 %v1262_v52, 0.0  ;;  %v1273_v61 = vadd.f32 %v5080_v51, %v6209_v32  ;;  %2135 = vmatpush2.bf16.msra.mxu1 %v5322_v9 }
 0x221   : > { %v1264_v53 = vpop.f32.mrf.mxu0 }
 0x222   : > { %v1265_v54 = vadd.f32 %v6209_v32, %v1264_v53  ;;  %v1303_v5 = vmax.f32 %v1273_v61, 0.0 }
 0x224   : > { %v1301_v60 = vmax.f32 %v1265_v54, 0.0  ;;  %v1313_v12 = vpack.c.bf16 %v1303_v5, %v1302_v11 }
 0x226   : > { %v1312_v62 = vpack.c.bf16 %v1301_v60, %v1300_v59 }
 0x228   : > { %1497 = vmatmul.mubr.bf16.gmra.mxu1 %v1312_v62 }
 0x229   : > { %1506 = vmatprep.mubr.bf16.mxu1 %v5826_v1 }
 0x230   : > { %1507 = vmatmul.mubr.bf16.gmra.mxu1 %v1313_v12 }
 0x231   : > { %1516 = vmatprep.mubr.bf16.mxu1 %v5826_v1 }
 0x240   : > { %v5083_v13 = vpop.f32.mrf.mxu0 }
 0x241   : > { %v1286_v24 = vadd.f32 %v5083_v13, %v6209_v32 }
 0x242   : > { %v1277_v14 = vpop.f32.mrf.mxu0 }
 0x243   : > { %v1278_v18 = vadd.f32 %v6209_v32, %v1277_v14  ;;  %v1306_v10 = vmax.f32 %v1286_v24, 0.0 }
 0x244   : > { %v5084_v15 = vpop.f32.mrf.mxu0 }
 0x245   : > { %v1304_v21 = vmax.f32 %v1278_v18, 0.0  ;;  %v1289_v16 = vadd.f32 %v5084_v15, %v6209_v32 }
 0x246   : > { %v1280_v19 = vpop.f32.mrf.mxu0 }
 0x247   : > { %v1281_v20 = vadd.f32 %v6209_v32, %v1280_v19  ;;  %v1307_v25 = vmax.f32 %v1289_v16, 0.0  ;;  %v6244_v32 = vrot.slane %v1332_v28, %v6102_v37 }
 0x249   : > { %v1305_v22 = vmax.f32 %v1281_v20, 0.0  ;;  %v1315_v26 = vpack.c.bf16 %v1307_v25, %v1306_v10 }
 0x24b   : > { %v1314_v23 = vpack.c.bf16 %v1305_v22, %v1304_v21 }
 0x24d   : > { %1517 = vmatmul.mubr.bf16.gmra.mxu1 %v1314_v23 }
 0x24e   : > { %1526 = vmatprep.mubr.bf16.mxu1 %v5826_v1 }
 0x255   : > { %1527 = vmatmul.mubr.bf16.gmra.mxu1 %v1315_v26 }
 0x2a2   : > { %v1458_v29 = vpop.f32.mrf.mxu1 }
 0x2a3   : > { %v1459_v36 = vadd.f32 %v1458_v29, %v6244_v32 }
 0x2a4   : > { %v1460_v17 = vpop.f32.mrf.mxu1 }
 0x2a5   : > { %v1461_v33 = vadd.f32 %v1460_v17, %v6241_v30  ;;  %v1537_v45 = vmax.f32 %v1459_v36, 0.0 }
 0x2a6   : > { %v1462_v39 = vpop.f32.mrf.mxu1 }
 0x2a7   : > { %v1463_v35 = vadd.f32 %v1462_v39, %v6244_v32  ;;  %v1538_v43 = vmax.f32 %v1461_v33, 0.0 }
 0x2a8   : > { %v1464_v38 = vpop.f32.mrf.mxu1 }
 0x2a9   : > { %v1465_v40 = vadd.f32 %v1464_v38, %v6241_v30  ;;  %v1539_v41 = vmax.f32 %v1463_v35, 0.0 }
 0x2aa   : > { %v1468_v42 = vpop.f32.mrf.mxu1 }
 0x2ab   : > { %v1540_v44 = vmax.f32 %v1465_v40, 0.0  ;;  %v1569_v48 = vpack.c.bf16 %v1539_v41, %v1537_v45  ;;  %v1469_v52 = vadd.f32 %v1468_v42, %v6244_v32 }
 0x2ac   : > { %v1470_v46 = vpop.f32.mrf.mxu1 }
 0x2ad   : > { %v1570_v47 = vpack.c.bf16 %v1540_v44, %v1538_v43  ;;  %v1471_v50 = vadd.f32 %v1470_v46, %v6241_v30  ;;  %v1541_v58 = vmax.f32 %v1469_v52, 0.0 }
 0x2ae   : > { %v1472_v49 = vpop.f32.mrf.mxu1 }
 0x2af   : > { %v1473_v51 = vadd.f32 %v1472_v49, %v6244_v32  ;;  %2023 = vmatprep.mubr.bf16.mxu0 %v1570_v47  ;;  %2136 = vmatprep.mubr.bf16.mxu1 %v1570_v47  ;;  %v1542_v56 = vmax.f32 %v1471_v50, 0.0 }
 0x2b0   : > { %v1474_v53 = vpop.f32.mrf.mxu1  ;;  %2024 = vmatmul.mubr.bf16.vlgmr.msra.gmra.mxu0 %v1569_v48  ;;  %2137 = vmatmul.mubr.bf16.vlgmr.msra.gmra.mxu1 %v1569_v48 }
 0x2b1   : > { %v1475_v54 = vadd.f32 %v1474_v53, %v6241_v30  ;;  %v1543_v55 = vmax.f32 %v1473_v51, 0.0 }
 0x2b3   : > { %v1544_v57 = vmax.f32 %v1475_v54, 0.0  ;;  %v1571_v60 = vpack.c.bf16 %v1543_v55, %v1541_v58 }
 0x2b5   : > { %v1572_v59 = vpack.c.bf16 %v1544_v57, %v1542_v56 }
 0x2b7   : > { %2033 = vmatprep.mubr.bf16.mxu0 %v1572_v59  ;;  %2146 = vmatprep.mubr.bf16.mxu1 %v1572_v59 }
 0x2b8   : > { %2034 = vmatmul.mubr.bf16.gmra.mxu0 %v1571_v60  ;;  %2147 = vmatmul.mubr.bf16.gmra.mxu1 %v1571_v60  ;;  %v5325_v60 = vld [vmem:[%s6840_s10 + $0xe0] ss:$16 sps:$4 sm:$0xff]  }
 0x2c7   : > { %v1478_v61 = vpop.f32.mrf.mxu1 }
 0x2c8   : > { %v1479_v3 = vadd.f32 %v1478_v61, %v6244_v32  ;;  %v5327_v61 = vld [vmem:[%s6840_s10 + $0xe4] ss:$16 sps:$4 sm:$0xff]  }
 0x2c9   : > { %v1480_v62 = vpop.f32.mrf.mxu1  ;;  %3409 = vmatprep.subr.bf16.mxu0 %v5327_v61  ;;  %v5375_v61 = vld [vmem:[%s6840_s10 + $0x1e4] ss:$16 sps:$4 sm:$0xff]  }
 0x2ca   : > { %v1481_v0 = vadd.f32 %v1480_v62, %v6241_v30  ;;  %v1545_v11 = vmax.f32 %v1479_v3, 0.0  ;;  %v5328_v62 = vld [vmem:[%s6840_s10 + $0x2e0] ss:$16 sps:$4 sm:$0xff]   ;;  %3410 = vmatpush1.bf16.msra.mxu0 %v5325_v60 }
 0x2cb   : > { %v1482_v63 = vpop.f32.mrf.mxu1  ;;  %v5331_v3 = vld [vmem:[%s6840_s10 + $0xc0] ss:$16 sps:$4 sm:$0xff]  }
 0x2cc   : > { %v1483_v2 = vadd.f32 %v1482_v63, %v6244_v32  ;;  %v1546_v8 = vmax.f32 %v1481_v0, 0.0  ;;  %v5330_v63 = vld [vmem:[%s6840_s10 + $0x2e4] ss:$16 sps:$4 sm:$0xff]   ;;  %v5370_v60 = vld [vmem:[%s6840_s10 + $0x200] ss:$16 sps:$4 sm:$0xff]  }
 0x2cd   : > { %v1484_v4 = vpop.f32.mrf.mxu1  ;;  %v5333_v0 = vld [vmem:[%s6840_s10 + $0xc4] ss:$16 sps:$4 sm:$0xff]   ;;  %3450 = vmatprep.subr.bf16.mxu1 %v5330_v63  ;;  %v5373_v63 = vld [vmem:[%s6840_s10 + $0x1e0] ss:$16 sps:$4 sm:$0xff]  }
 0x2ce   : > { %v1485_v5 = vadd.f32 %v1484_v4, %v6241_v30  ;;  %v1547_v6 = vmax.f32 %v1483_v2, 0.0  ;;  %v5336_v2 = vld [vmem:[%s6840_s10 + $0x2c4] ss:$16 sps:$4 sm:$0xff]   ;;  %3451 = vmatpush1.bf16.msra.mxu1 %v5328_v62  ;;  %3411 = vmatprep.subr.bf16.mxu0 %v5333_v0  ;;  %v5334_v4 = vld [vmem:[%s6840_s10 + $0x2c0] ss:$16 sps:$4 sm:$0xff]  }
 0x2cf   : > { %v1488_v7 = vpop.f32.mrf.mxu1  ;;  %3452 = vmatprep.subr.bf16.mxu1 %v5336_v2  ;;  %3412 = vmatpush1.bf16.msra.mxu0 %v5331_v3  ;;  %v5378_v62 = vld [vmem:[%s6840_s10 + $0x3e4] ss:$16 sps:$4 sm:$0xff]   ;;  %v5376_v0 = vld [vmem:[%s6840_s10 + $0x3e0] ss:$16 sps:$4 sm:$0xff]  }
 0x2d0   : > { %v1548_v9 = vmax.f32 %v1485_v5, 0.0  ;;  %v1573_v14 = vpack.c.bf16 %v1547_v6, %v1545_v11  ;;  %v1489_v20 = vadd.f32 %v1488_v7, %v6244_v32  ;;  %v5339_v5 = vld [vmem:[%s6840_s10 + $0xa4] ss:$16 sps:$4 sm:$0xff]   ;;  %v5337_v7 = vld [vmem:[%s6840_s10 + $0xa0] ss:$16 sps:$4 sm:$0xff]  }
 0x2d1   : > { %v1490_v12 = vpop.f32.mrf.mxu1  ;;  %v5342_v6 = vld [vmem:[%s6840_s10 + $0x2a4] ss:$16 sps:$4 sm:$0xff]   ;;  %3413 = vmatprep.subr.bf16.mxu0 %v5339_v5  ;;  %v5382_v5 = vld [vmem:[%s6840_s10 + $0x3c0] ss:$16 sps:$4 sm:$0xff]  }
 0x2d2   : > { %v1574_v13 = vpack.c.bf16 %v1548_v9, %v1546_v8  ;;  %v1491_v18 = vadd.f32 %v1490_v12, %v6241_v30  ;;  %v1549_v25 = vmax.f32 %v1489_v20, 0.0  ;;  %3453 = vmatpush1.bf16.msra.mxu1 %v5334_v4  ;;  %v5340_v8 = vld [vmem:[%s6840_s10 + $0x2a0] ss:$16 sps:$4 sm:$0xff]   ;;  %v5381_v2 = vld [vmem:[%s6840_s10 + $0x1c4] ss:$16 sps:$4 sm:$0xff]  }
 0x2d3   : > { %v1492_v15 = vpop.f32.mrf.mxu1  ;;  %3454 = vmatprep.subr.bf16.mxu1 %v5342_v6  ;;  %3414 = vmatpush1.bf16.msra.mxu0 %v5337_v7  ;;  %v5384_v3 = vld [vmem:[%s6840_s10 + $0x3c4] ss:$16 sps:$4 sm:$0xff]   ;;  %v5379_v4 = vld [vmem:[%s6840_s10 + $0x1c0] ss:$16 sps:$4 sm:$0xff]  }
 0x2d4   : > { %v1493_v19 = vadd.f32 %v1492_v15, %v6244_v32  ;;  %2043 = vmatprep.mubr.bf16.mxu0 %v1574_v13  ;;  %2156 = vmatprep.mubr.bf16.mxu1 %v1574_v13  ;;  %v1550_v23 = vmax.f32 %v1491_v18, 0.0  ;;  %v5387_v6 = vld [vmem:[%s6840_s10 + $0x1a4] ss:$16 sps:$4 sm:$0xff]  }
 0x2d5   : > { %v1494_v21 = vpop.f32.mrf.mxu1  ;;  %2044 = vmatmul.mubr.bf16.gmra.mxu0 %v1573_v14  ;;  %2157 = vmatmul.mubr.bf16.gmra.mxu1 %v1573_v14  ;;  %v5390_v7 = vld [vmem:[%s6840_s10 + $0x3a4] ss:$16 sps:$4 sm:$0xff]  }
 0x2d6   : > { %v1495_v22 = vadd.f32 %v1494_v21, %v6241_v30  ;;  %v1551_v16 = vmax.f32 %v1493_v19, 0.0  ;;  %3455 = vmatpush1.bf16.msra.mxu1 %v5340_v8  ;;  %v5385_v8 = vld [vmem:[%s6840_s10 + $0x1a0] ss:$16 sps:$4 sm:$0xff]  }
 0x2d8   : > { %v1552_v24 = vmax.f32 %v1495_v22, 0.0  ;;  %v1575_v26 = vpack.c.bf16 %v1551_v16, %v1549_v25  ;;  %v5345_v22 = vld [vmem:[%s6840_s10 + $0x84] ss:$16 sps:$4 sm:$0xff]   ;;  %v5343_v25 = vld [vmem:[%s6840_s10 + $0x80] ss:$16 sps:$4 sm:$0xff]  }
 0x2d9   : > { %v5348_v16 = vld [vmem:[%s6840_s10 + $0x284] ss:$16 sps:$4 sm:$0xff]   ;;  %3415 = vmatprep.subr.bf16.mxu0 %v5345_v22 }
 0x2da   : > { %v1576_v10 = vpack.c.bf16 %v1552_v24, %v1550_v23  ;;  %3456 = vmatprep.subr.bf16.mxu1 %v5348_v16  ;;  %3416 = vmatpush1.bf16.msra.mxu0 %v5343_v25  ;;  %v5408_v22 = vld [vmem:[%s6840_s10 + $0x344] ss:$16 sps:$4 sm:$0xff]   ;;  %v5403_v16 = vld [vmem:[%s6840_s10 + $0x140] ss:$16 sps:$4 sm:$0xff]  }
 0x2db   : > { %v5414_v25 = vld [vmem:[%s6840_s10 + $0x324] ss:$16 sps:$4 sm:$0xff]  }
 0x2dc   : > { %2053 = vmatprep.mubr.bf16.mxu0 %v1576_v10  ;;  %2166 = vmatprep.mubr.bf16.mxu1 %v1576_v10  ;;  %v5346_v10 = vld [vmem:[%s6840_s10 + $0x280] ss:$16 sps:$4 sm:$0xff]  }
 0x2dd   : > { %2054 = vmatmul.mubr.bf16.gmra.mxu0 %v1575_v26  ;;  %2167 = vmatmul.mubr.bf16.gmra.mxu1 %v1575_v26 }
 0x2de   : > { %3457 = vmatpush1.bf16.msra.mxu1 %v5346_v10  ;;  %v5409_v10 = vld [vmem:[%s6840_s10 + $0x120] ss:$16 sps:$4 sm:$0xff]  }
 0x2e8   : > { %v1498_v28 = vpop.f32.mrf.mxu1 }
 0x2e9   : > { %v1499_v35 = vadd.f32 %v1498_v28, %v6244_v32 }
 0x2ea   : > { %v1500_v29 = vpop.f32.mrf.mxu1 }
 0x2eb   : > { %v1501_v39 = vadd.f32 %v1500_v29, %v6241_v30  ;;  %v1553_v44 = vmax.f32 %v1499_v35, 0.0  ;;  %v5354_v35 = vld [vmem:[%s6840_s10 + $0x264] ss:$16 sps:$4 sm:$0xff]  }
 0x2ec   : > { %v1502_v17 = vpop.f32.mrf.mxu1  ;;  %3458 = vmatprep.subr.bf16.mxu1 %v5354_v35  ;;  %v5426_v35 = vld [vmem:[%s6840_s10 + $0x2ec] ss:$16 sps:$4 sm:$0xff]  }
 0x2ed   : > { %v1503_v33 = vadd.f32 %v1502_v17, %v6244_v32  ;;  %v1554_v42 = vmax.f32 %v1501_v39, 0.0 }
 0x2ee   : > { %v1504_v36 = vpop.f32.mrf.mxu1 }
 0x2ef   : > { %v1505_v38 = vadd.f32 %v1504_v36, %v6241_v30  ;;  %v1555_v40 = vmax.f32 %v1503_v33, 0.0  ;;  %v5351_v33 = vld [vmem:[%s6840_s10 + $0x64] ss:$16 sps:$4 sm:$0xff]  }
 0x2f0   : > { %v1508_v41 = vpop.f32.mrf.mxu1  ;;  %3417 = vmatprep.subr.bf16.mxu0 %v5351_v33  ;;  %v5423_v33 = vld [vmem:[%s6840_s10 + $0xec] ss:$16 sps:$4 sm:$0xff]  }
 0x2f1   : > { %v1556_v43 = vmax.f32 %v1505_v38, 0.0  ;;  %v1577_v47 = vpack.c.bf16 %v1555_v40, %v1553_v44  ;;  %v1509_v51 = vadd.f32 %v1508_v41, %v6244_v32  ;;  %v5349_v40 = vld [vmem:[%s6840_s10 + $0x60] ss:$16 sps:$4 sm:$0xff]  }
 0x2f2   : > { %v1510_v45 = vpop.f32.mrf.mxu1  ;;  %v5352_v41 = vld [vmem:[%s6840_s10 + $0x260] ss:$16 sps:$4 sm:$0xff]   ;;  %3418 = vmatpush1.bf16.msra.mxu0 %v5349_v40 }
 0x2f3   : > { %v1578_v46 = vpack.c.bf16 %v1556_v43, %v1554_v42  ;;  %v1511_v49 = vadd.f32 %v1510_v45, %v6241_v30  ;;  %v1557_v57 = vmax.f32 %v1509_v51, 0.0  ;;  %3459 = vmatpush1.bf16.msra.mxu1 %v5352_v41 }
 0x2f4   : > { %v1512_v48 = vpop.f32.mrf.mxu1 }
 0x2f5   : > { %v1513_v50 = vadd.f32 %v1512_v48, %v6244_v32  ;;  %2063 = vmatprep.mubr.bf16.mxu0 %v1578_v46  ;;  %2176 = vmatprep.mubr.bf16.mxu1 %v1578_v46  ;;  %v1558_v55 = vmax.f32 %v1511_v49, 0.0  ;;  %v5357_v46 = vld [vmem:[%s6840_s10 + $0x44] ss:$16 sps:$4 sm:$0xff]   ;;  %v5355_v49 = vld [vmem:[%s6840_s10 + $0x40] ss:$16 sps:$4 sm:$0xff]  }
 0x2f6   : > { %v1514_v52 = vpop.f32.mrf.mxu1  ;;  %2064 = vmatmul.mubr.bf16.gmra.mxu0 %v1577_v47  ;;  %2177 = vmatmul.mubr.bf16.gmra.mxu1 %v1577_v47  ;;  %v5360_v47 = vld [vmem:[%s6840_s10 + $0x244] ss:$16 sps:$4 sm:$0xff]  }
 0x2f7   : > { %v1515_v53 = vadd.f32 %v1514_v52, %v6241_v30  ;;  %v1559_v54 = vmax.f32 %v1513_v50, 0.0  ;;  %3419 = vmatprep.subr.bf16.mxu0 %v5357_v46  ;;  %3460 = vmatprep.subr.bf16.mxu1 %v5360_v47 }
 0x2f8   : > { %3420 = vmatpush1.bf16.msra.mxu0 %v5355_v49  ;;  %v6483_v49 = vsub.s32 3, %v6098_v34 }
 0x2f9   : > { %v1560_v56 = vmax.f32 %v1515_v53, 0.0  ;;  %v1579_v59 = vpack.c.bf16 %v1559_v54, %v1557_v57  ;;  %v5363_v53 = vld [vmem:[%s6840_s10 + $0x24] ss:$16 sps:$4 sm:$0xff]  }
 0x2fa   : > { %v5366_v54 = vld [vmem:[%s6840_s10 + $0x224] ss:$16 sps:$4 sm:$0xff]   ;;  %3421 = vmatprep.subr.bf16.mxu0 %v5363_v53 }
 0x2fb   : > { %v1580_v58 = vpack.c.bf16 %v1560_v56, %v1558_v55  ;;  %v5361_v55 = vld [vmem:[%s6840_s10 + $0x20] ss:$16 sps:$4 sm:$0xff]   ;;  %v5369_v57 = vld [vmem:[%s6840_s10 + $0x4] ss:$16 sps:$4 sm:$0xff]  }
 0x2fc   : > { %v5364_v56 = vld [vmem:[%s6840_s10 + $0x220] ss:$16 sps:$4 sm:$0xff]   ;;  %3422 = vmatpush1.bf16.msra.mxu0 %v5361_v55 }
 0x2fd   : > { %2073 = vmatprep.mubr.bf16.mxu0 %v1580_v58  ;;  %2186 = vmatprep.mubr.bf16.mxu1 %v1580_v58  ;;  %v5372_v58 = vld [vmem:[%s6840_s10 + $0x204] ss:$16 sps:$4 sm:$0xff]  }
 0x2fe   : > { %2074 = vmatmul.mubr.bf16.gmra.mxu0 %v1579_v59  ;;  %2187 = vmatmul.mubr.bf16.gmra.mxu1 %v1579_v59  ;;  %v5367_v59 = vld [vmem:[%s6840_s10] ss:$16 sps:$4 sm:$0xff]  }
 0x2ff   : > { %3423 = vmatprep.subr.bf16.mxu0 %v5369_v57 }
 0x300   : > { %3424 = vmatpush1.bf16.msra.mxu0 %v5367_v59 }
 0x301   : > { %3425 = vmatprep.subr.bf16.mxu0 %v5375_v61 }
 0x304   : > { %3426 = vmatpush2.bf16.msra.mxu0 %v5373_v63 }
 0x305   : > { %3427 = vmatprep.subr.bf16.mxu0 %v5381_v2 }
 0x308   : > { %3428 = vmatpush2.bf16.msra.mxu0 %v5379_v4 }
 0x309   : > { %3429 = vmatprep.subr.bf16.mxu0 %v5387_v6 }
 0x30c   : > { %3430 = vmatpush2.bf16.msra.mxu0 %v5385_v8 }
 0x30d   : > { %v1518_v9 = vpop.f32.mrf.mxu1 }
 0x30e   : > { %v1519_v15 = vadd.f32 %v1518_v9, %v6244_v32  ;;  %v5388_v9 = vld [vmem:[%s6840_s10 + $0x3a0] ss:$16 sps:$4 sm:$0xff]  }
 0x30f   : > { %v1520_v11 = vpop.f32.mrf.mxu1 }
 0x310   : > { %v1521_v13 = vadd.f32 %v1520_v11, %v6241_v30  ;;  %v1561_v26 = vmax.f32 %v1519_v15, 0.0  ;;  %v5393_v11 = vld [vmem:[%s6840_s10 + $0x184] ss:$16 sps:$4 sm:$0xff]  }
 0x311   : > { %v1522_v12 = vpop.f32.mrf.mxu1  ;;  %3431 = vmatprep.subr.bf16.mxu0 %v5393_v11  ;;  %v5399_v15 = vld [vmem:[%s6840_s10 + $0x164] ss:$16 sps:$4 sm:$0xff]  }
 0x312   : > { %v1523_v14 = vadd.f32 %v1522_v12, %v6244_v32  ;;  %v1562_v23 = vmax.f32 %v1521_v13, 0.0  ;;  %v5396_v12 = vld [vmem:[%s6840_s10 + $0x384] ss:$16 sps:$4 sm:$0xff]   ;;  %v5391_v13 = vld [vmem:[%s6840_s10 + $0x180] ss:$16 sps:$4 sm:$0xff]  }
 0x313   : > { %v1524_v18 = vpop.f32.mrf.mxu1  ;;  %3432 = vmatpush2.bf16.msra.mxu0 %v5391_v13 }
 0x314   : > { %v1525_v19 = vadd.f32 %v1524_v18, %v6241_v30  ;;  %v1563_v20 = vmax.f32 %v1523_v14, 0.0  ;;  %v5394_v14 = vld [vmem:[%s6840_s10 + $0x380] ss:$16 sps:$4 sm:$0xff]   ;;  %v5402_v18 = vld [vmem:[%s6840_s10 + $0x364] ss:$16 sps:$4 sm:$0xff]   ;;  %3433 = vmatprep.subr.bf16.mxu0 %v5399_v15 }
 0x315   : > { %v1528_v21 = vpop.f32.mrf.mxu1 }
 0x316   : > { %v1564_v24 = vmax.f32 %v1525_v19, 0.0  ;;  %v1581_v17 = vpack.c.bf16 %v1563_v20, %v1561_v26  ;;  %v1529_v42 = vadd.f32 %v1528_v21, %v6244_v32  ;;  %v5397_v19 = vld [vmem:[%s6840_s10 + $0x160] ss:$16 sps:$4 sm:$0xff]   ;;  %v5405_v21 = vld [vmem:[%s6840_s10 + $0x144] ss:$16 sps:$4 sm:$0xff]  }
 0x317   : > { %v1530_v28 = vpop.f32.mrf.mxu1  ;;  %v5400_v20 = vld [vmem:[%s6840_s10 + $0x360] ss:$16 sps:$4 sm:$0xff]   ;;  %3434 = vmatpush2.bf16.msra.mxu0 %v5397_v19 }
 0x318   : > { %v1582_v29 = vpack.c.bf16 %v1564_v24, %v1562_v23  ;;  %v1531_v36 = vadd.f32 %v1530_v28, %v6241_v30  ;;  %v1565_v50 = vmax.f32 %v1529_v42, 0.0  ;;  %v5406_v23 = vld [vmem:[%s6840_s10 + $0x340] ss:$16 sps:$4 sm:$0xff]   ;;  %3435 = vmatprep.subr.bf16.mxu0 %v5405_v21  ;;  %v5411_v24 = vld [vmem:[%s6840_s10 + $0x124] ss:$16 sps:$4 sm:$0xff]  }
 0x319   : > { %v1532_v39 = vpop.f32.mrf.mxu1  ;;  %v5412_v26 = vld [vmem:[%s6840_s10 + $0x320] ss:$16 sps:$4 sm:$0xff]   ;;  %v5417_v28 = vld [vmem:[%s6840_s10 + $0x104] ss:$16 sps:$4 sm:$0xff]  }
 0x31a   : > { %v1533_v38 = vadd.f32 %v1532_v39, %v6244_v32  ;;  %2083 = vmatprep.mubr.bf16.mxu0 %v1582_v29  ;;  %2196 = vmatprep.mubr.bf16.mxu1 %v1582_v29  ;;  %v1566_v48 = vmax.f32 %v1531_v36, 0.0  ;;  %v5415_v29 = vld [vmem:[%s6840_s10 + $0x100] ss:$16 sps:$4 sm:$0xff]   ;;  %v5420_v39 = vld [vmem:[%s6840_s10 + $0x304] ss:$16 sps:$4 sm:$0xff]  }
 0x31b   : > { %v1534_v43 = vpop.f32.mrf.mxu1  ;;  %2084 = vmatmul.mubr.bf16.gmra.mxu0 %v1581_v17  ;;  %2197 = vmatmul.mubr.bf16.gmra.mxu1 %v1581_v17  ;;  %v5418_v17 = vld [vmem:[%s6840_s10 + $0x300] ss:$16 sps:$4 sm:$0xff]  }
 0x31c   : > { %v1535_v44 = vadd.f32 %v1534_v43, %v6241_v30  ;;  %v1567_v45 = vmax.f32 %v1533_v38, 0.0  ;;  %v5358_v30 = vld [vmem:[%s6840_s10 + $0x240] ss:$16 sps:$4 sm:$0xff]   ;;  %3436 = vmatpush2.bf16.msra.mxu0 %v5403_v16 }
 0x31d   : > { %3461 = vmatpush1.bf16.msra.mxu1 %v5358_v30  ;;  %3437 = vmatprep.subr.bf16.mxu0 %v5411_v24 }
 0x31e   : > { %v1568_v32 = vmax.f32 %v1535_v44, 0.0  ;;  %v1583_v52 = vpack.c.bf16 %v1567_v45, %v1565_v50  ;;  %3462 = vmatprep.subr.bf16.mxu1 %v5366_v54 }
 0x320   : > { %v1584_v51 = vpack.c.bf16 %v1568_v32, %v1566_v48  ;;  %3438 = vmatpush2.bf16.msra.mxu0 %v5409_v10  ;;  %v6477_v48 = vsub.s32 2, %v6098_v34  ;;  %v1649_v32 = vld [vmem:[%s6839_s9] sm:$0xf] }
 0x321   : > { %3463 = vmatpush1.bf16.msra.mxu1 %v5364_v56  ;;  %3439 = vmatprep.subr.bf16.mxu0 %v5417_v28  ;;  %v6492_v53 = vrot.slane %v1649_v32, %v6235_v27  ;;  %v6495_v54 = vrot.slane %v1649_v32, %v6483_v49 }
 0x322   : > { %2093 = vmatprep.mubr.bf16.mxu0 %v1584_v51  ;;  %2206 = vmatprep.mubr.bf16.mxu1 %v1584_v51  ;;  %v6486_v51 = vrot.slane %v1649_v32, %v6102_v37 }
 0x323   : > { %2094 = vmatmul.mubr.bf16.gmra.mxu0 %v1583_v52  ;;  %2207 = vmatmul.mubr.bf16.gmra.mxu1 %v1583_v52  ;;  %v6489_v52 = vrot.slane %v1649_v32, %v6477_v48 }
 0x324   : > { %3464 = vmatprep.subr.bf16.mxu1 %v5372_v58  ;;  %3440 = vmatpush2.bf16.msra.mxu0 %v5415_v29 }
 0x325   : > { %3465 = vmatpush1.bf16.msra.mxu1 %v5370_v60  ;;  %3491 = vmatprep.subr.bf16.mxu0 %v5423_v33 }
 0x326   : > { %3466 = vmatprep.subr.bf16.mxu1 %v5378_v62 }
 0x329   : > { %3467 = vmatpush2.bf16.msra.mxu1 %v5376_v0 }
 0x32a   : > { %3468 = vmatprep.subr.bf16.mxu1 %v5384_v3 }
 0x32d   : > { %3469 = vmatpush2.bf16.msra.mxu1 %v5382_v5 }
 0x32e   : > { %3470 = vmatprep.subr.bf16.mxu1 %v5390_v7 }
 0x331   : > { %3471 = vmatpush2.bf16.msra.mxu1 %v5388_v9 }
 0x332   : > { %3472 = vmatprep.subr.bf16.mxu1 %v5396_v12 }
 0x335   : > { %3473 = vmatpush2.bf16.msra.mxu1 %v5394_v14 }
 0x336   : > { %3474 = vmatprep.subr.bf16.mxu1 %v5402_v18 }
 0x339   : > { %3475 = vmatpush2.bf16.msra.mxu1 %v5400_v20 }
 0x33a   : > { %3476 = vmatprep.subr.bf16.mxu1 %v5408_v22 }
 0x33d   : > { %3477 = vmatpush2.bf16.msra.mxu1 %v5406_v23 }
 0x33e   : > { %3478 = vmatprep.subr.bf16.mxu1 %v5414_v25 }
 0x341   : > { %3479 = vmatpush2.bf16.msra.mxu1 %v5412_v26 }
 0x342   : > { %3480 = vmatprep.subr.bf16.mxu1 %v5420_v39 }
 0x345   : > { %3481 = vmatpush2.bf16.msra.mxu1 %v5418_v17 }
 0x346   : > { %3532 = vmatprep.subr.bf16.mxu1 %v5426_v35 }
 0x370   : > { %v2025_v36 = vpop.f32.mrf.mxu0  ;;  %v2138_v38 = vpop.f32.mrf.mxu1 }
 0x371   : > { %v2026_v59 = vadd.f32 %v2025_v36, %v6486_v51  ;;  %v2139_v60 = vadd.f32 %v2138_v38, %v6489_v52 }
 0x372   : > { %v2027_v40 = vpop.f32.mrf.mxu0  ;;  %v2140_v41 = vpop.f32.mrf.mxu1 }
 0x373   : > { %v2028_v63 = vadd.f32 %v2027_v40, %v6492_v53  ;;  %v2141_v0 = vadd.f32 %v2140_v41, %v6495_v54  ;;  %v2217_v13 = vmax.f32 %v2026_v59, 0.0  ;;  %v2219_v14 = vmax.f32 %v2139_v60, 0.0 }
 0x374   : > { %v2029_v42 = vpop.f32.mrf.mxu0  ;;  %v2142_v43 = vpop.f32.mrf.mxu1 }
 0x375   : > { %v2030_v55 = vadd.f32 %v2029_v42, %v6486_v51  ;;  %v2143_v56 = vadd.f32 %v2142_v43, %v6489_v52  ;;  %v2218_v19 = vmax.f32 %v2028_v63, 0.0  ;;  %v2220_v20 = vmax.f32 %v2141_v0, 0.0 }
 0x376   : > { %v2031_v44 = vpop.f32.mrf.mxu0  ;;  %v2144_v45 = vpop.f32.mrf.mxu1 }
 0x377   : > { %v2032_v61 = vadd.f32 %v2031_v44, %v6492_v53  ;;  %v2145_v62 = vadd.f32 %v2144_v45, %v6495_v54  ;;  %v2221_v4 = vmax.f32 %v2030_v55, 0.0  ;;  %v2223_v5 = vmax.f32 %v2143_v56, 0.0 }
 0x378   : > { %v2035_v46 = vpop.f32.mrf.mxu0  ;;  %v2148_v47 = vpop.f32.mrf.mxu1 }
 0x379   : > { %v2036_v2 = vadd.f32 %v2035_v46, %v6486_v51  ;;  %v2149_v3 = vadd.f32 %v2148_v47, %v6489_v52  ;;  %v2222_v15 = vmax.f32 %v2032_v61, 0.0  ;;  %v2224_v18 = vmax.f32 %v2145_v62, 0.0 }
 0x37a   : > { %v2037_v30 = vpop.f32.mrf.mxu0  ;;  %v2150_v50 = vpop.f32.mrf.mxu1  ;;  %v2428_v16 = vmax.f32 %v2217_v13, %v2221_v4  ;;  %v2470_v23 = vmax.f32 %v2219_v14, %v2223_v5 }
 0x37b   : > { %v2038_v6 = vadd.f32 %v2037_v30, %v6492_v53  ;;  %v2151_v7 = vadd.f32 %v2150_v50, %v6495_v54  ;;  %v2225_v21 = vmax.f32 %v2036_v2, 0.0  ;;  %v2227_v22 = vmax.f32 %v2149_v3, 0.0 }
 0x37c   : > { %v2039_v57 = vpop.f32.mrf.mxu0  ;;  %v2152_v58 = vpop.f32.mrf.mxu1  ;;  %v2449_v33 = vmax.f32 %v2218_v19, %v2222_v15  ;;  %v2491_v35 = vmax.f32 %v2220_v20, %v2224_v18 }
 0x37d   : > { %v2040_v8 = vadd.f32 %v2039_v57, %v6486_v51  ;;  %v2153_v9 = vadd.f32 %v2152_v58, %v6489_v52  ;;  %v2226_v28 = vmax.f32 %v2038_v6, 0.0  ;;  %v2228_v29 = vmax.f32 %v2151_v7, 0.0 }
 0x37e   : > { %v2041_v11 = vpop.f32.mrf.mxu0  ;;  %v2154_v12 = vpop.f32.mrf.mxu1  ;;  %v2429_v42 = vmax.f32 %v2428_v16, %v2225_v21  ;;  %v2471_v43 = vmax.f32 %v2470_v23, %v2227_v22 }
 0x37f   : > { %v2042_v24 = vadd.f32 %v2041_v11, %v6492_v53  ;;  %v2155_v25 = vadd.f32 %v2154_v12, %v6495_v54  ;;  %v2229_v17 = vmax.f32 %v2040_v8, 0.0  ;;  %v2231_v39 = vmax.f32 %v2153_v9, 0.0 }
 0x380   : > { %v2450_v50 = vmax.f32 %v2449_v33, %v2226_v28  ;;  %v2492_v55 = vmax.f32 %v2491_v35, %v2228_v29 }
 0x381   : > { %v2230_v46 = vmax.f32 %v2042_v24, 0.0  ;;  %v2232_v47 = vmax.f32 %v2155_v25, 0.0  ;;  %v2430_v56 = vmax.f32 %v2429_v42, %v2229_v17  ;;  %v2472_v57 = vmax.f32 %v2471_v43, %v2231_v39 }
 0x383   : > { %v2451_v5 = vmax.f32 %v2450_v50, %v2230_v46  ;;  %v2493_v6 = vmax.f32 %v2492_v55, %v2232_v47 }
 0x395   : > { %v2045_v10 = vpop.f32.mrf.mxu0  ;;  %v2158_v26 = vpop.f32.mrf.mxu1 }
 0x396   : > { %v2046_v36 = vadd.f32 %v2045_v10, %v6486_v51  ;;  %v2159_v38 = vadd.f32 %v2158_v26, %v6489_v52 }
 0x397   : > { %v2047_v40 = vpop.f32.mrf.mxu0  ;;  %v2160_v41 = vpop.f32.mrf.mxu1 }
 0x398   : > { %v2048_v44 = vadd.f32 %v2047_v40, %v6492_v53  ;;  %v2161_v45 = vadd.f32 %v2160_v41, %v6495_v54  ;;  %v2233_v58 = vmax.f32 %v2046_v36, 0.0  ;;  %v2235_v59 = vmax.f32 %v2159_v38, 0.0 }
 0x399   : > { %v2049_v32 = vpop.f32.mrf.mxu0  ;;  %v2162_v30 = vpop.f32.mrf.mxu1 }
 0x39a   : > { %v2050_v60 = vadd.f32 %v2049_v32, %v6486_v51  ;;  %v2163_v61 = vadd.f32 %v2162_v30, %v6489_v52  ;;  %v2234_v0 = vmax.f32 %v2048_v44, 0.0  ;;  %v2236_v2 = vmax.f32 %v2161_v45, 0.0 }
 0x39b   : > { %v2051_v62 = vpop.f32.mrf.mxu0  ;;  %v2164_v63 = vpop.f32.mrf.mxu1  ;;  %v2431_v18 = vmax.f32 %v2430_v56, %v2233_v58  ;;  %v2473_v19 = vmax.f32 %v2472_v57, %v2235_v59 }
 0x39c   : > { %v2052_v3 = vadd.f32 %v2051_v62, %v6492_v53  ;;  %v2165_v4 = vadd.f32 %v2164_v63, %v6495_v54  ;;  %v2237_v7 = vmax.f32 %v2050_v60, 0.0  ;;  %v2239_v8 = vmax.f32 %v2163_v61, 0.0 }
 0x39d   : > { %v2055_v9 = vpop.f32.mrf.mxu0  ;;  %v2168_v11 = vpop.f32.mrf.mxu1  ;;  %v2452_v22 = vmax.f32 %v2451_v5, %v2234_v0  ;;  %v2494_v16 = vmax.f32 %v2493_v6, %v2236_v2  ;;  %v5834_v2 = vmov 1966171168  }
 0x39e   : > { %v2238_v12 = vmax.f32 %v2052_v3, 0.0  ;;  %v2240_v13 = vmax.f32 %v2165_v4, 0.0  ;;  %v2056_v14 = vadd.f32 %v2055_v9, %v6486_v51  ;;  %v2169_v15 = vadd.f32 %v2168_v11, %v6489_v52 }
 0x39f   : > { %v2057_v20 = vpop.f32.mrf.mxu0  ;;  %v2170_v21 = vpop.f32.mrf.mxu1  ;;  %v2432_v25 = vmax.f32 %v2431_v18, %v2237_v7  ;;  %v2474_v10 = vmax.f32 %v2473_v19, %v2239_v8  ;;  %v2523_v3 = vunpack.c.l.s4 %v5834_v2  ;;  %v5430_v2 = vld [vmem:[%s6840_s10 + $0x2c8] ss:$16 sps:$4 sm:$0xff]  }
 0x3a0   : > { %v2241_v23 = vmax.f32 %v2056_v14, 0.0  ;;  %v2243_v24 = vmax.f32 %v2169_v15, 0.0  ;;  %v2058_v26 = vadd.f32 %v2057_v20, %v6492_v53  ;;  %v2171_v28 = vadd.f32 %v2170_v21, %v6495_v54 }
 0x3a1   : > { %v2059_v29 = vpop.f32.mrf.mxu0  ;;  %v2172_v17 = vpop.f32.mrf.mxu1  ;;  %v2453_v39 = vmax.f32 %v2452_v22, %v2238_v12  ;;  %v2495_v33 = vmax.f32 %v2494_v16, %v2240_v13  ;;  %v2524_v11 = vunpack.c.0.s8 %v2523_v3  ;;  %v5435_v3 = vld [vmem:[%s6840_s10 + $0xac] ss:$16 sps:$4 sm:$0xff]  }
 0x3a2   : > { %v2060_v35 = vadd.f32 %v2059_v29, %v6486_v51  ;;  %v2173_v36 = vadd.f32 %v2172_v17, %v6489_v52  ;;  %v2433_v38 = vmax.f32 %v2432_v25, %v2241_v23  ;;  %v2475_v40 = vmax.f32 %v2474_v10, %v2243_v24 }
 0x3a3   : > { %v2242_v41 = vmax.f32 %v2058_v26, 0.0  ;;  %v2244_v42 = vmax.f32 %v2171_v28, 0.0  ;;  %v2061_v43 = vpop.f32.mrf.mxu0  ;;  %v2174_v44 = vpop.f32.mrf.mxu1  ;;  %v6530_v20 = vsub.s32 %v2524_v11, %v6098_v34  ;;  %v5450_v11 = vld [vmem:[%s6840_s10 + $0x26c] ss:$16 sps:$4 sm:$0xff]  }
 0x3a4   : > { %v2245_v45 = vmax.f32 %v2060_v35, 0.0  ;;  %v2247_v46 = vmax.f32 %v2173_v36, 0.0  ;;  %v2062_v47 = vadd.f32 %v2061_v43, %v6492_v53  ;;  %v2175_v32 = vadd.f32 %v2174_v44, %v6495_v54 }
 0x3a5   : > { %v2454_v30 = vmax.f32 %v2453_v39, %v2242_v41  ;;  %v2496_v50 = vmax.f32 %v2495_v33, %v2244_v42 }
 0x3a6   : > { %v2434_v55 = vmax.f32 %v2433_v38, %v2245_v45  ;;  %v2476_v56 = vmax.f32 %v2475_v40, %v2247_v46  ;;  %v2246_v57 = vmax.f32 %v2062_v47, 0.0  ;;  %v2248_v51 = vmax.f32 %v2175_v32, 0.0 }
 0x3a8   : > { %v2443_v58 = vrot.slane %v2434_v55, 4  ;;  %v2485_v52 = vrot.slane %v2476_v56, 4  ;;  %v2455_v59 = vmax.f32 %v2454_v30, %v2246_v57  ;;  %v2497_v60 = vmax.f32 %v2496_v50, %v2248_v51 }
 0x3aa   : > { %v2444_v61 = vmax.f32 %v2434_v55, %v2443_v58  ;;  %v2486_v62 = vmax.f32 %v2476_v56, %v2485_v52  ;;  %v2464_v63 = vrot.slane %v2455_v59, 4  ;;  %v2506_v0 = vrot.slane %v2497_v60, 4  ;;  %v5421_v52 = vld [vmem:[%s6840_s10 + $0xe8] ss:$16 sps:$4 sm:$0xff]  }
 0x3ac   : > { %v2445_v4 = vrot.slane %v2444_v61, 2  ;;  %v2487_v53 = vrot.slane %v2486_v62, 2  ;;  %v2465_v5 = vmax.f32 %v2455_v59, %v2464_v63  ;;  %v2507_v54 = vmax.f32 %v2497_v60, %v2506_v0  ;;  %v5424_v59 = vld [vmem:[%s6840_s10 + $0x2e8] ss:$16 sps:$4 sm:$0xff]   ;;  %v5432_v63 = vld [vmem:[%s6840_s10 + $0x2cc] ss:$16 sps:$4 sm:$0xff]  }
 0x3ad   : > { %v5427_v0 = vld [vmem:[%s6840_s10 + $0xc8] ss:$16 sps:$4 sm:$0xff]  }
 0x3ae   : > { %v2446_v6 = vmax.f32 %v2444_v61, %v2445_v4  ;;  %v2488_v7 = vmax.f32 %v2486_v62, %v2487_v53  ;;  %v2466_v8 = vrot.slane %v2465_v5, 2  ;;  %v2508_v9 = vrot.slane %v2507_v54, 2  ;;  %v5429_v62 = vld [vmem:[%s6840_s10 + $0xcc] ss:$16 sps:$4 sm:$0xff]   ;;  %v5433_v53 = vld [vmem:[%s6840_s10 + $0xa8] ss:$16 sps:$4 sm:$0xff]  }
 0x3af   : > { %v5438_v4 = vld [vmem:[%s6840_s10 + $0x2ac] ss:$16 sps:$4 sm:$0xff]  }
 0x3b0   : > { %v2447_v12 = vrot.slane %v2446_v6, 1  ;;  %v2489_v13 = vrot.slane %v2488_v7, 1  ;;  %v2467_v14 = vmax.f32 %v2465_v5, %v2466_v8  ;;  %v2509_v15 = vmax.f32 %v2507_v54, %v2508_v9  ;;  %v5436_v5 = vld [vmem:[%s6840_s10 + $0x2a8] ss:$16 sps:$4 sm:$0xff]   ;;  %v5441_v54 = vld [vmem:[%s6840_s10 + $0x8c] ss:$16 sps:$4 sm:$0xff]  }
 0x3b1   : > { %v5442_v8 = vld [vmem:[%s6840_s10 + $0x288] ss:$16 sps:$4 sm:$0xff]   ;;  %v5447_v9 = vld [vmem:[%s6840_s10 + $0x6c] ss:$16 sps:$4 sm:$0xff]  }
 0x3b2   : > { %v2468_v18 = vrot.slane %v2467_v14, 1  ;;  %v2510_v19 = vrot.slane %v2509_v15, 1  ;;  %v2448_v21 = vmax.f32 %v2446_v6, %v2447_v12  ;;  %v2490_v22 = vmax.f32 %v2488_v7, %v2489_v13  ;;  %v5444_v6 = vld [vmem:[%s6840_s10 + $0x28c] ss:$16 sps:$4 sm:$0xff]   ;;  %v5439_v7 = vld [vmem:[%s6840_s10 + $0x88] ss:$16 sps:$4 sm:$0xff]  }
 0x3b3   : > { %v5445_v12 = vld [vmem:[%s6840_s10 + $0x68] ss:$16 sps:$4 sm:$0xff]  }
 0x3b4   : > { %v2469_v16 = vmax.f32 %v2467_v14, %v2468_v18  ;;  %v2511_v23 = vmax.f32 %v2509_v15, %v2510_v19  ;;  %v5448_v13 = vld [vmem:[%s6840_s10 + $0x268] ss:$16 sps:$4 sm:$0xff]   ;;  %v5453_v14 = vld [vmem:[%s6840_s10 + $0x4c] ss:$16 sps:$4 sm:$0xff]  }
 0x3b5   : > { %v5456_v15 = vld [vmem:[%s6840_s10 + $0x24c] ss:$16 sps:$4 sm:$0xff]  }
 0x3b6   : > { %v2520_v24 = vcombine.low %v2448_v21, %v2469_v16  ;;  %v2521_v25 = vcombine.low %v2490_v22, %v2511_v23  ;;  %v2065_v10 = vpop.f32.mrf.mxu0  ;;  %v2178_v26 = vpop.f32.mrf.mxu1  ;;  %v5451_v21 = vld [vmem:[%s6840_s10 + $0x48] ss:$16 sps:$4 sm:$0xff]  }
 0x3b7   : > { %v5454_v22 = vld [vmem:[%s6840_s10 + $0x248] ss:$16 sps:$4 sm:$0xff]  }
 0x3b8   : > { %v2528_v28 = vrot.slane %v2520_v24, %v6530_v20  ;;  %v2535_v29 = vrot.slane %v2521_v25, %v6530_v20  ;;  %v2067_v17 = vpop.f32.mrf.mxu0  ;;  %v2180_v39 = vpop.f32.mrf.mxu1  ;;  %v5459_v24 = vld [vmem:[%s6840_s10 + $0x2c] ss:$16 sps:$4 sm:$0xff]  }
 0x3b9   : > { %v5462_v25 = vld [vmem:[%s6840_s10 + $0x22c] ss:$16 sps:$4 sm:$0xff]  }
 0x3ba   : > { %v2536_v33 = vcombine.low %v2528_v28, %v2535_v29  ;;  %v2069_v35 = vpop.f32.mrf.mxu0  ;;  %v2182_v36 = vpop.f32.mrf.mxu1  ;;  %v5457_v28 = vld [vmem:[%s6840_s10 + $0x28] ss:$16 sps:$4 sm:$0xff]  }
 0x3bb   : > { %v5460_v29 = vld [vmem:[%s6840_s10 + $0x228] ss:$16 sps:$4 sm:$0xff]   ;;  %v5468_v35 = vld [vmem:[%s6840_s10 + $0x20c] ss:$16 sps:$4 sm:$0xff]  }
 0x3bc   : > { %v2543_v38 = vrot.slane %v2536_v33, %v6530_v20  ;;  %v2071_v40 = vpop.f32.mrf.mxu0  ;;  %v2184_v41 = vpop.f32.mrf.mxu1  ;;  %v5465_v33 = vld [vmem:[%s6840_s10 + $0xc] ss:$16 sps:$4 sm:$0xff]  }
 0x3bd   : > { %v5463_v40 = vld [vmem:[%s6840_s10 + $0x8] ss:$16 sps:$4 sm:$0xff]  }
 0x3be   : > { %2549 = vst.msk [vmem:[#allocation2] sm:$0xf] %vm6535_vm1, %v2543_v38  ;;  %v2075_v42 = vpop.f32.mrf.mxu0  ;;  %v2188_v43 = vpop.f32.mrf.mxu1  ;;  %v5466_v41 = vld [vmem:[%s6840_s10 + $0x208] ss:$16 sps:$4 sm:$0xff]  }
 0x3c0   : > { %v2077_v44 = vpop.f32.mrf.mxu0  ;;  %v2190_v45 = vpop.f32.mrf.mxu1 }
 0x3c1   : > { %v5471_v44 = vld [vmem:[%s6840_s10 + $0x1ec] ss:$16 sps:$4 sm:$0xff]  }
 0x3c2   : > { %v2079_v46 = vpop.f32.mrf.mxu0  ;;  %v2192_v47 = vpop.f32.mrf.mxu1  ;;  %v5474_v45 = vld [vmem:[%s6840_s10 + $0x3ec] ss:$16 sps:$4 sm:$0xff]  }
 0x3c4   : > { %v2081_v32 = vpop.f32.mrf.mxu0  ;;  %v2194_v30 = vpop.f32.mrf.mxu1 }
 0x3c5   : > { %v2593_v50 = vld [vmem:[#allocation2] sm:$0xf]  ;;  %v5469_v32 = vld [vmem:[%s6840_s10 + $0x1e8] ss:$16 sps:$4 sm:$0xff]  }
 0x3c6   : > { %v2602_v31 = vrot.slane %v2593_v50, %v6235_v27  ;;  %v2610_v55 = vrot.slane %v2593_v50, %v6483_v49  ;;  %v2598_v56 = vrot.slane %v2593_v50, %v6102_v37  ;;  %v2606_v57 = vrot.slane %v2593_v50, %v6477_v48  ;;  %v5472_v30 = vld [vmem:[%s6840_s10 + $0x3e8] ss:$16 sps:$4 sm:$0xff]  }
 0x3c8   : > { %v2616_v51 = vpack.c.bf16 %v2602_v31, %v2602_v31  ;;  %v2618_v58 = vpack.c.bf16 %v2610_v55, %v2610_v55  ;;  %v6552_v60 = vpack.c.bf16 %v2598_v56, %v2598_v56  ;;  %v6554_v61 = vpack.c.bf16 %v2606_v57, %v2606_v57  ;;  %v5477_v55 = vld [vmem:[%s6840_s10 + $0x1cc] ss:$16 sps:$4 sm:$0xff]   ;;  %v5475_v57 = vld [vmem:[%s6840_s10 + $0x1c8] ss:$16 sps:$4 sm:$0xff]  }
 0x3c9   : > { %v5480_v56 = vld [vmem:[%s6840_s10 + $0x3cc] ss:$16 sps:$4 sm:$0xff]  }
 0x3ca   : > { %3441 = vmatprep.mubr.bf16.mxu0 %v2616_v51  ;;  %3482 = vmatprep.mubr.bf16.mxu1 %v2618_v58 }
 0x3cb   : > { %3442 = vmatmul.mubr.bf16.vlgmr.msra.gmra.mxu0 %v6552_v60  ;;  %3483 = vmatmul.mubr.bf16.vlgmr.msra.gmra.mxu1 %v6554_v61 }
 0x3cc   : > { %3492 = vmatpush1.bf16.msra.mxu0 %v5421_v52  ;;  %3533 = vmatpush1.bf16.msra.mxu1 %v5424_v59  ;;  %v5486_v52 = vld [vmem:[%s6840_s10 + $0x3ac] ss:$16 sps:$4 sm:$0xff]   ;;  %v5481_v59 = vld [vmem:[%s6840_s10 + $0x1a8] ss:$16 sps:$4 sm:$0xff]  }
 0x3cd   : > { %3523 = vmatprep.mubr.bf16.mxu0 %v2616_v51  ;;  %3564 = vmatprep.mubr.bf16.mxu1 %v2618_v58  ;;  %v5478_v51 = vld [vmem:[%s6840_s10 + $0x3c8] ss:$16 sps:$4 sm:$0xff]   ;;  %v5483_v58 = vld [vmem:[%s6840_s10 + $0x1ac] ss:$16 sps:$4 sm:$0xff]  }
 0x3ce   : > { %3493 = vmatprep.subr.bf16.mxu0 %v5429_v62  ;;  %3534 = vmatprep.subr.bf16.mxu1 %v5432_v63  ;;  %v5484_v62 = vld [vmem:[%s6840_s10 + $0x3a8] ss:$16 sps:$4 sm:$0xff]   ;;  %v5489_v63 = vld [vmem:[%s6840_s10 + $0x18c] ss:$16 sps:$4 sm:$0xff]  }
 0x3d0   : > { %3494 = vmatpush1.bf16.msra.mxu0 %v5427_v0  ;;  %3535 = vmatpush1.bf16.msra.mxu1 %v5430_v2  ;;  %v5492_v0 = vld [vmem:[%s6840_s10 + $0x38c] ss:$16 sps:$4 sm:$0xff]   ;;  %v5487_v2 = vld [vmem:[%s6840_s10 + $0x188] ss:$16 sps:$4 sm:$0xff]  }
 0x3d1   : > { %3495 = vmatprep.subr.bf16.mxu0 %v5435_v3  ;;  %3536 = vmatprep.subr.bf16.mxu1 %v5438_v4  ;;  %v5490_v3 = vld [vmem:[%s6840_s10 + $0x388] ss:$16 sps:$4 sm:$0xff]   ;;  %v5495_v4 = vld [vmem:[%s6840_s10 + $0x16c] ss:$16 sps:$4 sm:$0xff]  }
 0x3d4   : > { %3496 = vmatpush1.bf16.msra.mxu0 %v5433_v53  ;;  %3537 = vmatpush1.bf16.msra.mxu1 %v5436_v5  ;;  %v5498_v53 = vld [vmem:[%s6840_s10 + $0x36c] ss:$16 sps:$4 sm:$0xff]   ;;  %v5493_v5 = vld [vmem:[%s6840_s10 + $0x168] ss:$16 sps:$4 sm:$0xff]  }
 0x3d5   : > { %3497 = vmatprep.subr.bf16.mxu0 %v5441_v54  ;;  %3538 = vmatprep.subr.bf16.mxu1 %v5444_v6  ;;  %v5496_v54 = vld [vmem:[%s6840_s10 + $0x368] ss:$16 sps:$4 sm:$0xff]   ;;  %v5501_v6 = vld [vmem:[%s6840_s10 + $0x14c] ss:$16 sps:$4 sm:$0xff]  }
 0x3d8   : > { %3498 = vmatpush1.bf16.msra.mxu0 %v5439_v7  ;;  %3539 = vmatpush1.bf16.msra.mxu1 %v5442_v8  ;;  %v5504_v7 = vld [vmem:[%s6840_s10 + $0x34c] ss:$16 sps:$4 sm:$0xff]   ;;  %v5499_v8 = vld [vmem:[%s6840_s10 + $0x148] ss:$16 sps:$4 sm:$0xff]  }
 0x3d9   : > { %3499 = vmatprep.subr.bf16.mxu0 %v5447_v9  ;;  %3540 = vmatprep.subr.bf16.mxu1 %v5450_v11  ;;  %v5502_v9 = vld [vmem:[%s6840_s10 + $0x348] ss:$16 sps:$4 sm:$0xff]   ;;  %v5507_v11 = vld [vmem:[%s6840_s10 + $0x12c] ss:$16 sps:$4 sm:$0xff]  }
 0x3db   : > { %v2085_v18 = vpop.f32.mrf.mxu0  ;;  %v2198_v19 = vpop.f32.mrf.mxu1 }
 0x3dc   : > { %3500 = vmatpush1.bf16.msra.mxu0 %v5445_v12  ;;  %3541 = vmatpush1.bf16.msra.mxu1 %v5448_v13  ;;  %v5510_v12 = vld [vmem:[%s6840_s10 + $0x32c] ss:$16 sps:$4 sm:$0xff]   ;;  %v5505_v13 = vld [vmem:[%s6840_s10 + $0x128] ss:$16 sps:$4 sm:$0xff]  }
 0x3dd   : > { %v2087_v16 = vpop.f32.mrf.mxu0  ;;  %v2200_v23 = vpop.f32.mrf.mxu1  ;;  %3501 = vmatprep.subr.bf16.mxu0 %v5453_v14  ;;  %3542 = vmatprep.subr.bf16.mxu1 %v5456_v15  ;;  %v5508_v14 = vld [vmem:[%s6840_s10 + $0x328] ss:$16 sps:$4 sm:$0xff]   ;;  %v5513_v15 = vld [vmem:[%s6840_s10 + $0x10c] ss:$16 sps:$4 sm:$0xff]  }
 0x3de   : > { %v5516_v18 = vld [vmem:[%s6840_s10 + $0x30c] ss:$16 sps:$4 sm:$0xff]   ;;  %v5511_v19 = vld [vmem:[%s6840_s10 + $0x108] ss:$16 sps:$4 sm:$0xff]  }
 0x3df   : > { %v2089_v10 = vpop.f32.mrf.mxu0  ;;  %v2202_v26 = vpop.f32.mrf.mxu1  ;;  %v5517_v16 = vld [vmem:[#allocation7 + $0x70] ss:$8 sps:$4 sm:$0xff]   ;;  %v5522_v23 = vld [vmem:[#allocation7 + $0x64] ss:$8 sps:$4 sm:$0xff]  }
 0x3e0   : > { %3502 = vmatpush1.bf16.msra.mxu0 %v5451_v21  ;;  %3543 = vmatpush1.bf16.msra.mxu1 %v5454_v22  ;;  %v5514_v21 = vld [vmem:[%s6840_s10 + $0x308] ss:$16 sps:$4 sm:$0xff]   ;;  %v5523_v10 = vld [vmem:[#allocation7 + $0x50] ss:$8 sps:$4 sm:$0xff]  }
 0x3e1   : > { %v2091_v17 = vpop.f32.mrf.mxu0  ;;  %v2204_v39 = vpop.f32.mrf.mxu1  ;;  %3503 = vmatprep.subr.bf16.mxu0 %v5459_v24  ;;  %3544 = vmatprep.subr.bf16.mxu1 %v5462_v25  ;;  %v5519_v22 = vld [vmem:[#allocation7 + $0x74] ss:$8 sps:$4 sm:$0xff]   ;;  %v5520_v24 = vld [vmem:[#allocation7 + $0x60] ss:$8 sps:$4 sm:$0xff]   ;;  %v5528_v26 = vld [vmem:[#allocation7 + $0x44] ss:$8 sps:$4 sm:$0xff]  }
 0x3e2   : > { %v5525_v25 = vld [vmem:[#allocation7 + $0x54] ss:$8 sps:$4 sm:$0xff]   ;;  %v5565_v39 = vld [vmem:[#allocation7 + $0x170] ss:$8 sps:$4 sm:$0xff]  }
 0x3e3   : > { %v2095_v36 = vpop.f32.mrf.mxu0  ;;  %v2208_v38 = vpop.f32.mrf.mxu1  ;;  %v5567_v17 = vld [vmem:[#allocation7 + $0x174] ss:$8 sps:$4 sm:$0xff]  }
 0x3e4   : > { %3504 = vmatpush1.bf16.msra.mxu0 %v5457_v28  ;;  %3545 = vmatpush1.bf16.msra.mxu1 %v5460_v29  ;;  %v5526_v28 = vld [vmem:[#allocation7 + $0x40] ss:$8 sps:$4 sm:$0xff]   ;;  %v5531_v29 = vld [vmem:[#allocation7 + $0x34] ss:$8 sps:$4 sm:$0xff]  }
 0x3e5   : > { %v2097_v42 = vpop.f32.mrf.mxu0  ;;  %v2210_v43 = vpop.f32.mrf.mxu1  ;;  %3505 = vmatprep.subr.bf16.mxu0 %v5465_v33  ;;  %3546 = vmatprep.subr.bf16.mxu1 %v5468_v35  ;;  %v5570_v33 = vld [vmem:[#allocation7 + $0x164] ss:$8 sps:$4 sm:$0xff]   ;;  %v5573_v36 = vld [vmem:[#allocation7 + $0x154] ss:$8 sps:$4 sm:$0xff]   ;;  %v5532_v38 = vld [vmem:[#allocation7 + $0x20] ss:$8 sps:$4 sm:$0xff]  }
 0x3e6   : > { %v5534_v35 = vld [vmem:[#allocation7 + $0x24] ss:$8 sps:$4 sm:$0xff]   ;;  %v5535_v43 = vld [vmem:[#allocation7 + $0x10] ss:$8 sps:$4 sm:$0xff]  }
 0x3e7   : > { %v2099_v46 = vpop.f32.mrf.mxu0  ;;  %v2212_v47 = vpop.f32.mrf.mxu1  ;;  %v5576_v42 = vld [vmem:[#allocation7 + $0x144] ss:$8 sps:$4 sm:$0xff]  }
 0x3e8   : > { %3506 = vmatpush1.bf16.msra.mxu0 %v5463_v40  ;;  %3547 = vmatpush1.bf16.msra.mxu1 %v5466_v41  ;;  %v5571_v40 = vld [vmem:[#allocation7 + $0x150] ss:$8 sps:$4 sm:$0xff]   ;;  %v5537_v41 = vld [vmem:[#allocation7 + $0x14] ss:$8 sps:$4 sm:$0xff]   ;;  %v5538_v47 = vld [vmem:[#allocation7] ss:$8 sps:$4 sm:$0xff]  }
 0x3e9   : > { %v2101_v50 = vpop.f32.mrf.mxu0  ;;  %v2214_v31 = vpop.f32.mrf.mxu1  ;;  %3507 = vmatprep.subr.bf16.mxu0 %v5471_v44  ;;  %3548 = vmatprep.subr.bf16.mxu1 %v5474_v45  ;;  %v5574_v44 = vld [vmem:[#allocation7 + $0x140] ss:$8 sps:$4 sm:$0xff]   ;;  %v5540_v45 = vld [vmem:[#allocation7 + $0x4] ss:$8 sps:$4 sm:$0xff]   ;;  %v5579_v46 = vld [vmem:[#allocation7 + $0x134] ss:$8 sps:$4 sm:$0xff]  }
 0x3ea   : > { %v5582_v50 = vld [vmem:[#allocation7 + $0x124] ss:$8 sps:$4 sm:$0xff]   ;;  %v5541_v31 = vld [vmem:[#allocation7 + $0xf0] ss:$8 sps:$4 sm:$0xff]  }
 0x3ec   : > { %3508 = vmatpush2.bf16.msra.mxu0 %v5469_v32  ;;  %3549 = vmatpush2.bf16.msra.mxu1 %v5472_v30  ;;  %v5577_v32 = vld [vmem:[#allocation7 + $0x130] ss:$8 sps:$4 sm:$0xff]   ;;  %v5543_v30 = vld [vmem:[#allocation7 + $0xf4] ss:$8 sps:$4 sm:$0xff]  }
 0x3ed   : > { %3509 = vmatprep.subr.bf16.mxu0 %v5477_v55  ;;  %3550 = vmatprep.subr.bf16.mxu1 %v5480_v56  ;;  %v5580_v55 = vld [vmem:[#allocation7 + $0x120] ss:$8 sps:$4 sm:$0xff]   ;;  %v5546_v56 = vld [vmem:[#allocation7 + $0xe4] ss:$8 sps:$4 sm:$0xff]  }
 0x3f0   : > { %3510 = vmatpush2.bf16.msra.mxu0 %v5475_v57  ;;  %3551 = vmatpush2.bf16.msra.mxu1 %v5478_v51  ;;  %v5585_v57 = vld [vmem:[#allocation7 + $0x114] ss:$8 sps:$4 sm:$0xff]   ;;  %v5544_v51 = vld [vmem:[#allocation7 + $0xe0] ss:$8 sps:$4 sm:$0xff]  }
 0x3f1   : > { %3511 = vmatprep.subr.bf16.mxu0 %v5483_v58  ;;  %3552 = vmatprep.subr.bf16.mxu1 %v5486_v52  ;;  %v5583_v58 = vld [vmem:[#allocation7 + $0x110] ss:$8 sps:$4 sm:$0xff]   ;;  %v5549_v52 = vld [vmem:[#allocation7 + $0xd4] ss:$8 sps:$4 sm:$0xff]  }
 0x3f4   : > { %3512 = vmatpush2.bf16.msra.mxu0 %v5481_v59  ;;  %3553 = vmatpush2.bf16.msra.mxu1 %v5484_v62  ;;  %v5588_v59 = vld [vmem:[#allocation7 + $0x104] ss:$8 sps:$4 sm:$0xff]   ;;  %v5547_v62 = vld [vmem:[#allocation7 + $0xd0] ss:$8 sps:$4 sm:$0xff]  }
 0x3f5   : > { %3513 = vmatprep.subr.bf16.mxu0 %v5489_v63  ;;  %3554 = vmatprep.subr.bf16.mxu1 %v5492_v0  ;;  %v5586_v63 = vld [vmem:[#allocation7 + $0x100] ss:$8 sps:$4 sm:$0xff]   ;;  %v5552_v0 = vld [vmem:[#allocation7 + $0xc4] ss:$8 sps:$4 sm:$0xff]  }
 0x3f8   : > { %3514 = vmatpush2.bf16.msra.mxu0 %v5487_v2  ;;  %3555 = vmatpush2.bf16.msra.mxu1 %v5490_v3  ;;  %v5591_v2 = vld [vmem:[#allocation7 + $0x1f4] ss:$8 sps:$4 sm:$0xff]   ;;  %v5550_v3 = vld [vmem:[#allocation7 + $0xc0] ss:$8 sps:$4 sm:$0xff]  }
 0x3f9   : > { %3515 = vmatprep.subr.bf16.mxu0 %v5495_v4  ;;  %3556 = vmatprep.subr.bf16.mxu1 %v5498_v53  ;;  %v5589_v4 = vld [vmem:[#allocation7 + $0x1f0] ss:$8 sps:$4 sm:$0xff]   ;;  %v5555_v53 = vld [vmem:[#allocation7 + $0xb4] ss:$8 sps:$4 sm:$0xff]  }
 0x3fc   : > { %3516 = vmatpush2.bf16.msra.mxu0 %v5493_v5  ;;  %3557 = vmatpush2.bf16.msra.mxu1 %v5496_v54  ;;  %v5594_v5 = vld [vmem:[#allocation7 + $0x1e4] ss:$8 sps:$4 sm:$0xff]   ;;  %v5553_v54 = vld [vmem:[#allocation7 + $0xb0] ss:$8 sps:$4 sm:$0xff]  }
 0x3fd   : > { %3517 = vmatprep.subr.bf16.mxu0 %v5501_v6  ;;  %3558 = vmatprep.subr.bf16.mxu1 %v5504_v7  ;;  %v5592_v6 = vld [vmem:[#allocation7 + $0x1e0] ss:$8 sps:$4 sm:$0xff]   ;;  %v5558_v7 = vld [vmem:[#allocation7 + $0xa4] ss:$8 sps:$4 sm:$0xff]  }
 0x400   : > { %3518 = vmatpush2.bf16.msra.mxu0 %v5499_v8  ;;  %3559 = vmatpush2.bf16.msra.mxu1 %v5502_v9  ;;  %v5597_v8 = vld [vmem:[#allocation7 + $0x1d4] ss:$8 sps:$4 sm:$0xff]   ;;  %v5556_v9 = vld [vmem:[#allocation7 + $0xa0] ss:$8 sps:$4 sm:$0xff]  }
 0x401   : > { %3519 = vmatprep.subr.bf16.mxu0 %v5507_v11  ;;  %3560 = vmatprep.subr.bf16.mxu1 %v5510_v12  ;;  %v5595_v11 = vld [vmem:[#allocation7 + $0x1d0] ss:$8 sps:$4 sm:$0xff]   ;;  %v5561_v12 = vld [vmem:[#allocation7 + $0x94] ss:$8 sps:$4 sm:$0xff]  }
 0x404   : > { %3520 = vmatpush2.bf16.msra.mxu0 %v5505_v13  ;;  %3561 = vmatpush2.bf16.msra.mxu1 %v5508_v14  ;;  %v5600_v13 = vld [vmem:[#allocation7 + $0x1c4] ss:$8 sps:$4 sm:$0xff]   ;;  %v5559_v14 = vld [vmem:[#allocation7 + $0x90] ss:$8 sps:$4 sm:$0xff]  }
 0x405   : > { %3521 = vmatprep.subr.bf16.mxu0 %v5513_v15  ;;  %3562 = vmatprep.subr.bf16.mxu1 %v5516_v18  ;;  %v5598_v15 = vld [vmem:[#allocation7 + $0x1c0] ss:$8 sps:$4 sm:$0xff]   ;;  %v5564_v18 = vld [vmem:[#allocation7 + $0x84] ss:$8 sps:$4 sm:$0xff]  }
 0x408   : > { %3522 = vmatpush2.bf16.msra.mxu0 %v5511_v19  ;;  %3563 = vmatpush2.bf16.msra.mxu1 %v5514_v21  ;;  %v5603_v19 = vld [vmem:[#allocation7 + $0x1b4] ss:$8 sps:$4 sm:$0xff]   ;;  %v5562_v21 = vld [vmem:[#allocation7 + $0x80] ss:$8 sps:$4 sm:$0xff]  }
 0x409   : > { %3977 = vmatprep.subr.bf16.mxu0 %v5519_v22  ;;  %4018 = vmatprep.subr.bf16.mxu1 %v5567_v17  ;;  %v5601_v22 = vld [vmem:[#allocation7 + $0x1b0] ss:$8 sps:$4 sm:$0xff]  }
 0x40b   : > { %3524 = vmatmul.mubr.bf16.vlgmr.msra.gmra.mxu0 %v6552_v60  ;;  %3565 = vmatmul.mubr.bf16.vlgmr.msra.gmra.mxu1 %v6554_v61  ;;  %v5529_v60 = vld [vmem:[#allocation7 + $0x30] ss:$8 sps:$4 sm:$0xff]   ;;  %v5568_v61 = vld [vmem:[#allocation7 + $0x160] ss:$8 sps:$4 sm:$0xff]  }
 0x40c   : > { %3978 = vmatpush1.bf16.msra.mxu0 %v5517_v16  ;;  %4019 = vmatpush1.bf16.msra.mxu1 %v5565_v39  ;;  %v5606_v16 = vld [vmem:[#allocation7 + $0x1a4] ss:$8 sps:$4 sm:$0xff]  }
 0x40d   : > { %3979 = vmatprep.subr.bf16.mxu0 %v5522_v23  ;;  %4020 = vmatprep.subr.bf16.mxu1 %v5570_v33  ;;  %v5604_v23 = vld [vmem:[#allocation7 + $0x1a0] ss:$8 sps:$4 sm:$0xff]  }
 0x410   : > { %3980 = vmatpush1.bf16.msra.mxu0 %v5520_v24  ;;  %4021 = vmatpush1.bf16.msra.mxu1 %v5568_v61  ;;  %v5609_v24 = vld [vmem:[#allocation7 + $0x194] ss:$8 sps:$4 sm:$0xff]  }
 0x411   : > { %3981 = vmatprep.subr.bf16.mxu0 %v5525_v25  ;;  %4022 = vmatprep.subr.bf16.mxu1 %v5573_v36  ;;  %v5607_v25 = vld [vmem:[#allocation7 + $0x190] ss:$8 sps:$4 sm:$0xff]  }
 0x414   : > { %3982 = vmatpush1.bf16.msra.mxu0 %v5523_v10  ;;  %4023 = vmatpush1.bf16.msra.mxu1 %v5571_v40  ;;  %v5612_v10 = vld [vmem:[#allocation7 + $0x184] ss:$8 sps:$4 sm:$0xff]  }
 0x415   : > { %3983 = vmatprep.subr.bf16.mxu0 %v5528_v26  ;;  %4024 = vmatprep.subr.bf16.mxu1 %v5576_v42  ;;  %v5610_v26 = vld [vmem:[#allocation7 + $0x180] ss:$8 sps:$4 sm:$0xff]  }
 0x418   : > { %3984 = vmatpush1.bf16.msra.mxu0 %v5526_v28  ;;  %4025 = vmatpush1.bf16.msra.mxu1 %v5574_v44  ;;  %v2747_v28 = vld [vmem:[%s6841_s11] sm:$0xf] }
 0x419   : > { %3985 = vmatprep.subr.bf16.mxu0 %v5531_v29  ;;  %4026 = vmatprep.subr.bf16.mxu1 %v5579_v46  ;;  %v3392_v29 = vrot.slane %v2747_v28, %v6102_v37  ;;  %v3396_v17 = vrot.slane %v2747_v28, %v6235_v27 }
 0x41c   : > { %3986 = vmatpush1.bf16.msra.mxu0 %v5529_v60  ;;  %4027 = vmatpush1.bf16.msra.mxu1 %v5577_v32 }
 0x41d   : > { %3987 = vmatprep.subr.bf16.mxu0 %v5534_v35  ;;  %4028 = vmatprep.subr.bf16.mxu1 %v5582_v50  ;;  %v3404_v50 = vrot.slane %v2747_v28, %v6483_v49 }
 0x420   : > { %3988 = vmatpush1.bf16.msra.mxu0 %v5532_v38  ;;  %4029 = vmatpush1.bf16.msra.mxu1 %v5580_v55 }
 0x421   : > { %3989 = vmatprep.subr.bf16.mxu0 %v5537_v41  ;;  %4030 = vmatprep.subr.bf16.mxu1 %v5585_v57 }
 0x424   : > { %3990 = vmatpush1.bf16.msra.mxu0 %v5535_v43  ;;  %4031 = vmatpush1.bf16.msra.mxu1 %v5583_v58 }
 0x425   : > { %3991 = vmatprep.subr.bf16.mxu0 %v5540_v45  ;;  %4032 = vmatprep.subr.bf16.mxu1 %v5588_v59 }
 0x428   : > { %3992 = vmatpush1.bf16.msra.mxu0 %v5538_v47  ;;  %4033 = vmatpush1.bf16.msra.mxu1 %v5586_v63 }
 0x429   : > { %3993 = vmatprep.subr.bf16.mxu0 %v5543_v30  ;;  %4034 = vmatprep.subr.bf16.mxu1 %v5591_v2  ;;  %v3400_v30 = vrot.slane %v2747_v28, %v6477_v48  ;;  %v5635_v28 = vld [vmem:[#allocation8 + $0xc0] ss:$16 sps:$4 sm:$0xff]  }
 0x42c   : > { %3994 = vmatpush2.bf16.msra.mxu0 %v5541_v31  ;;  %4035 = vmatpush2.bf16.msra.mxu1 %v5589_v4 }
 0x42d   : > { %3995 = vmatprep.subr.bf16.mxu0 %v5546_v56  ;;  %4036 = vmatprep.subr.bf16.mxu1 %v5594_v5 }
 0x430   : > { %3996 = vmatpush2.bf16.msra.mxu0 %v5544_v51  ;;  %4037 = vmatpush2.bf16.msra.mxu1 %v5592_v6  ;;  %v5614_v6 = vld [vmem:[%s6844_s14 + $0x38] sm:$0xff]  }
 0x431   : > { %3997 = vmatprep.subr.bf16.mxu0 %v5549_v52  ;;  %4038 = vmatprep.subr.bf16.mxu1 %v5597_v8  ;;  %v5616_v8 = vld [vmem:[%s6844_s14 + $0x30] sm:$0xff]  }
 0x434   : > { %3998 = vmatpush2.bf16.msra.mxu0 %v5547_v62  ;;  %4039 = vmatpush2.bf16.msra.mxu1 %v5595_v11  ;;  %v5618_v11 = vld [vmem:[%s6844_s14 + $0x28] sm:$0xff]  }
 0x435   : > { %3999 = vmatprep.subr.bf16.mxu0 %v5552_v0  ;;  %4040 = vmatprep.subr.bf16.mxu1 %v5600_v13  ;;  %v5620_v13 = vld [vmem:[%s6844_s14 + $0x20] sm:$0xff]  }
 0x438   : > { %4000 = vmatpush2.bf16.msra.mxu0 %v5550_v3  ;;  %4041 = vmatpush2.bf16.msra.mxu1 %v5598_v15  ;;  %v5622_v15 = vld [vmem:[%s6844_s14 + $0x18] sm:$0xff]  }
 0x439   : > { %4001 = vmatprep.subr.bf16.mxu0 %v5555_v53  ;;  %4042 = vmatprep.subr.bf16.mxu1 %v5603_v19  ;;  %v5624_v19 = vld [vmem:[%s6844_s14 + $0x10] sm:$0xff]  }
 0x43c   : > { %4002 = vmatpush2.bf16.msra.mxu0 %v5553_v54  ;;  %4043 = vmatpush2.bf16.msra.mxu1 %v5601_v22  ;;  %v5613_v54 = vld [vmem:[%s6844_s14 + $0x78] sm:$0xff]   ;;  %v5626_v22 = vld [vmem:[%s6844_s14 + $0x8] sm:$0xff]  }
 0x43d   : > { %4003 = vmatprep.subr.bf16.mxu0 %v5558_v7  ;;  %4044 = vmatprep.subr.bf16.mxu1 %v5606_v16  ;;  %v5615_v7 = vld [vmem:[%s6844_s14 + $0x70] sm:$0xff]   ;;  %v5627_v16 = vld [vmem:[%s6844_s14 + $0x40] sm:$0xff]  }
 0x440   : > { %4004 = vmatpush2.bf16.msra.mxu0 %v5556_v9  ;;  %4045 = vmatpush2.bf16.msra.mxu1 %v5604_v23  ;;  %v5617_v9 = vld [vmem:[%s6844_s14 + $0x68] sm:$0xff]   ;;  %v5628_v23 = vld [vmem:[%s6844_s14] sm:$0xff]  }
 0x441   : > { %4005 = vmatprep.subr.bf16.mxu0 %v5561_v12  ;;  %4046 = vmatprep.subr.bf16.mxu1 %v5609_v24  ;;  %v5619_v12 = vld [vmem:[%s6844_s14 + $0x60] sm:$0xff]  }
 0x442   : > { %v5629_v24 = vld [vmem:[#allocation8 + $0xe0] ss:$16 sps:$4 sm:$0xff]  }
 0x444   : > { %4006 = vmatpush2.bf16.msra.mxu0 %v5559_v14  ;;  %4047 = vmatpush2.bf16.msra.mxu1 %v5607_v25  ;;  %v5621_v14 = vld [vmem:[%s6844_s14 + $0x58] sm:$0xff]  }
 0x445   : > { %4007 = vmatprep.subr.bf16.mxu0 %v5564_v18  ;;  %4048 = vmatprep.subr.bf16.mxu1 %v5612_v10  ;;  %v5623_v18 = vld [vmem:[%s6844_s14 + $0x50] sm:$0xff]   ;;  %v5631_v25 = vld [vmem:[#allocation8 + $0xe4] ss:$16 sps:$4 sm:$0xff]  }
 0x446   : > { %v5634_v10 = vld [vmem:[#allocation8 + $0xec] ss:$16 sps:$4 sm:$0xff]  }
 0x448   : > { %4008 = vmatpush2.bf16.msra.mxu0 %v5562_v21  ;;  %4049 = vmatpush2.bf16.msra.mxu1 %v5610_v26  ;;  %v5625_v21 = vld [vmem:[%s6844_s14 + $0x48] sm:$0xff]  }
 0x449   : > { %5043 = vmatprep.subr.bf16.mxu0 %v5613_v54  ;;  %v5637_v26 = vld [vmem:[#allocation8 + $0xc4] ss:$16 sps:$4 sm:$0xff]   ;;  %4448 = vmatprep.subr.bf16.mxu1 %v5631_v25  ;;  %v5664_v54 = vld [vmem:[#allocation8 + $0x4c] ss:$16 sps:$4 sm:$0xff]  }
 0x48b   : > { %v3443_v39 = vpop.f32.mrf.mxu0  ;;  %v3484_v33 = vpop.f32.mrf.mxu1 }
 0x48c   : > { %v3444_v60 = vadd.f32 %v3443_v39, %v3392_v29  ;;  %v5643_v29 = vld [vmem:[#allocation8 + $0xa4] ss:$16 sps:$4 sm:$0xff]  }
 0x48d   : > { %v3445_v61 = vpop.f32.mrf.mxu0  ;;  %v3486_v35 = vpop.f32.mrf.mxu1  ;;  %v5649_v39 = vld [vmem:[#allocation8 + $0x84] ss:$16 sps:$4 sm:$0xff]  }
 0x48e   : > { %v3485_v36 = vadd.f32 %v3484_v33, %v3444_v60  ;;  %v3446_v38 = vadd.f32 %v3445_v61, %v3396_v17  ;;  %v5641_v17 = vld [vmem:[#allocation8 + $0xa0] ss:$16 sps:$4 sm:$0xff]   ;;  %v5655_v60 = vld [vmem:[#allocation8 + $0x64] ss:$16 sps:$4 sm:$0xff]  }
 0x48f   : > { %v3447_v40 = vpop.f32.mrf.mxu0  ;;  %v3488_v41 = vpop.f32.mrf.mxu1  ;;  %v5647_v33 = vld [vmem:[#allocation8 + $0x80] ss:$16 sps:$4 sm:$0xff]  }
 0x490   : > { %v3487_v42 = vadd.f32 %v3486_v35, %v3446_v38  ;;  %v3573_v43 = vmax.f32 %v3485_v36, 0.0  ;;  %v5653_v61 = vld [vmem:[#allocation8 + $0x60] ss:$16 sps:$4 sm:$0xff]   ;;  %v5661_v35 = vld [vmem:[#allocation8 + $0x44] ss:$16 sps:$4 sm:$0xff]  }
 0x491   : > { %v3448_v44 = vpop.f32.mrf.mxu0  ;;  %v3489_v45 = vpop.f32.mrf.mxu1  ;;  %v5659_v36 = vld [vmem:[#allocation8 + $0x40] ss:$16 sps:$4 sm:$0xff]  }
 0x492   : > { %v3574_v46 = vmax.f32 %v3487_v42, 0.0  ;;  %v3577_v32 = vpack.c.bf16 %v3573_v43, %v3573_v43  ;;  %v3645_v43 = vld [vmem:[%s6843_s13] sm:$0x3] }
 0x493   : > { %v3970_v44 = vrot.slane %v3645_v43, %v6102_v37  ;;  %v3974_v45 = vrot.slane %v3645_v43, %v6235_v27 }
 0x494   : > { %v3578_v47 = vpack.c.bf16 %v3574_v46, %v3574_v46 }
 0x496   : > { %4009 = vmatprep.mubr.bf16.mxu0 %v3578_v47 }
 0x497   : > { %4010 = vmatmul.mubr.bf16.vlgmr.msra.gmra.mxu0 %v3577_v32 }
 0x498   : > { %5044 = vmatpush3.bf16.msra.mxu0 %v5614_v6  ;;  %v5662_v6 = vld [vmem:[#allocation8 + $0x48] ss:$16 sps:$4 sm:$0xff]  }
 0x499   : > { %5045 = vmatprep.subr.bf16.mxu0 %v5615_v7  ;;  %v5667_v7 = vld [vmem:[#allocation8 + $0x24] ss:$16 sps:$4 sm:$0xff]  }
 0x49c   : > { %5046 = vmatpush3.bf16.msra.mxu0 %v5616_v8  ;;  %v5665_v8 = vld [vmem:[#allocation8 + $0x20] ss:$16 sps:$4 sm:$0xff]  }
 0x49d   : > { %5047 = vmatprep.subr.bf16.mxu0 %v5617_v9  ;;  %v5668_v9 = vld [vmem:[#allocation8 + $0x28] ss:$16 sps:$4 sm:$0xff]  }
 0x4a0   : > { %5048 = vmatpush3.bf16.msra.mxu0 %v5618_v11  ;;  %v5673_v11 = vld [vmem:[#allocation8 + $0x4] ss:$16 sps:$4 sm:$0xff]  }
 0x4a1   : > { %5049 = vmatprep.subr.bf16.mxu0 %v5619_v12  ;;  %v5676_v12 = vld [vmem:[#allocation8 + $0xc] ss:$16 sps:$4 sm:$0xff]  }
 0x4a4   : > { %5050 = vmatpush3.bf16.msra.mxu0 %v5620_v13  ;;  %v5671_v13 = vld [vmem:[#allocation8] ss:$16 sps:$4 sm:$0xff]  }
 0x4a5   : > { %5051 = vmatprep.subr.bf16.mxu0 %v5621_v14  ;;  %v5674_v14 = vld [vmem:[#allocation8 + $0x8] ss:$16 sps:$4 sm:$0xff]  }
 0x4a8   : > { %5052 = vmatpush3.bf16.msra.mxu0 %v5622_v15 }
 0x4a9   : > { %5053 = vmatprep.subr.bf16.mxu0 %v5623_v18  ;;  %v4095_v18 = vld [vmem:[%s6845_s15] sm:$0x1] }
 0x4ac   : > { %5054 = vmatpush3.bf16.msra.mxu0 %v5624_v19 }
 0x4ad   : > { %5055 = vmatprep.subr.bf16.mxu0 %v5625_v21 }
 0x4b0   : > { %5056 = vmatpush3.bf16.msra.mxu0 %v5626_v22 }
 0x4b1   : > { %5057 = vmatprep.subr.bf16.mxu0 %v5627_v16 }
 0x4b4   : > { %5058 = vmatpush3.bf16.msra.mxu0 %v5628_v23 }
 0x4b5   : > { %4489 = vmatprep.subr.bf16.mxu0 %v5634_v10  ;;  %v4266_v10 = vld [vmem:[%s6847_s17] sm:$0xf] }
 0x4cb   : > { %v3525_v31 = vpop.f32.mrf.mxu0  ;;  %v3566_v55 = vpop.f32.mrf.mxu1 }
 0x4cc   : > { %v3526_v56 = vadd.f32 %v3525_v31, %v3400_v30 }
 0x4cd   : > { %v3527_v57 = vpop.f32.mrf.mxu0  ;;  %v3568_v51 = vpop.f32.mrf.mxu1 }
 0x4ce   : > { %v3567_v58 = vadd.f32 %v3566_v55, %v3526_v56  ;;  %v3528_v52 = vadd.f32 %v3527_v57, %v3404_v50 }
 0x4cf   : > { %v3529_v59 = vpop.f32.mrf.mxu0  ;;  %v3570_v62 = vpop.f32.mrf.mxu1 }
 0x4d0   : > { %v3569_v63 = vadd.f32 %v3568_v51, %v3528_v52  ;;  %v3575_v0 = vmax.f32 %v3567_v58, 0.0  ;;  %v5632_v52 = vld [vmem:[#allocation8 + $0xe8] ss:$16 sps:$4 sm:$0xff]   ;;  %v5640_v62 = vld [vmem:[#allocation8 + $0xcc] ss:$16 sps:$4 sm:$0xff]  }
 0x4d1   : > { %v3530_v2 = vpop.f32.mrf.mxu0  ;;  %v3571_v3 = vpop.f32.mrf.mxu1 }
 0x4d2   : > { %v3576_v4 = vmax.f32 %v3569_v63, 0.0  ;;  %v3579_v5 = vpack.c.bf16 %v3575_v0, %v3575_v0  ;;  %v5638_v63 = vld [vmem:[#allocation8 + $0xc8] ss:$16 sps:$4 sm:$0xff]   ;;  %v5646_v0 = vld [vmem:[#allocation8 + $0xac] ss:$16 sps:$4 sm:$0xff]  }
 0x4d3   : > { %v5644_v2 = vld [vmem:[#allocation8 + $0xa8] ss:$16 sps:$4 sm:$0xff]   ;;  %v5652_v3 = vld [vmem:[#allocation8 + $0x8c] ss:$16 sps:$4 sm:$0xff]  }
 0x4d4   : > { %v3580_v53 = vpack.c.bf16 %v3576_v4, %v3576_v4  ;;  %v5650_v4 = vld [vmem:[#allocation8 + $0x88] ss:$16 sps:$4 sm:$0xff]  }
 0x4d6   : > { %4050 = vmatprep.mubr.bf16.mxu1 %v3580_v53  ;;  %v5658_v53 = vld [vmem:[#allocation8 + $0x6c] ss:$16 sps:$4 sm:$0xff]  }
 0x4d7   : > { %4051 = vmatmul.mubr.bf16.vlgmr.msra.gmra.mxu1 %v3579_v5  ;;  %v5656_v5 = vld [vmem:[#allocation8 + $0x68] ss:$16 sps:$4 sm:$0xff]  }
 0x4d8   : > { %4480 = vmatprep.mubr.bf16.mxu1 %v5826_v1  ;;  %4449 = vmatpush1.bf16.msra.mxu1 %v5629_v24 }
 0x4d9   : > { %4450 = vmatprep.subr.bf16.mxu1 %v5637_v26  ;;  %v4431_v26 = vrot.slane %v4266_v10, %v6102_v37 }
 0x4dc   : > { %4451 = vmatpush1.bf16.msra.mxu1 %v5635_v28  ;;  %v4439_v28 = vrot.slane %v4266_v10, %v6477_v48 }
 0x4dd   : > { %4452 = vmatprep.subr.bf16.mxu1 %v5643_v29  ;;  %v4435_v29 = vrot.slane %v4266_v10, %v6235_v27 }
 0x4e0   : > { %4453 = vmatpush1.bf16.msra.mxu1 %v5641_v17  ;;  %v4443_v17 = vrot.slane %v4266_v10, %v6483_v49 }
 0x4e1   : > { %4454 = vmatprep.subr.bf16.mxu1 %v5649_v39 }
 0x4e4   : > { %4455 = vmatpush1.bf16.msra.mxu1 %v5647_v33 }
 0x4e5   : > { %4456 = vmatprep.subr.bf16.mxu1 %v5655_v60 }
 0x4e8   : > { %4457 = vmatpush1.bf16.msra.mxu1 %v5653_v61 }
 0x4e9   : > { %4458 = vmatprep.subr.bf16.mxu1 %v5661_v35 }
 0x4ec   : > { %4459 = vmatpush1.bf16.msra.mxu1 %v5659_v36 }
 0x4ed   : > { %4460 = vmatprep.subr.bf16.mxu1 %v5667_v7 }
 0x4f0   : > { %4461 = vmatpush1.bf16.msra.mxu1 %v5665_v8 }
 0x4f1   : > { %4462 = vmatprep.subr.bf16.mxu1 %v5673_v11 }
 0x4f4   : > { %4463 = vmatpush1.bf16.msra.mxu1 %v5671_v13 }
 0x557   : > { %v4011_v38 = vpop.f32.mrf.mxu0 }
 0x558   : > { %v4012_v46 = vadd.f32 %v4011_v38, %v3970_v44 }
 0x559   : > { %v4013_v40 = vpop.f32.mrf.mxu0 }
 0x55a   : > { %v4014_v32 = vadd.f32 %v4013_v40, %v3974_v45 }
 0x55b   : > { %v4015_v41 = vpop.f32.mrf.mxu0 }
 0x55d   : > { %v4016_v42 = vpop.f32.mrf.mxu0 }
 0x597   : > { %v4052_v47 = vpop.f32.mrf.mxu1 }
 0x598   : > { %v4053_v30 = vadd.f32 %v4052_v47, %v4012_v46 }
 0x599   : > { %v4054_v50 = vpop.f32.mrf.mxu1 }
 0x59a   : > { %v4055_v31 = vadd.f32 %v4054_v50, %v4014_v32  ;;  %v4059_v55 = vmax.f32 %v4053_v30, 0.0 }
 0x59b   : > { %v4056_v56 = vpop.f32.mrf.mxu1 }
 0x59c   : > { %v4060_v57 = vmax.f32 %v4055_v31, 0.0  ;;  %v4061_v59 = vpack.c.bf16 %v4059_v55, %v4059_v55 }
 0x59d   : > { %v4057_v51 = vpop.f32.mrf.mxu1 }
 0x59e   : > { %v4062_v58 = vpack.c.bf16 %v4060_v57, %v4060_v57 }
 0x5a0   : > { %4224 = vmatprep.mubr.bf16.mxu0 %v4062_v58 }
 0x5a1   : > { %4225 = vmatmul.mubr.bf16.vlgmr.msra.gmra.mxu0 %v4061_v59 }
 0x5a2   : > { %4490 = vmatpush1.bf16.msra.mxu0 %v5632_v52  ;;  %4521 = vmatprep.mubr.bf16.mxu0 %v5826_v1  ;;  %v5670_v1 = vld [vmem:[#allocation8 + $0x2c] ss:$16 sps:$4 sm:$0xff]  }
 0x5a3   : > { %4491 = vmatprep.subr.bf16.mxu0 %v5640_v62 }
 0x5a6   : > { %4492 = vmatpush1.bf16.msra.mxu0 %v5638_v63 }
 0x5a7   : > { %4493 = vmatprep.subr.bf16.mxu0 %v5646_v0 }
 0x5aa   : > { %4494 = vmatpush1.bf16.msra.mxu0 %v5644_v2 }
 0x5ab   : > { %4495 = vmatprep.subr.bf16.mxu0 %v5652_v3 }
 0x5ae   : > { %4496 = vmatpush1.bf16.msra.mxu0 %v5650_v4 }
 0x5af   : > { %4497 = vmatprep.subr.bf16.mxu0 %v5658_v53 }
 0x5b2   : > { %4498 = vmatpush1.bf16.msra.mxu0 %v5656_v5 }
 0x5b3   : > { %4499 = vmatprep.subr.bf16.mxu0 %v5664_v54 }
 0x5b6   : > { %4500 = vmatpush1.bf16.msra.mxu0 %v5662_v6 }
 0x5b7   : > { %4501 = vmatprep.subr.bf16.mxu0 %v5670_v1 }
 0x5ba   : > { %4502 = vmatpush1.bf16.msra.mxu0 %v5668_v9 }
 0x5bb   : > { %4503 = vmatprep.subr.bf16.mxu0 %v5676_v12 }
 0x5be   : > { %4504 = vmatpush1.bf16.msra.mxu0 %v5674_v14 }
 0x661   : > { %v5059_v15 = vpop.f32.mrf.mxu0 }
 0x663   : > { %v5060_v19 = vpop.f32.mrf.mxu0 }
 0x664   : > { %v5061_v21 = vadd.f32 %v5060_v19, %v5059_v15 }
 0x665   : > { %v5062_v22 = vpop.f32.mrf.mxu0 }
 0x666   : > { %v4227_v16 = vadd.f32 %v5061_v21, %v4095_v18 }
 0x667   : > { %v5063_v23 = vpop.f32.mrf.mxu0 }
 0x668   : > { %v4232_v24 = vmax.f32 %v4227_v16, 0.0 }
 0x66a   : > { %v4233_v25 = vpack.c.bf16 %v4232_v24, %v4232_v24 }
 0x66c   : > { %4481 = vmatmul.mubr.bf16.vlgmr.msra.gmra.mxu1 %v4233_v25  ;;  %4522 = vmatmul.mubr.bf16.vlgmr.msra.gmra.mxu0 %v4233_v25 }
 0x72c   : > { %v4482_v39 = vpop.f32.mrf.mxu1  ;;  %v4523_v33 = vpop.f32.mrf.mxu0 }
 0x72d   : > { %v4483_v35 = vadd.f32 %v4482_v39, %v4431_v26  ;;  %v4524_v36 = vadd.f32 %v4523_v33, %v4439_v28 }
 0x72e   : > { %v4484_v60 = vpop.f32.mrf.mxu1  ;;  %v4525_v61 = vpop.f32.mrf.mxu0 }
 0x72f   : > { %v4485_v38 = vadd.f32 %v4484_v60, %v4435_v29  ;;  %v4526_v40 = vadd.f32 %v4525_v61, %v4443_v17 }
 0x730   : > { %v4486_v41 = vpop.f32.mrf.mxu1  ;;  %v4527_v42 = vpop.f32.mrf.mxu0 }
 0x731   : > { %v4534_v43 = vcombine.low %v4483_v35, %v4485_v38  ;;  %v4535_v44 = vcombine.low %v4524_v36, %v4526_v40 }
 0x732   : > { %v4487_v37 = vpop.f32.mrf.mxu1  ;;  %v4528_v45 = vpop.f32.mrf.mxu0 }
 0x733   : > { %v4542_v48 = vrot.slane %v4534_v43, %v6530_v20  ;;  %v4549_v27 = vrot.slane %v4535_v44, %v6530_v20 }
 0x735   : > { %v4550_v49 = vcombine.low %v4542_v48, %v4549_v27 }
 0x737   : > { %v4557_v46 = vrot.slane %v4550_v49, %v6530_v20 }
 0x739   : > { %4563 = vst.msk [vmem:[%s674_s28] sm:$0xf] %vm6535_vm1, %v4557_v46 }
 0x73a PF: > { %s31_s29 = sadd.s32 1, %s5815_s29   ;;  %s6873_s27 = sld [smem:[#allocation13_spill]] }
 0x73b   : > { %p28_p3 = scmp.ge.s32.totalorder %s31_s29, 4   ;;  %s6874_s28 = sld [smem:[#allocation14_spill]] }
 0x73d   :  { %30 = sbr.rel (!%p28_p3) target bundleno = 9 (0x9), region = 154 }
 0x742   :  { %4583 = vsyncpa [#allocation4], 1 }
 0x743   :  { %4585 = vsyncpa [#allocation4 + $0x1], 1 }
 0x744   :  { %4586 = vsyncpa [#allocation6], 1 }
 0x745   :  { %4587 = vsyncpa [#allocation9], 1 }

</bundles_post_ra>
